<compile_context>
chip_gen: v7x
topology: tpu7x:2x2x1
jax: 0.10.0
libtpu: 0.0.40
codegen_flags: <defaults>
</compile_context>

<pallas_src>
import functools

import jax
import jax.numpy as jnp
from jax import lax
from jax.experimental import pallas as pl
from jax.experimental.pallas import tpu as pltpu


_STATIC_UNROLL_MAX = 32  # static Python unroll up to this tile; fori_loop beyond


# ------------------------------------------------------------------ kernel ---
def _encoder_ocd_kernel(x_ref, fw1_ref, fb1_ref, fw2_ref, fb2_ref,
                        hw1_ref, hb1_ref, hw2_ref, hb2_ref, hw3_ref,
                        o_ref, acc_ref):
    # x_ref  : (LT, B, IN)        bf16    fw1_ref: (LT, IN, 4*O)  bf16
    # fb1_ref: (LT, 1, 4*O) f32           fw2_ref: (LT, 4*O, O)   bf16
    # fb2_ref: (LT, 1, O)   f32           hw1_ref: (LT*O, D1)     bf16
    # hb1_ref: (1, D1) f32   hw2_ref: (D1, D2) bf16   hb2_ref: (1, D2) f32
    # hw3_ref: (D2, D3) bf16  o_ref: (B, D3) f32   acc_ref: (B, D1) f32 scratch
    i = pl.program_id(0)
    lt = x_ref.shape[0]
    out_size = fw2_ref.shape[2]

    @pl.when(i == 0)
    def _init():
        acc_ref[...] = jnp.zeros_like(acc_ref)

    def contribution(xl, w1l, b1l, w2l, b2l, hw1l):
        # Per-position MLP: ReLU(x@W1+b1) -> ReLU(h@W2+b2), then project the
        # 8-wide feature straight onto the head's first layer rows.
        h = jnp.dot(xl, w1l, preferred_element_type=jnp.float32)
        h = jnp.maximum(h + b1l, 0.0)                               # ReLU
        y = jnp.dot(h.astype(jnp.bfloat16), w2l,
                    preferred_element_type=jnp.float32)
        y = jnp.maximum(y + b2l, 0.0)                               # ReLU
        return jnp.dot(y.astype(jnp.bfloat16), hw1l,
                       preferred_element_type=jnp.float32)

    if lt <= _STATIC_UNROLL_MAX:
        for l in range(lt):                       # static unroll, static slices
            acc_ref[...] += contribution(
                x_ref[l], fw1_ref[l], fb1_ref[l], fw2_ref[l], fb2_ref[l],
                hw1_ref[l * out_size:(l + 1) * out_size, :])
    else:
        def body(l, carry):                       # bounded-register partial unroll
            r0 = pl.multiple_of(l * out_size, out_size)
            acc_ref[...] += contribution(
                x_ref[l], fw1_ref[l], fb1_ref[l], fw2_ref[l], fb2_ref[l],
                hw1_ref[pl.ds(r0, out_size), :])
            return carry
        lax.fori_loop(0, lt, body, 0, unroll=8)

    @pl.when(i == pl.num_programs(0) - 1)
    def _finalize():
        h = jnp.maximum(acc_ref[...] + hb1_ref[...], 0.0)           # ReLU
        h = jnp.dot(h.astype(jnp.bfloat16), hw2_ref[...],
                    preferred_element_type=jnp.float32) + hb2_ref[...]
        h = jnp.maximum(h, 0.0)                                     # ReLU
        y = jnp.dot(h.astype(jnp.bfloat16), hw3_ref[...],
                    preferred_element_type=jnp.float32)
        o_ref[...] = jnp.clip(y, 0.0, 6.0)                          # ReLU6


# ------------------------------------------------------- param preparation ---
def prepare_params(params, l_tile=32):
    """One-time prep: transpose to x@W form, zero-pad the position axis to a
    multiple of l_tile, stream weights as bf16 (biases stay f32)."""
    bf = jnp.bfloat16
    fw1 = jnp.transpose(params["feat_w1"], (0, 2, 1))        # (L, IN, 4*O)
    fb1 = params["feat_b1"][:, None, :]                      # (L, 1, 4*O)
    fw2 = jnp.transpose(params["feat_w2"], (0, 2, 1))        # (L, 4*O, O)
    fb2 = params["feat_b2"][:, None, :]                      # (L, 1, O)
    hw1 = params["ocd_w1"].T                                 # (L*O, D1)

    L = fw1.shape[0]
    out_size = fw2.shape[2]
    l_tile = max(1, min(l_tile, L))
    n_tiles = pl.cdiv(L, l_tile)
    L_pad = n_tiles * l_tile
    pad = L_pad - L
    if pad:
        # Zero-padded positions produce exactly-zero features (ReLU(x@0+0)=0)
        # and zero hw1 rows, so the head output is unchanged.
        fw1 = jnp.pad(fw1, ((0, pad), (0, 0), (0, 0)))
        fb1 = jnp.pad(fb1, ((0, pad), (0, 0), (0, 0)))
        fw2 = jnp.pad(fw2, ((0, pad), (0, 0), (0, 0)))
        fb2 = jnp.pad(fb2, ((0, pad), (0, 0), (0, 0)))
        hw1 = jnp.pad(hw1, ((0, pad * out_size), (0, 0)))

    return {
        "fw1": fw1.astype(bf), "fb1": fb1.astype(jnp.float32),
        "fw2": fw2.astype(bf), "fb2": fb2.astype(jnp.float32),
        "hw1": hw1.astype(bf),
        "hb1": params["ocd_b1"][None, :].astype(jnp.float32),
        "hw2": params["ocd_w2"].T.astype(bf),
        "hb2": params["ocd_b2"][None, :].astype(jnp.float32),
        "hw3": params["ocd_w3"].T.astype(bf),
    }


# ------------------------------------------------------------------ wrapper --
@functools.partial(jax.jit, static_argnames=("l_tile",))
def encoder_ocd_forward(x, prep, l_tile=32):
    # x: (B, IN=512, L) float32, PyTorch layout; x[:, :, i] feeds position i.
    B, in_size, L = x.shape
    L_pad, _, hid = prep["fw1"].shape
    out_size = prep["fw2"].shape[2]
    d0, d1 = prep["hw1"].shape
    d2 = prep["hw2"].shape[1]
    d3 = prep["hw3"].shape[1]
    l_tile = max(1, min(l_tile, L_pad))
    assert L_pad % l_tile == 0, (L_pad, l_tile)
    assert d0 == L_pad * out_size, (d0, L_pad, out_size)
    n_tiles = L_pad // l_tile

    # Single fused transpose+cast of the activation tensor (tiny vs the bf16
    # weight stream); pad the position axis to match the padded weights.
    x_t = jnp.transpose(x, (2, 0, 1)).astype(jnp.bfloat16)    # (L, B, IN)
    if L_pad > L:
        x_t = jnp.pad(x_t, ((0, L_pad - L), (0, 0), (0, 0)))

    flops = 2 * B * (L_pad * (in_size * hid + hid * out_size + out_size * d1)
                     + d1 * d2 + d2 * d3)
    bytes_accessed = (
        2 * (prep["fw1"].size + prep["fw2"].size + prep["hw1"].size
             + prep["hw2"].size + prep["hw3"].size + x_t.size)
        + 4 * (prep["fb1"].size + prep["fb2"].size + prep["hb1"].size
               + prep["hb2"].size + B * d3))

    return pl.pallas_call(
        _encoder_ocd_kernel,
        out_shape=jax.ShapeDtypeStruct((B, d3), jnp.float32),
        grid=(n_tiles,),
        in_specs=[
            pl.BlockSpec((l_tile, B, in_size), lambda i: (i, 0, 0)),   # x
            pl.BlockSpec((l_tile, in_size, hid), lambda i: (i, 0, 0)), # fw1
            pl.BlockSpec((l_tile, 1, hid), lambda i: (i, 0, 0)),       # fb1
            pl.BlockSpec((l_tile, hid, out_size), lambda i: (i, 0, 0)),# fw2
            pl.BlockSpec((l_tile, 1, out_size), lambda i: (i, 0, 0)),  # fb2
            pl.BlockSpec((l_tile * out_size, d1), lambda i: (i, 0)),   # hw1 (streamed)
            pl.BlockSpec((1, d1), lambda i: (0, 0)),                   # hb1 (resident)
            pl.BlockSpec((d1, d2), lambda i: (0, 0)),                  # hw2 (resident)
            pl.BlockSpec((1, d2), lambda i: (0, 0)),                   # hb2 (resident)
            pl.BlockSpec((d2, d3), lambda i: (0, 0)),                  # hw3 (resident)
        ],
        out_specs=pl.BlockSpec((B, d3), lambda i: (0, 0)),
        scratch_shapes=[pltpu.VMEM((B, d1), jnp.float32)],             # head-1 acc
        compiler_params=pltpu.CompilerParams(
            dimension_semantics=("arbitrary",)),   # grid carries the accumulator
        cost_estimate=pl.CostEstimate(
            flops=flops, transcendentals=0, bytes_accessed=bytes_accessed),
    )(x_t, prep["fw1"], prep["fb1"], prep["fw2"], prep["fb2"],
      prep["hw1"], prep["hb1"], prep["hw2"], prep["hb2"], prep["hw3"])


# ---------------------------------------------------------- param init + ref --
def init_params(key, inplanes, in_size=512, out_size=8, dims=(512, 256, 6)):
    """Deterministic torch-Linear-style uniform(-1/sqrt(fan_in), 1/sqrt(fan_in))."""
    ks = jax.random.split(key, 9)
    d0 = out_size * inplanes
    d1, d2, d3 = dims

    def uni(k, shape, fan_in):
        bound = 1.0 / jnp.sqrt(float(fan_in))
        return jax.random.uniform(k, shape, jnp.float32, -bound, bound)

    return {
        "feat_w1": uni(ks[0], (inplanes, 4 * out_size, in_size), in_size),
        "feat_b1": uni(ks[1], (inplanes, 4 * out_size), in_size),
        "feat_w2": uni(ks[2], (inplanes, out_size, 4 * out_size), 4 * out_size),
        "feat_b2": uni(ks[3], (inplanes, out_size), 4 * out_size),
        "ocd_w1": uni(ks[4], (d1, d0), d0),
        "ocd_b1": uni(ks[5], (d1,), d0),
        "ocd_w2": uni(ks[6], (d2, d1), d1),
        "ocd_b2": uni(ks[7], (d2,), d1),
        "ocd_w3": uni(ks[8], (d3, d2), d2),  # bias=False
    }


def reference(x, params):
    """Pure-JAX reference with the same bf16-stream / f32-accumulate numerics."""
    bf = jnp.bfloat16
    B, _, L = x.shape
    xb = x.astype(bf)
    feats = []
    for i in range(L):
        xi = xb[:, :, i]
        h = jnp.dot(xi, params["feat_w1"][i].astype(bf).T,
                    preferred_element_type=jnp.float32) + params["feat_b1"][i]
        h = jnp.maximum(h, 0.0).astype(bf)
        y = jnp.dot(h, params["feat_w2"][i].astype(bf).T,
                    preferred_element_type=jnp.float32) + params["feat_b2"][i]
        feats.append(jnp.maximum(y, 0.0)[:, None, :])
    f = jnp.concatenate(feats, axis=1).reshape(B, -1).astype(bf)   # (B, L*8)
    h = jnp.dot(f, params["ocd_w1"].astype(bf).T,
                preferred_element_type=jnp.float32) + params["ocd_b1"]
    h = jnp.maximum(h, 0.0).astype(bf)
    h = jnp.dot(h, params["ocd_w2"].astype(bf).T,
                preferred_element_type=jnp.float32) + params["ocd_b2"]
    h = jnp.maximum(h, 0.0).astype(bf)
    y = jnp.dot(h, params["ocd_w3"].astype(bf).T,
                preferred_element_type=jnp.float32)
    return jnp.clip(y, 0.0, 6.0)


# ---------------------------------------------------------------------- main --
if __name__ == "__main__":
    # Small-but-faithful config: inplanes reduced 196 -> 28 (deliberately NOT a
    # multiple of the tile so the zero-padding path is exercised); in_size and
    # the head dims are the module's hard-coded 512 / 512 / 256 / 6.
    B, in_size, inplanes, out_size = 2, 512, 28, 8
    L_TILE = 16   # -> L_pad=32, 2 pipelined grid steps, 4 zero-padded positions

    key = jax.random.PRNGKey(0)
    k_x, k_p = jax.random.split(key)
    x = jax.random.normal(k_x, (B, in_size, inplanes), jnp.float32)
    params = init_params(k_p, inplanes, in_size=in_size, out_size=out_size)
    prep = prepare_params(params, l_tile=L_TILE)

    out = jax.block_until_ready(encoder_ocd_forward(x, prep, l_tile=L_TILE))
    ref = jax.block_until_ready(reference(x, params))

    assert out.shape == (B, 6), out.shape
    assert jnp.allclose(out, ref, rtol=1e-3, atol=1e-3), (out, ref)
    print("KERNEL_OK")
</pallas_src>

<mosaic_0001>
module attributes {stable_mosaic.version = 11 : i64} {
  func.func @_encoder_ocd_kernel(%arg0: i32, %arg1: memref<16x2x512xbf16, #tpu.memory_space<vmem>>, %arg2: memref<16x512x32xbf16, #tpu.memory_space<vmem>>, %arg3: memref<16x1x32xf32, #tpu.memory_space<vmem>>, %arg4: memref<16x32x8xbf16, #tpu.memory_space<vmem>>, %arg5: memref<16x1x8xf32, #tpu.memory_space<vmem>>, %arg6: memref<128x512xbf16, #tpu.memory_space<vmem>>, %arg7: memref<1x512xf32, #tpu.memory_space<vmem>>, %arg8: memref<512x256xbf16, #tpu.memory_space<vmem>>, %arg9: memref<1x256xf32, #tpu.memory_space<vmem>>, %arg10: memref<256x6xbf16, #tpu.memory_space<vmem>>, %arg11: memref<2x6xf32, #tpu.memory_space<vmem>>, %arg12: memref<2x512xf32, #tpu.memory_space<vmem>>) attributes {dimension_semantics = [#tpu.dimension_semantics<arbitrary>], iteration_bounds = array<i64: 2>, scalar_prefetch = 0 : i64, scratch_operands = 1 : i64, tpu.core_type = #tpu.core_type<tc>, window_params = [{transform_indices = @transform_0, window_bounds = array<i64: 16, 2, 512>}, {transform_indices = @transform_1, window_bounds = array<i64: 16, 512, 32>}, {transform_indices = @transform_2, window_bounds = array<i64: 16, 1, 32>}, {transform_indices = @transform_3, window_bounds = array<i64: 16, 32, 8>}, {transform_indices = @transform_4, window_bounds = array<i64: 16, 1, 8>}, {transform_indices = @transform_5, window_bounds = array<i64: 128, 512>}, {pipeline_mode = #tpu.pipeline_mode<synchronous>, transform_indices = @transform_6, window_bounds = array<i64: 1, 512>}, {pipeline_mode = #tpu.pipeline_mode<synchronous>, transform_indices = @transform_7, window_bounds = array<i64: 512, 256>}, {pipeline_mode = #tpu.pipeline_mode<synchronous>, transform_indices = @transform_8, window_bounds = array<i64: 1, 256>}, {pipeline_mode = #tpu.pipeline_mode<synchronous>, transform_indices = @transform_9, window_bounds = array<i64: 256, 6>}, {pipeline_mode = #tpu.pipeline_mode<synchronous>, transform_indices = @transform_10, window_bounds = array<i64: 2, 6>}]} {
    %c0_i32 = arith.constant 0 : i32
    %0 = arith.cmpi eq, %arg0, %c0_i32 : i32
    %1 = arith.extui %0 : i1 to i32
    %c0_i32_0 = arith.constant 0 : i32
    %2 = arith.cmpi ne, %1, %c0_i32_0 : i32
    scf.if %2 {
      %cst_387 = arith.constant 0.000000e+00 : f32
      %438 = vector.broadcast %cst_387 : f32 to vector<2x512xf32>
      %c0_388 = arith.constant 0 : index
      %c0_389 = arith.constant 0 : index
      %439 = vector.load %arg12[%c0_388, %c0_389] : memref<2x512xf32, #tpu.memory_space<vmem>>, vector<2x512xf32>
      tpu.vector_store %arg12[%c0_388, %c0_389], %438 {strides = array<i32>} : memref<2x512xf32, #tpu.memory_space<vmem>>, vector<2x512xf32>,
    } else {
    }
    %c0 = arith.constant 0 : index
    %c0_1 = arith.constant 0 : index
    %3 = vector.load %arg12[%c0, %c0_1] : memref<2x512xf32, #tpu.memory_space<vmem>>, vector<2x512xf32>
    %c0_2 = arith.constant 0 : index
    %c0_3 = arith.constant 0 : index
    %c0_4 = arith.constant 0 : index
    %4 = vector.load %arg1[%c0_2, %c0_3, %c0_4] : memref<16x2x512xbf16, #tpu.memory_space<vmem>>, vector<1x2x512xbf16>
    %5 = vector.shape_cast %4 : vector<1x2x512xbf16> to vector<2x512xbf16>
    %c0_5 = arith.constant 0 : index
    %c0_6 = arith.constant 0 : index
    %c0_7 = arith.constant 0 : index
    %6 = vector.load %arg2[%c0_5, %c0_6, %c0_7] : memref<16x512x32xbf16, #tpu.memory_space<vmem>>, vector<1x512x32xbf16>
    %7 = vector.shape_cast %6 : vector<1x512x32xbf16> to vector<512x32xbf16>
    %c0_8 = arith.constant 0 : index
    %c0_9 = arith.constant 0 : index
    %c0_10 = arith.constant 0 : index
    %8 = vector.load %arg3[%c0_8, %c0_9, %c0_10] : memref<16x1x32xf32, #tpu.memory_space<vmem>>, vector<1x1x32xf32>
    %9 = vector.shape_cast %8 : vector<1x1x32xf32> to vector<1x32xf32>
    %c0_11 = arith.constant 0 : index
    %c0_12 = arith.constant 0 : index
    %c0_13 = arith.constant 0 : index
    %10 = vector.load %arg4[%c0_11, %c0_12, %c0_13] : memref<16x32x8xbf16, #tpu.memory_space<vmem>>, vector<1x32x8xbf16>
    %11 = vector.shape_cast %10 : vector<1x32x8xbf16> to vector<32x8xbf16>
    %c0_14 = arith.constant 0 : index
    %c0_15 = arith.constant 0 : index
    %c0_16 = arith.constant 0 : index
    %12 = vector.load %arg5[%c0_14, %c0_15, %c0_16] : memref<16x1x8xf32, #tpu.memory_space<vmem>>, vector<1x1x8xf32>
    %13 = vector.shape_cast %12 : vector<1x1x8xf32> to vector<1x8xf32>
    %c0_17 = arith.constant 0 : index
    %c0_18 = arith.constant 0 : index
    %14 = vector.load %arg6[%c0_17, %c0_18] : memref<128x512xbf16, #tpu.memory_space<vmem>>, vector<8x512xbf16>
    %cst = arith.constant dense<0.000000e+00> : vector<2x32xf32>
    %15 = tpu.matmul %5, %7, %cst {dimension_numbers = #tpu.dot_dimension_numbers<[1], [0], [0], [1], [0, 0, 1, 1], [], []>} : vector<2x512xbf16>, vector<512x32xbf16>, vector<2x32xf32> -> vector<2x32xf32>
    %16 = vector.broadcast %9 : vector<1x32xf32> to vector<2x32xf32>
    %17 = arith.addf %15, %16 : vector<2x32xf32>
    %cst_19 = arith.constant 0.000000e+00 : f32
    %18 = vector.broadcast %cst_19 : f32 to vector<2x32xf32>
    %19 = arith.maximumf %17, %18 : vector<2x32xf32>
    %20 = arith.truncf %19 : vector<2x32xf32> to vector<2x32xbf16>
    %cst_20 = arith.constant dense<0.000000e+00> : vector<2x8xf32>
    %21 = tpu.matmul %20, %11, %cst_20 {dimension_numbers = #tpu.dot_dimension_numbers<[1], [0], [0], [1], [0, 0, 1, 1], [], []>} : vector<2x32xbf16>, vector<32x8xbf16>, vector<2x8xf32> -> vector<2x8xf32>
    %22 = vector.broadcast %13 : vector<1x8xf32> to vector<2x8xf32>
    %23 = arith.addf %21, %22 : vector<2x8xf32>
    %cst_21 = arith.constant 0.000000e+00 : f32
    %24 = vector.broadcast %cst_21 : f32 to vector<2x8xf32>
    %25 = arith.maximumf %23, %24 : vector<2x8xf32>
    %26 = arith.truncf %25 : vector<2x8xf32> to vector<2x8xbf16>
    %cst_22 = arith.constant dense<0.000000e+00> : vector<2x512xf32>
    %27 = tpu.matmul %26, %14, %cst_22 {dimension_numbers = #tpu.dot_dimension_numbers<[1], [0], [0], [1], [0, 0, 1, 1], [], []>} : vector<2x8xbf16>, vector<8x512xbf16>, vector<2x512xf32> -> vector<2x512xf32>
    %28 = arith.addf %3, %27 : vector<2x512xf32>
    %c0_23 = arith.constant 0 : index
    %c0_24 = arith.constant 0 : index
    %29 = vector.load %arg12[%c0_23, %c0_24] : memref<2x512xf32, #tpu.memory_space<vmem>>, vector<2x512xf32>
    tpu.vector_store %arg12[%c0_23, %c0_24], %28 {strides = array<i32>} : memref<2x512xf32, #tpu.memory_space<vmem>>, vector<2x512xf32>,
    %c0_25 = arith.constant 0 : index
    %c0_26 = arith.constant 0 : index
    %30 = vector.load %arg12[%c0_25, %c0_26] : memref<2x512xf32, #tpu.memory_space<vmem>>, vector<2x512xf32>
    %c1 = arith.constant 1 : index
    %c0_27 = arith.constant 0 : index
    %c0_28 = arith.constant 0 : index
    %31 = vector.load %arg1[%c1, %c0_27, %c0_28] : memref<16x2x512xbf16, #tpu.memory_space<vmem>>, vector<1x2x512xbf16>
    %32 = vector.shape_cast %31 : vector<1x2x512xbf16> to vector<2x512xbf16>
    %c1_29 = arith.constant 1 : index
    %c0_30 = arith.constant 0 : index
    %c0_31 = arith.constant 0 : index
    %33 = vector.load %arg2[%c1_29, %c0_30, %c0_31] : memref<16x512x32xbf16, #tpu.memory_space<vmem>>, vector<1x512x32xbf16>
    %34 = vector.shape_cast %33 : vector<1x512x32xbf16> to vector<512x32xbf16>
    %c1_32 = arith.constant 1 : index
    %c0_33 = arith.constant 0 : index
    %c0_34 = arith.constant 0 : index
    %35 = vector.load %arg3[%c1_32, %c0_33, %c0_34] : memref<16x1x32xf32, #tpu.memory_space<vmem>>, vector<1x1x32xf32>
    %36 = vector.shape_cast %35 : vector<1x1x32xf32> to vector<1x32xf32>
    %c1_35 = arith.constant 1 : index
    %c0_36 = arith.constant 0 : index
    %c0_37 = arith.constant 0 : index
    %37 = vector.load %arg4[%c1_35, %c0_36, %c0_37] : memref<16x32x8xbf16, #tpu.memory_space<vmem>>, vector<1x32x8xbf16>
    %38 = vector.shape_cast %37 : vector<1x32x8xbf16> to vector<32x8xbf16>
    %c1_38 = arith.constant 1 : index
    %c0_39 = arith.constant 0 : index
    %c0_40 = arith.constant 0 : index
    %39 = vector.load %arg5[%c1_38, %c0_39, %c0_40] : memref<16x1x8xf32, #tpu.memory_space<vmem>>, vector<1x1x8xf32>
    %40 = vector.shape_cast %39 : vector<1x1x8xf32> to vector<1x8xf32>
    %c8 = arith.constant 8 : index
    %c0_41 = arith.constant 0 : index
    %41 = vector.load %arg6[%c8, %c0_41] : memref<128x512xbf16, #tpu.memory_space<vmem>>, vector<8x512xbf16>
    %cst_42 = arith.constant dense<0.000000e+00> : vector<2x32xf32>
    %42 = tpu.matmul %32, %34, %cst_42 {dimension_numbers = #tpu.dot_dimension_numbers<[1], [0], [0], [1], [0, 0, 1, 1], [], []>} : vector<2x512xbf16>, vector<512x32xbf16>, vector<2x32xf32> -> vector<2x32xf32>
    %43 = vector.broadcast %36 : vector<1x32xf32> to vector<2x32xf32>
    %44 = arith.addf %42, %43 : vector<2x32xf32>
    %cst_43 = arith.constant 0.000000e+00 : f32
    %45 = vector.broadcast %cst_43 : f32 to vector<2x32xf32>
    %46 = arith.maximumf %44, %45 : vector<2x32xf32>
    %47 = arith.truncf %46 : vector<2x32xf32> to vector<2x32xbf16>
    %cst_44 = arith.constant dense<0.000000e+00> : vector<2x8xf32>
    %48 = tpu.matmul %47, %38, %cst_44 {dimension_numbers = #tpu.dot_dimension_numbers<[1], [0], [0], [1], [0, 0, 1, 1], [], []>} : vector<2x32xbf16>, vector<32x8xbf16>, vector<2x8xf32> -> vector<2x8xf32>
    %49 = vector.broadcast %40 : vector<1x8xf32> to vector<2x8xf32>
    %50 = arith.addf %48, %49 : vector<2x8xf32>
    %cst_45 = arith.constant 0.000000e+00 : f32
    %51 = vector.broadcast %cst_45 : f32 to vector<2x8xf32>
    %52 = arith.maximumf %50, %51 : vector<2x8xf32>
    %53 = arith.truncf %52 : vector<2x8xf32> to vector<2x8xbf16>
    %cst_46 = arith.constant dense<0.000000e+00> : vector<2x512xf32>
    %54 = tpu.matmul %53, %41, %cst_46 {dimension_numbers = #tpu.dot_dimension_numbers<[1], [0], [0], [1], [0, 0, 1, 1], [], []>} : vector<2x8xbf16>, vector<8x512xbf16>, vector<2x512xf32> -> vector<2x512xf32>
    %55 = arith.addf %30, %54 : vector<2x512xf32>
    %c0_47 = arith.constant 0 : index
    %c0_48 = arith.constant 0 : index
    %56 = vector.load %arg12[%c0_47, %c0_48] : memref<2x512xf32, #tpu.memory_space<vmem>>, vector<2x512xf32>
    tpu.vector_store %arg12[%c0_47, %c0_48], %55 {strides = array<i32>} : memref<2x512xf32, #tpu.memory_space<vmem>>, vector<2x512xf32>,
    %c0_49 = arith.constant 0 : index
    %c0_50 = arith.constant 0 : index
    %57 = vector.load %arg12[%c0_49, %c0_50] : memref<2x512xf32, #tpu.memory_space<vmem>>, vector<2x512xf32>
    %c2 = arith.constant 2 : index
    %c0_51 = arith.constant 0 : index
    %c0_52 = arith.constant 0 : index
    %58 = vector.load %arg1[%c2, %c0_51, %c0_52] : memref<16x2x512xbf16, #tpu.memory_space<vmem>>, vector<1x2x512xbf16>
    %59 = vector.shape_cast %58 : vector<1x2x512xbf16> to vector<2x512xbf16>
    %c2_53 = arith.constant 2 : index
    %c0_54 = arith.constant 0 : index
    %c0_55 = arith.constant 0 : index
    %60 = vector.load %arg2[%c2_53, %c0_54, %c0_55] : memref<16x512x32xbf16, #tpu.memory_space<vmem>>, vector<1x512x32xbf16>
    %61 = vector.shape_cast %60 : vector<1x512x32xbf16> to vector<512x32xbf16>
    %c2_56 = arith.constant 2 : index
    %c0_57 = arith.constant 0 : index
    %c0_58 = arith.constant 0 : index
    %62 = vector.load %arg3[%c2_56, %c0_57, %c0_58] : memref<16x1x32xf32, #tpu.memory_space<vmem>>, vector<1x1x32xf32>
    %63 = vector.shape_cast %62 : vector<1x1x32xf32> to vector<1x32xf32>
    %c2_59 = arith.constant 2 : index
    %c0_60 = arith.constant 0 : index
    %c0_61 = arith.constant 0 : index
    %64 = vector.load %arg4[%c2_59, %c0_60, %c0_61] : memref<16x32x8xbf16, #tpu.memory_space<vmem>>, vector<1x32x8xbf16>
    %65 = vector.shape_cast %64 : vector<1x32x8xbf16> to vector<32x8xbf16>
    %c2_62 = arith.constant 2 : index
    %c0_63 = arith.constant 0 : index
    %c0_64 = arith.constant 0 : index
    %66 = vector.load %arg5[%c2_62, %c0_63, %c0_64] : memref<16x1x8xf32, #tpu.memory_space<vmem>>, vector<1x1x8xf32>
    %67 = vector.shape_cast %66 : vector<1x1x8xf32> to vector<1x8xf32>
    %c16 = arith.constant 16 : index
    %c0_65 = arith.constant 0 : index
    %68 = vector.load %arg6[%c16, %c0_65] : memref<128x512xbf16, #tpu.memory_space<vmem>>, vector<8x512xbf16>
    %cst_66 = arith.constant dense<0.000000e+00> : vector<2x32xf32>
    %69 = tpu.matmul %59, %61, %cst_66 {dimension_numbers = #tpu.dot_dimension_numbers<[1], [0], [0], [1], [0, 0, 1, 1], [], []>} : vector<2x512xbf16>, vector<512x32xbf16>, vector<2x32xf32> -> vector<2x32xf32>
    %70 = vector.broadcast %63 : vector<1x32xf32> to vector<2x32xf32>
    %71 = arith.addf %69, %70 : vector<2x32xf32>
    %cst_67 = arith.constant 0.000000e+00 : f32
    %72 = vector.broadcast %cst_67 : f32 to vector<2x32xf32>
    %73 = arith.maximumf %71, %72 : vector<2x32xf32>
    %74 = arith.truncf %73 : vector<2x32xf32> to vector<2x32xbf16>
    %cst_68 = arith.constant dense<0.000000e+00> : vector<2x8xf32>
    %75 = tpu.matmul %74, %65, %cst_68 {dimension_numbers = #tpu.dot_dimension_numbers<[1], [0], [0], [1], [0, 0, 1, 1], [], []>} : vector<2x32xbf16>, vector<32x8xbf16>, vector<2x8xf32> -> vector<2x8xf32>
    %76 = vector.broadcast %67 : vector<1x8xf32> to vector<2x8xf32>
    %77 = arith.addf %75, %76 : vector<2x8xf32>
    %cst_69 = arith.constant 0.000000e+00 : f32
    %78 = vector.broadcast %cst_69 : f32 to vector<2x8xf32>
    %79 = arith.maximumf %77, %78 : vector<2x8xf32>
    %80 = arith.truncf %79 : vector<2x8xf32> to vector<2x8xbf16>
    %cst_70 = arith.constant dense<0.000000e+00> : vector<2x512xf32>
    %81 = tpu.matmul %80, %68, %cst_70 {dimension_numbers = #tpu.dot_dimension_numbers<[1], [0], [0], [1], [0, 0, 1, 1], [], []>} : vector<2x8xbf16>, vector<8x512xbf16>, vector<2x512xf32> -> vector<2x512xf32>
    %82 = arith.addf %57, %81 : vector<2x512xf32>
    %c0_71 = arith.constant 0 : index
    %c0_72 = arith.constant 0 : index
    %83 = vector.load %arg12[%c0_71, %c0_72] : memref<2x512xf32, #tpu.memory_space<vmem>>, vector<2x512xf32>
    tpu.vector_store %arg12[%c0_71, %c0_72], %82 {strides = array<i32>} : memref<2x512xf32, #tpu.memory_space<vmem>>, vector<2x512xf32>,
    %c0_73 = arith.constant 0 : index
    %c0_74 = arith.constant 0 : index
    %84 = vector.load %arg12[%c0_73, %c0_74] : memref<2x512xf32, #tpu.memory_space<vmem>>, vector<2x512xf32>
    %c3 = arith.constant 3 : index
    %c0_75 = arith.constant 0 : index
    %c0_76 = arith.constant 0 : index
    %85 = vector.load %arg1[%c3, %c0_75, %c0_76] : memref<16x2x512xbf16, #tpu.memory_space<vmem>>, vector<1x2x512xbf16>
    %86 = vector.shape_cast %85 : vector<1x2x512xbf16> to vector<2x512xbf16>
    %c3_77 = arith.constant 3 : index
    %c0_78 = arith.constant 0 : index
    %c0_79 = arith.constant 0 : index
    %87 = vector.load %arg2[%c3_77, %c0_78, %c0_79] : memref<16x512x32xbf16, #tpu.memory_space<vmem>>, vector<1x512x32xbf16>
    %88 = vector.shape_cast %87 : vector<1x512x32xbf16> to vector<512x32xbf16>
    %c3_80 = arith.constant 3 : index
    %c0_81 = arith.constant 0 : index
    %c0_82 = arith.constant 0 : index
    %89 = vector.load %arg3[%c3_80, %c0_81, %c0_82] : memref<16x1x32xf32, #tpu.memory_space<vmem>>, vector<1x1x32xf32>
    %90 = vector.shape_cast %89 : vector<1x1x32xf32> to vector<1x32xf32>
    %c3_83 = arith.constant 3 : index
    %c0_84 = arith.constant 0 : index
    %c0_85 = arith.constant 0 : index
    %91 = vector.load %arg4[%c3_83, %c0_84, %c0_85] : memref<16x32x8xbf16, #tpu.memory_space<vmem>>, vector<1x32x8xbf16>
    %92 = vector.shape_cast %91 : vector<1x32x8xbf16> to vector<32x8xbf16>
    %c3_86 = arith.constant 3 : index
    %c0_87 = arith.constant 0 : index
    %c0_88 = arith.constant 0 : index
    %93 = vector.load %arg5[%c3_86, %c0_87, %c0_88] : memref<16x1x8xf32, #tpu.memory_space<vmem>>, vector<1x1x8xf32>
    %94 = vector.shape_cast %93 : vector<1x1x8xf32> to vector<1x8xf32>
    %c24 = arith.constant 24 : index
    %c0_89 = arith.constant 0 : index
    %95 = vector.load %arg6[%c24, %c0_89] : memref<128x512xbf16, #tpu.memory_space<vmem>>, vector<8x512xbf16>
    %cst_90 = arith.constant dense<0.000000e+00> : vector<2x32xf32>
    %96 = tpu.matmul %86, %88, %cst_90 {dimension_numbers = #tpu.dot_dimension_numbers<[1], [0], [0], [1], [0, 0, 1, 1], [], []>} : vector<2x512xbf16>, vector<512x32xbf16>, vector<2x32xf32> -> vector<2x32xf32>
    %97 = vector.broadcast %90 : vector<1x32xf32> to vector<2x32xf32>
    %98 = arith.addf %96, %97 : vector<2x32xf32>
    %cst_91 = arith.constant 0.000000e+00 : f32
    %99 = vector.broadcast %cst_91 : f32 to vector<2x32xf32>
    %100 = arith.maximumf %98, %99 : vector<2x32xf32>
    %101 = arith.truncf %100 : vector<2x32xf32> to vector<2x32xbf16>
    %cst_92 = arith.constant dense<0.000000e+00> : vector<2x8xf32>
    %102 = tpu.matmul %101, %92, %cst_92 {dimension_numbers = #tpu.dot_dimension_numbers<[1], [0], [0], [1], [0, 0, 1, 1], [], []>} : vector<2x32xbf16>, vector<32x8xbf16>, vector<2x8xf32> -> vector<2x8xf32>
    %103 = vector.broadcast %94 : vector<1x8xf32> to vector<2x8xf32>
    %104 = arith.addf %102, %103 : vector<2x8xf32>
    %cst_93 = arith.constant 0.000000e+00 : f32
    %105 = vector.broadcast %cst_93 : f32 to vector<2x8xf32>
    %106 = arith.maximumf %104, %105 : vector<2x8xf32>
    %107 = arith.truncf %106 : vector<2x8xf32> to vector<2x8xbf16>
    %cst_94 = arith.constant dense<0.000000e+00> : vector<2x512xf32>
    %108 = tpu.matmul %107, %95, %cst_94 {dimension_numbers = #tpu.dot_dimension_numbers<[1], [0], [0], [1], [0, 0, 1, 1], [], []>} : vector<2x8xbf16>, vector<8x512xbf16>, vector<2x512xf32> -> vector<2x512xf32>
    %109 = arith.addf %84, %108 : vector<2x512xf32>
    %c0_95 = arith.constant 0 : index
    %c0_96 = arith.constant 0 : index
    %110 = vector.load %arg12[%c0_95, %c0_96] : memref<2x512xf32, #tpu.memory_space<vmem>>, vector<2x512xf32>
    tpu.vector_store %arg12[%c0_95, %c0_96], %109 {strides = array<i32>} : memref<2x512xf32, #tpu.memory_space<vmem>>, vector<2x512xf32>,
    %c0_97 = arith.constant 0 : index
    %c0_98 = arith.constant 0 : index
    %111 = vector.load %arg12[%c0_97, %c0_98] : memref<2x512xf32, #tpu.memory_space<vmem>>, vector<2x512xf32>
    %c4 = arith.constant 4 : index
    %c0_99 = arith.constant 0 : index
    %c0_100 = arith.constant 0 : index
    %112 = vector.load %arg1[%c4, %c0_99, %c0_100] : memref<16x2x512xbf16, #tpu.memory_space<vmem>>, vector<1x2x512xbf16>
    %113 = vector.shape_cast %112 : vector<1x2x512xbf16> to vector<2x512xbf16>
    %c4_101 = arith.constant 4 : index
    %c0_102 = arith.constant 0 : index
    %c0_103 = arith.constant 0 : index
    %114 = vector.load %arg2[%c4_101, %c0_102, %c0_103] : memref<16x512x32xbf16, #tpu.memory_space<vmem>>, vector<1x512x32xbf16>
    %115 = vector.shape_cast %114 : vector<1x512x32xbf16> to vector<512x32xbf16>
    %c4_104 = arith.constant 4 : index
    %c0_105 = arith.constant 0 : index
    %c0_106 = arith.constant 0 : index
    %116 = vector.load %arg3[%c4_104, %c0_105, %c0_106] : memref<16x1x32xf32, #tpu.memory_space<vmem>>, vector<1x1x32xf32>
    %117 = vector.shape_cast %116 : vector<1x1x32xf32> to vector<1x32xf32>
    %c4_107 = arith.constant 4 : index
    %c0_108 = arith.constant 0 : index
    %c0_109 = arith.constant 0 : index
    %118 = vector.load %arg4[%c4_107, %c0_108, %c0_109] : memref<16x32x8xbf16, #tpu.memory_space<vmem>>, vector<1x32x8xbf16>
    %119 = vector.shape_cast %118 : vector<1x32x8xbf16> to vector<32x8xbf16>
    %c4_110 = arith.constant 4 : index
    %c0_111 = arith.constant 0 : index
    %c0_112 = arith.constant 0 : index
    %120 = vector.load %arg5[%c4_110, %c0_111, %c0_112] : memref<16x1x8xf32, #tpu.memory_space<vmem>>, vector<1x1x8xf32>
    %121 = vector.shape_cast %120 : vector<1x1x8xf32> to vector<1x8xf32>
    %c32 = arith.constant 32 : index
    %c0_113 = arith.constant 0 : index
    %122 = vector.load %arg6[%c32, %c0_113] : memref<128x512xbf16, #tpu.memory_space<vmem>>, vector<8x512xbf16>
    %cst_114 = arith.constant dense<0.000000e+00> : vector<2x32xf32>
    %123 = tpu.matmul %113, %115, %cst_114 {dimension_numbers = #tpu.dot_dimension_numbers<[1], [0], [0], [1], [0, 0, 1, 1], [], []>} : vector<2x512xbf16>, vector<512x32xbf16>, vector<2x32xf32> -> vector<2x32xf32>
    %124 = vector.broadcast %117 : vector<1x32xf32> to vector<2x32xf32>
    %125 = arith.addf %123, %124 : vector<2x32xf32>
    %cst_115 = arith.constant 0.000000e+00 : f32
    %126 = vector.broadcast %cst_115 : f32 to vector<2x32xf32>
    %127 = arith.maximumf %125, %126 : vector<2x32xf32>
    %128 = arith.truncf %127 : vector<2x32xf32> to vector<2x32xbf16>
    %cst_116 = arith.constant dense<0.000000e+00> : vector<2x8xf32>
    %129 = tpu.matmul %128, %119, %cst_116 {dimension_numbers = #tpu.dot_dimension_numbers<[1], [0], [0], [1], [0, 0, 1, 1], [], []>} : vector<2x32xbf16>, vector<32x8xbf16>, vector<2x8xf32> -> vector<2x8xf32>
    %130 = vector.broadcast %121 : vector<1x8xf32> to vector<2x8xf32>
    %131 = arith.addf %129, %130 : vector<2x8xf32>
    %cst_117 = arith.constant 0.000000e+00 : f32
    %132 = vector.broadcast %cst_117 : f32 to vector<2x8xf32>
    %133 = arith.maximumf %131, %132 : vector<2x8xf32>
    %134 = arith.truncf %133 : vector<2x8xf32> to vector<2x8xbf16>
    %cst_118 = arith.constant dense<0.000000e+00> : vector<2x512xf32>
    %135 = tpu.matmul %134, %122, %cst_118 {dimension_numbers = #tpu.dot_dimension_numbers<[1], [0], [0], [1], [0, 0, 1, 1], [], []>} : vector<2x8xbf16>, vector<8x512xbf16>, vector<2x512xf32> -> vector<2x512xf32>
    %136 = arith.addf %111, %135 : vector<2x512xf32>
    %c0_119 = arith.constant 0 : index
    %c0_120 = arith.constant 0 : index
    %137 = vector.load %arg12[%c0_119, %c0_120] : memref<2x512xf32, #tpu.memory_space<vmem>>, vector<2x512xf32>
    tpu.vector_store %arg12[%c0_119, %c0_120], %136 {strides = array<i32>} : memref<2x512xf32, #tpu.memory_space<vmem>>, vector<2x512xf32>,
    %c0_121 = arith.constant 0 : index
    %c0_122 = arith.constant 0 : index
    %138 = vector.load %arg12[%c0_121, %c0_122] : memref<2x512xf32, #tpu.memory_space<vmem>>, vector<2x512xf32>
    %c5 = arith.constant 5 : index
    %c0_123 = arith.constant 0 : index
    %c0_124 = arith.constant 0 : index
    %139 = vector.load %arg1[%c5, %c0_123, %c0_124] : memref<16x2x512xbf16, #tpu.memory_space<vmem>>, vector<1x2x512xbf16>
    %140 = vector.shape_cast %139 : vector<1x2x512xbf16> to vector<2x512xbf16>
    %c5_125 = arith.constant 5 : index
    %c0_126 = arith.constant 0 : index
    %c0_127 = arith.constant 0 : index
    %141 = vector.load %arg2[%c5_125, %c0_126, %c0_127] : memref<16x512x32xbf16, #tpu.memory_space<vmem>>, vector<1x512x32xbf16>
    %142 = vector.shape_cast %141 : vector<1x512x32xbf16> to vector<512x32xbf16>
    %c5_128 = arith.constant 5 : index
    %c0_129 = arith.constant 0 : index
    %c0_130 = arith.constant 0 : index
    %143 = vector.load %arg3[%c5_128, %c0_129, %c0_130] : memref<16x1x32xf32, #tpu.memory_space<vmem>>, vector<1x1x32xf32>
    %144 = vector.shape_cast %143 : vector<1x1x32xf32> to vector<1x32xf32>
    %c5_131 = arith.constant 5 : index
    %c0_132 = arith.constant 0 : index
    %c0_133 = arith.constant 0 : index
    %145 = vector.load %arg4[%c5_131, %c0_132, %c0_133] : memref<16x32x8xbf16, #tpu.memory_space<vmem>>, vector<1x32x8xbf16>
    %146 = vector.shape_cast %145 : vector<1x32x8xbf16> to vector<32x8xbf16>
    %c5_134 = arith.constant 5 : index
    %c0_135 = arith.constant 0 : index
    %c0_136 = arith.constant 0 : index
    %147 = vector.load %arg5[%c5_134, %c0_135, %c0_136] : memref<16x1x8xf32, #tpu.memory_space<vmem>>, vector<1x1x8xf32>
    %148 = vector.shape_cast %147 : vector<1x1x8xf32> to vector<1x8xf32>
    %c40 = arith.constant 40 : index
    %c0_137 = arith.constant 0 : index
    %149 = vector.load %arg6[%c40, %c0_137] : memref<128x512xbf16, #tpu.memory_space<vmem>>, vector<8x512xbf16>
    %cst_138 = arith.constant dense<0.000000e+00> : vector<2x32xf32>
    %150 = tpu.matmul %140, %142, %cst_138 {dimension_numbers = #tpu.dot_dimension_numbers<[1], [0], [0], [1], [0, 0, 1, 1], [], []>} : vector<2x512xbf16>, vector<512x32xbf16>, vector<2x32xf32> -> vector<2x32xf32>
    %151 = vector.broadcast %144 : vector<1x32xf32> to vector<2x32xf32>
    %152 = arith.addf %150, %151 : vector<2x32xf32>
    %cst_139 = arith.constant 0.000000e+00 : f32
    %153 = vector.broadcast %cst_139 : f32 to vector<2x32xf32>
    %154 = arith.maximumf %152, %153 : vector<2x32xf32>
    %155 = arith.truncf %154 : vector<2x32xf32> to vector<2x32xbf16>
    %cst_140 = arith.constant dense<0.000000e+00> : vector<2x8xf32>
    %156 = tpu.matmul %155, %146, %cst_140 {dimension_numbers = #tpu.dot_dimension_numbers<[1], [0], [0], [1], [0, 0, 1, 1], [], []>} : vector<2x32xbf16>, vector<32x8xbf16>, vector<2x8xf32> -> vector<2x8xf32>
    %157 = vector.broadcast %148 : vector<1x8xf32> to vector<2x8xf32>
    %158 = arith.addf %156, %157 : vector<2x8xf32>
    %cst_141 = arith.constant 0.000000e+00 : f32
    %159 = vector.broadcast %cst_141 : f32 to vector<2x8xf32>
    %160 = arith.maximumf %158, %159 : vector<2x8xf32>
    %161 = arith.truncf %160 : vector<2x8xf32> to vector<2x8xbf16>
    %cst_142 = arith.constant dense<0.000000e+00> : vector<2x512xf32>
    %162 = tpu.matmul %161, %149, %cst_142 {dimension_numbers = #tpu.dot_dimension_numbers<[1], [0], [0], [1], [0, 0, 1, 1], [], []>} : vector<2x8xbf16>, vector<8x512xbf16>, vector<2x512xf32> -> vector<2x512xf32>
    %163 = arith.addf %138, %162 : vector<2x512xf32>
    %c0_143 = arith.constant 0 : index
    %c0_144 = arith.constant 0 : index
    %164 = vector.load %arg12[%c0_143, %c0_144] : memref<2x512xf32, #tpu.memory_space<vmem>>, vector<2x512xf32>
    tpu.vector_store %arg12[%c0_143, %c0_144], %163 {strides = array<i32>} : memref<2x512xf32, #tpu.memory_space<vmem>>, vector<2x512xf32>,
    %c0_145 = arith.constant 0 : index
    %c0_146 = arith.constant 0 : index
    %165 = vector.load %arg12[%c0_145, %c0_146] : memref<2x512xf32, #tpu.memory_space<vmem>>, vector<2x512xf32>
    %c6 = arith.constant 6 : index
    %c0_147 = arith.constant 0 : index
    %c0_148 = arith.constant 0 : index
    %166 = vector.load %arg1[%c6, %c0_147, %c0_148] : memref<16x2x512xbf16, #tpu.memory_space<vmem>>, vector<1x2x512xbf16>
    %167 = vector.shape_cast %166 : vector<1x2x512xbf16> to vector<2x512xbf16>
    %c6_149 = arith.constant 6 : index
    %c0_150 = arith.constant 0 : index
    %c0_151 = arith.constant 0 : index
    %168 = vector.load %arg2[%c6_149, %c0_150, %c0_151] : memref<16x512x32xbf16, #tpu.memory_space<vmem>>, vector<1x512x32xbf16>
    %169 = vector.shape_cast %168 : vector<1x512x32xbf16> to vector<512x32xbf16>
    %c6_152 = arith.constant 6 : index
    %c0_153 = arith.constant 0 : index
    %c0_154 = arith.constant 0 : index
    %170 = vector.load %arg3[%c6_152, %c0_153, %c0_154] : memref<16x1x32xf32, #tpu.memory_space<vmem>>, vector<1x1x32xf32>
    %171 = vector.shape_cast %170 : vector<1x1x32xf32> to vector<1x32xf32>
    %c6_155 = arith.constant 6 : index
    %c0_156 = arith.constant 0 : index
    %c0_157 = arith.constant 0 : index
    %172 = vector.load %arg4[%c6_155, %c0_156, %c0_157] : memref<16x32x8xbf16, #tpu.memory_space<vmem>>, vector<1x32x8xbf16>
    %173 = vector.shape_cast %172 : vector<1x32x8xbf16> to vector<32x8xbf16>
    %c6_158 = arith.constant 6 : index
    %c0_159 = arith.constant 0 : index
    %c0_160 = arith.constant 0 : index
    %174 = vector.load %arg5[%c6_158, %c0_159, %c0_160] : memref<16x1x8xf32, #tpu.memory_space<vmem>>, vector<1x1x8xf32>
    %175 = vector.shape_cast %174 : vector<1x1x8xf32> to vector<1x8xf32>
    %c48 = arith.constant 48 : index
    %c0_161 = arith.constant 0 : index
    %176 = vector.load %arg6[%c48, %c0_161] : memref<128x512xbf16, #tpu.memory_space<vmem>>, vector<8x512xbf16>
    %cst_162 = arith.constant dense<0.000000e+00> : vector<2x32xf32>
    %177 = tpu.matmul %167, %169, %cst_162 {dimension_numbers = #tpu.dot_dimension_numbers<[1], [0], [0], [1], [0, 0, 1, 1], [], []>} : vector<2x512xbf16>, vector<512x32xbf16>, vector<2x32xf32> -> vector<2x32xf32>
    %178 = vector.broadcast %171 : vector<1x32xf32> to vector<2x32xf32>
    %179 = arith.addf %177, %178 : vector<2x32xf32>
    %cst_163 = arith.constant 0.000000e+00 : f32
    %180 = vector.broadcast %cst_163 : f32 to vector<2x32xf32>
    %181 = arith.maximumf %179, %180 : vector<2x32xf32>
    %182 = arith.truncf %181 : vector<2x32xf32> to vector<2x32xbf16>
    %cst_164 = arith.constant dense<0.000000e+00> : vector<2x8xf32>
    %183 = tpu.matmul %182, %173, %cst_164 {dimension_numbers = #tpu.dot_dimension_numbers<[1], [0], [0], [1], [0, 0, 1, 1], [], []>} : vector<2x32xbf16>, vector<32x8xbf16>, vector<2x8xf32> -> vector<2x8xf32>
    %184 = vector.broadcast %175 : vector<1x8xf32> to vector<2x8xf32>
    %185 = arith.addf %183, %184 : vector<2x8xf32>
    %cst_165 = arith.constant 0.000000e+00 : f32
    %186 = vector.broadcast %cst_165 : f32 to vector<2x8xf32>
    %187 = arith.maximumf %185, %186 : vector<2x8xf32>
    %188 = arith.truncf %187 : vector<2x8xf32> to vector<2x8xbf16>
    %cst_166 = arith.constant dense<0.000000e+00> : vector<2x512xf32>
    %189 = tpu.matmul %188, %176, %cst_166 {dimension_numbers = #tpu.dot_dimension_numbers<[1], [0], [0], [1], [0, 0, 1, 1], [], []>} : vector<2x8xbf16>, vector<8x512xbf16>, vector<2x512xf32> -> vector<2x512xf32>
    %190 = arith.addf %165, %189 : vector<2x512xf32>
    %c0_167 = arith.constant 0 : index
    %c0_168 = arith.constant 0 : index
    %191 = vector.load %arg12[%c0_167, %c0_168] : memref<2x512xf32, #tpu.memory_space<vmem>>, vector<2x512xf32>
    tpu.vector_store %arg12[%c0_167, %c0_168], %190 {strides = array<i32>} : memref<2x512xf32, #tpu.memory_space<vmem>>, vector<2x512xf32>,
    %c0_169 = arith.constant 0 : index
    %c0_170 = arith.constant 0 : index
    %192 = vector.load %arg12[%c0_169, %c0_170] : memref<2x512xf32, #tpu.memory_space<vmem>>, vector<2x512xf32>
    %c7 = arith.constant 7 : index
    %c0_171 = arith.constant 0 : index
    %c0_172 = arith.constant 0 : index
    %193 = vector.load %arg1[%c7, %c0_171, %c0_172] : memref<16x2x512xbf16, #tpu.memory_space<vmem>>, vector<1x2x512xbf16>
    %194 = vector.shape_cast %193 : vector<1x2x512xbf16> to vector<2x512xbf16>
    %c7_173 = arith.constant 7 : index
    %c0_174 = arith.constant 0 : index
    %c0_175 = arith.constant 0 : index
    %195 = vector.load %arg2[%c7_173, %c0_174, %c0_175] : memref<16x512x32xbf16, #tpu.memory_space<vmem>>, vector<1x512x32xbf16>
    %196 = vector.shape_cast %195 : vector<1x512x32xbf16> to vector<512x32xbf16>
    %c7_176 = arith.constant 7 : index
    %c0_177 = arith.constant 0 : index
    %c0_178 = arith.constant 0 : index
    %197 = vector.load %arg3[%c7_176, %c0_177, %c0_178] : memref<16x1x32xf32, #tpu.memory_space<vmem>>, vector<1x1x32xf32>
    %198 = vector.shape_cast %197 : vector<1x1x32xf32> to vector<1x32xf32>
    %c7_179 = arith.constant 7 : index
    %c0_180 = arith.constant 0 : index
    %c0_181 = arith.constant 0 : index
    %199 = vector.load %arg4[%c7_179, %c0_180, %c0_181] : memref<16x32x8xbf16, #tpu.memory_space<vmem>>, vector<1x32x8xbf16>
    %200 = vector.shape_cast %199 : vector<1x32x8xbf16> to vector<32x8xbf16>
    %c7_182 = arith.constant 7 : index
    %c0_183 = arith.constant 0 : index
    %c0_184 = arith.constant 0 : index
    %201 = vector.load %arg5[%c7_182, %c0_183, %c0_184] : memref<16x1x8xf32, #tpu.memory_space<vmem>>, vector<1x1x8xf32>
    %202 = vector.shape_cast %201 : vector<1x1x8xf32> to vector<1x8xf32>
    %c56 = arith.constant 56 : index
    %c0_185 = arith.constant 0 : index
    %203 = vector.load %arg6[%c56, %c0_185] : memref<128x512xbf16, #tpu.memory_space<vmem>>, vector<8x512xbf16>
    %cst_186 = arith.constant dense<0.000000e+00> : vector<2x32xf32>
    %204 = tpu.matmul %194, %196, %cst_186 {dimension_numbers = #tpu.dot_dimension_numbers<[1], [0], [0], [1], [0, 0, 1, 1], [], []>} : vector<2x512xbf16>, vector<512x32xbf16>, vector<2x32xf32> -> vector<2x32xf32>
    %205 = vector.broadcast %198 : vector<1x32xf32> to vector<2x32xf32>
    %206 = arith.addf %204, %205 : vector<2x32xf32>
    %cst_187 = arith.constant 0.000000e+00 : f32
    %207 = vector.broadcast %cst_187 : f32 to vector<2x32xf32>
    %208 = arith.maximumf %206, %207 : vector<2x32xf32>
    %209 = arith.truncf %208 : vector<2x32xf32> to vector<2x32xbf16>
    %cst_188 = arith.constant dense<0.000000e+00> : vector<2x8xf32>
    %210 = tpu.matmul %209, %200, %cst_188 {dimension_numbers = #tpu.dot_dimension_numbers<[1], [0], [0], [1], [0, 0, 1, 1], [], []>} : vector<2x32xbf16>, vector<32x8xbf16>, vector<2x8xf32> -> vector<2x8xf32>
    %211 = vector.broadcast %202 : vector<1x8xf32> to vector<2x8xf32>
    %212 = arith.addf %210, %211 : vector<2x8xf32>
    %cst_189 = arith.constant 0.000000e+00 : f32
    %213 = vector.broadcast %cst_189 : f32 to vector<2x8xf32>
    %214 = arith.maximumf %212, %213 : vector<2x8xf32>
    %215 = arith.truncf %214 : vector<2x8xf32> to vector<2x8xbf16>
    %cst_190 = arith.constant dense<0.000000e+00> : vector<2x512xf32>
    %216 = tpu.matmul %215, %203, %cst_190 {dimension_numbers = #tpu.dot_dimension_numbers<[1], [0], [0], [1], [0, 0, 1, 1], [], []>} : vector<2x8xbf16>, vector<8x512xbf16>, vector<2x512xf32> -> vector<2x512xf32>
    %217 = arith.addf %192, %216 : vector<2x512xf32>
    %c0_191 = arith.constant 0 : index
    %c0_192 = arith.constant 0 : index
    %218 = vector.load %arg12[%c0_191, %c0_192] : memref<2x512xf32, #tpu.memory_space<vmem>>, vector<2x512xf32>
    tpu.vector_store %arg12[%c0_191, %c0_192], %217 {strides = array<i32>} : memref<2x512xf32, #tpu.memory_space<vmem>>, vector<2x512xf32>,
    %c0_193 = arith.constant 0 : index
    %c0_194 = arith.constant 0 : index
    %219 = vector.load %arg12[%c0_193, %c0_194] : memref<2x512xf32, #tpu.memory_space<vmem>>, vector<2x512xf32>
    %c8_195 = arith.constant 8 : index
    %c0_196 = arith.constant 0 : index
    %c0_197 = arith.constant 0 : index
    %220 = vector.load %arg1[%c8_195, %c0_196, %c0_197] : memref<16x2x512xbf16, #tpu.memory_space<vmem>>, vector<1x2x512xbf16>
    %221 = vector.shape_cast %220 : vector<1x2x512xbf16> to vector<2x512xbf16>
    %c8_198 = arith.constant 8 : index
    %c0_199 = arith.constant 0 : index
    %c0_200 = arith.constant 0 : index
    %222 = vector.load %arg2[%c8_198, %c0_199, %c0_200] : memref<16x512x32xbf16, #tpu.memory_space<vmem>>, vector<1x512x32xbf16>
    %223 = vector.shape_cast %222 : vector<1x512x32xbf16> to vector<512x32xbf16>
    %c8_201 = arith.constant 8 : index
    %c0_202 = arith.constant 0 : index
    %c0_203 = arith.constant 0 : index
    %224 = vector.load %arg3[%c8_201, %c0_202, %c0_203] : memref<16x1x32xf32, #tpu.memory_space<vmem>>, vector<1x1x32xf32>
    %225 = vector.shape_cast %224 : vector<1x1x32xf32> to vector<1x32xf32>
    %c8_204 = arith.constant 8 : index
    %c0_205 = arith.constant 0 : index
    %c0_206 = arith.constant 0 : index
    %226 = vector.load %arg4[%c8_204, %c0_205, %c0_206] : memref<16x32x8xbf16, #tpu.memory_space<vmem>>, vector<1x32x8xbf16>
    %227 = vector.shape_cast %226 : vector<1x32x8xbf16> to vector<32x8xbf16>
    %c8_207 = arith.constant 8 : index
    %c0_208 = arith.constant 0 : index
    %c0_209 = arith.constant 0 : index
    %228 = vector.load %arg5[%c8_207, %c0_208, %c0_209] : memref<16x1x8xf32, #tpu.memory_space<vmem>>, vector<1x1x8xf32>
    %229 = vector.shape_cast %228 : vector<1x1x8xf32> to vector<1x8xf32>
    %c64 = arith.constant 64 : index
    %c0_210 = arith.constant 0 : index
    %230 = vector.load %arg6[%c64, %c0_210] : memref<128x512xbf16, #tpu.memory_space<vmem>>, vector<8x512xbf16>
    %cst_211 = arith.constant dense<0.000000e+00> : vector<2x32xf32>
    %231 = tpu.matmul %221, %223, %cst_211 {dimension_numbers = #tpu.dot_dimension_numbers<[1], [0], [0], [1], [0, 0, 1, 1], [], []>} : vector<2x512xbf16>, vector<512x32xbf16>, vector<2x32xf32> -> vector<2x32xf32>
    %232 = vector.broadcast %225 : vector<1x32xf32> to vector<2x32xf32>
    %233 = arith.addf %231, %232 : vector<2x32xf32>
    %cst_212 = arith.constant 0.000000e+00 : f32
    %234 = vector.broadcast %cst_212 : f32 to vector<2x32xf32>
    %235 = arith.maximumf %233, %234 : vector<2x32xf32>
    %236 = arith.truncf %235 : vector<2x32xf32> to vector<2x32xbf16>
    %cst_213 = arith.constant dense<0.000000e+00> : vector<2x8xf32>
    %237 = tpu.matmul %236, %227, %cst_213 {dimension_numbers = #tpu.dot_dimension_numbers<[1], [0], [0], [1], [0, 0, 1, 1], [], []>} : vector<2x32xbf16>, vector<32x8xbf16>, vector<2x8xf32> -> vector<2x8xf32>
    %238 = vector.broadcast %229 : vector<1x8xf32> to vector<2x8xf32>
    %239 = arith.addf %237, %238 : vector<2x8xf32>
    %cst_214 = arith.constant 0.000000e+00 : f32
    %240 = vector.broadcast %cst_214 : f32 to vector<2x8xf32>
    %241 = arith.maximumf %239, %240 : vector<2x8xf32>
    %242 = arith.truncf %241 : vector<2x8xf32> to vector<2x8xbf16>
    %cst_215 = arith.constant dense<0.000000e+00> : vector<2x512xf32>
    %243 = tpu.matmul %242, %230, %cst_215 {dimension_numbers = #tpu.dot_dimension_numbers<[1], [0], [0], [1], [0, 0, 1, 1], [], []>} : vector<2x8xbf16>, vector<8x512xbf16>, vector<2x512xf32> -> vector<2x512xf32>
    %244 = arith.addf %219, %243 : vector<2x512xf32>
    %c0_216 = arith.constant 0 : index
    %c0_217 = arith.constant 0 : index
    %245 = vector.load %arg12[%c0_216, %c0_217] : memref<2x512xf32, #tpu.memory_space<vmem>>, vector<2x512xf32>
    tpu.vector_store %arg12[%c0_216, %c0_217], %244 {strides = array<i32>} : memref<2x512xf32, #tpu.memory_space<vmem>>, vector<2x512xf32>,
    %c0_218 = arith.constant 0 : index
    %c0_219 = arith.constant 0 : index
    %246 = vector.load %arg12[%c0_218, %c0_219] : memref<2x512xf32, #tpu.memory_space<vmem>>, vector<2x512xf32>
    %c9 = arith.constant 9 : index
    %c0_220 = arith.constant 0 : index
    %c0_221 = arith.constant 0 : index
    %247 = vector.load %arg1[%c9, %c0_220, %c0_221] : memref<16x2x512xbf16, #tpu.memory_space<vmem>>, vector<1x2x512xbf16>
    %248 = vector.shape_cast %247 : vector<1x2x512xbf16> to vector<2x512xbf16>
    %c9_222 = arith.constant 9 : index
    %c0_223 = arith.constant 0 : index
    %c0_224 = arith.constant 0 : index
    %249 = vector.load %arg2[%c9_222, %c0_223, %c0_224] : memref<16x512x32xbf16, #tpu.memory_space<vmem>>, vector<1x512x32xbf16>
    %250 = vector.shape_cast %249 : vector<1x512x32xbf16> to vector<512x32xbf16>
    %c9_225 = arith.constant 9 : index
    %c0_226 = arith.constant 0 : index
    %c0_227 = arith.constant 0 : index
    %251 = vector.load %arg3[%c9_225, %c0_226, %c0_227] : memref<16x1x32xf32, #tpu.memory_space<vmem>>, vector<1x1x32xf32>
    %252 = vector.shape_cast %251 : vector<1x1x32xf32> to vector<1x32xf32>
    %c9_228 = arith.constant 9 : index
    %c0_229 = arith.constant 0 : index
    %c0_230 = arith.constant 0 : index
    %253 = vector.load %arg4[%c9_228, %c0_229, %c0_230] : memref<16x32x8xbf16, #tpu.memory_space<vmem>>, vector<1x32x8xbf16>
    %254 = vector.shape_cast %253 : vector<1x32x8xbf16> to vector<32x8xbf16>
    %c9_231 = arith.constant 9 : index
    %c0_232 = arith.constant 0 : index
    %c0_233 = arith.constant 0 : index
    %255 = vector.load %arg5[%c9_231, %c0_232, %c0_233] : memref<16x1x8xf32, #tpu.memory_space<vmem>>, vector<1x1x8xf32>
    %256 = vector.shape_cast %255 : vector<1x1x8xf32> to vector<1x8xf32>
    %c72 = arith.constant 72 : index
    %c0_234 = arith.constant 0 : index
    %257 = vector.load %arg6[%c72, %c0_234] : memref<128x512xbf16, #tpu.memory_space<vmem>>, vector<8x512xbf16>
    %cst_235 = arith.constant dense<0.000000e+00> : vector<2x32xf32>
    %258 = tpu.matmul %248, %250, %cst_235 {dimension_numbers = #tpu.dot_dimension_numbers<[1], [0], [0], [1], [0, 0, 1, 1], [], []>} : vector<2x512xbf16>, vector<512x32xbf16>, vector<2x32xf32> -> vector<2x32xf32>
    %259 = vector.broadcast %252 : vector<1x32xf32> to vector<2x32xf32>
    %260 = arith.addf %258, %259 : vector<2x32xf32>
    %cst_236 = arith.constant 0.000000e+00 : f32
    %261 = vector.broadcast %cst_236 : f32 to vector<2x32xf32>
    %262 = arith.maximumf %260, %261 : vector<2x32xf32>
    %263 = arith.truncf %262 : vector<2x32xf32> to vector<2x32xbf16>
    %cst_237 = arith.constant dense<0.000000e+00> : vector<2x8xf32>
    %264 = tpu.matmul %263, %254, %cst_237 {dimension_numbers = #tpu.dot_dimension_numbers<[1], [0], [0], [1], [0, 0, 1, 1], [], []>} : vector<2x32xbf16>, vector<32x8xbf16>, vector<2x8xf32> -> vector<2x8xf32>
    %265 = vector.broadcast %256 : vector<1x8xf32> to vector<2x8xf32>
    %266 = arith.addf %264, %265 : vector<2x8xf32>
    %cst_238 = arith.constant 0.000000e+00 : f32
    %267 = vector.broadcast %cst_238 : f32 to vector<2x8xf32>
    %268 = arith.maximumf %266, %267 : vector<2x8xf32>
    %269 = arith.truncf %268 : vector<2x8xf32> to vector<2x8xbf16>
    %cst_239 = arith.constant dense<0.000000e+00> : vector<2x512xf32>
    %270 = tpu.matmul %269, %257, %cst_239 {dimension_numbers = #tpu.dot_dimension_numbers<[1], [0], [0], [1], [0, 0, 1, 1], [], []>} : vector<2x8xbf16>, vector<8x512xbf16>, vector<2x512xf32> -> vector<2x512xf32>
    %271 = arith.addf %246, %270 : vector<2x512xf32>
    %c0_240 = arith.constant 0 : index
    %c0_241 = arith.constant 0 : index
    %272 = vector.load %arg12[%c0_240, %c0_241] : memref<2x512xf32, #tpu.memory_space<vmem>>, vector<2x512xf32>
    tpu.vector_store %arg12[%c0_240, %c0_241], %271 {strides = array<i32>} : memref<2x512xf32, #tpu.memory_space<vmem>>, vector<2x512xf32>,
    %c0_242 = arith.constant 0 : index
    %c0_243 = arith.constant 0 : index
    %273 = vector.load %arg12[%c0_242, %c0_243] : memref<2x512xf32, #tpu.memory_space<vmem>>, vector<2x512xf32>
    %c10 = arith.constant 10 : index
    %c0_244 = arith.constant 0 : index
    %c0_245 = arith.constant 0 : index
    %274 = vector.load %arg1[%c10, %c0_244, %c0_245] : memref<16x2x512xbf16, #tpu.memory_space<vmem>>, vector<1x2x512xbf16>
    %275 = vector.shape_cast %274 : vector<1x2x512xbf16> to vector<2x512xbf16>
    %c10_246 = arith.constant 10 : index
    %c0_247 = arith.constant 0 : index
    %c0_248 = arith.constant 0 : index
    %276 = vector.load %arg2[%c10_246, %c0_247, %c0_248] : memref<16x512x32xbf16, #tpu.memory_space<vmem>>, vector<1x512x32xbf16>
    %277 = vector.shape_cast %276 : vector<1x512x32xbf16> to vector<512x32xbf16>
    %c10_249 = arith.constant 10 : index
    %c0_250 = arith.constant 0 : index
    %c0_251 = arith.constant 0 : index
    %278 = vector.load %arg3[%c10_249, %c0_250, %c0_251] : memref<16x1x32xf32, #tpu.memory_space<vmem>>, vector<1x1x32xf32>
    %279 = vector.shape_cast %278 : vector<1x1x32xf32> to vector<1x32xf32>
    %c10_252 = arith.constant 10 : index
    %c0_253 = arith.constant 0 : index
    %c0_254 = arith.constant 0 : index
    %280 = vector.load %arg4[%c10_252, %c0_253, %c0_254] : memref<16x32x8xbf16, #tpu.memory_space<vmem>>, vector<1x32x8xbf16>
    %281 = vector.shape_cast %280 : vector<1x32x8xbf16> to vector<32x8xbf16>
    %c10_255 = arith.constant 10 : index
    %c0_256 = arith.constant 0 : index
    %c0_257 = arith.constant 0 : index
    %282 = vector.load %arg5[%c10_255, %c0_256, %c0_257] : memref<16x1x8xf32, #tpu.memory_space<vmem>>, vector<1x1x8xf32>
    %283 = vector.shape_cast %282 : vector<1x1x8xf32> to vector<1x8xf32>
    %c80 = arith.constant 80 : index
    %c0_258 = arith.constant 0 : index
    %284 = vector.load %arg6[%c80, %c0_258] : memref<128x512xbf16, #tpu.memory_space<vmem>>, vector<8x512xbf16>
    %cst_259 = arith.constant dense<0.000000e+00> : vector<2x32xf32>
    %285 = tpu.matmul %275, %277, %cst_259 {dimension_numbers = #tpu.dot_dimension_numbers<[1], [0], [0], [1], [0, 0, 1, 1], [], []>} : vector<2x512xbf16>, vector<512x32xbf16>, vector<2x32xf32> -> vector<2x32xf32>
    %286 = vector.broadcast %279 : vector<1x32xf32> to vector<2x32xf32>
    %287 = arith.addf %285, %286 : vector<2x32xf32>
    %cst_260 = arith.constant 0.000000e+00 : f32
    %288 = vector.broadcast %cst_260 : f32 to vector<2x32xf32>
    %289 = arith.maximumf %287, %288 : vector<2x32xf32>
    %290 = arith.truncf %289 : vector<2x32xf32> to vector<2x32xbf16>
    %cst_261 = arith.constant dense<0.000000e+00> : vector<2x8xf32>
    %291 = tpu.matmul %290, %281, %cst_261 {dimension_numbers = #tpu.dot_dimension_numbers<[1], [0], [0], [1], [0, 0, 1, 1], [], []>} : vector<2x32xbf16>, vector<32x8xbf16>, vector<2x8xf32> -> vector<2x8xf32>
    %292 = vector.broadcast %283 : vector<1x8xf32> to vector<2x8xf32>
    %293 = arith.addf %291, %292 : vector<2x8xf32>
    %cst_262 = arith.constant 0.000000e+00 : f32
    %294 = vector.broadcast %cst_262 : f32 to vector<2x8xf32>
    %295 = arith.maximumf %293, %294 : vector<2x8xf32>
    %296 = arith.truncf %295 : vector<2x8xf32> to vector<2x8xbf16>
    %cst_263 = arith.constant dense<0.000000e+00> : vector<2x512xf32>
    %297 = tpu.matmul %296, %284, %cst_263 {dimension_numbers = #tpu.dot_dimension_numbers<[1], [0], [0], [1], [0, 0, 1, 1], [], []>} : vector<2x8xbf16>, vector<8x512xbf16>, vector<2x512xf32> -> vector<2x512xf32>
    %298 = arith.addf %273, %297 : vector<2x512xf32>
    %c0_264 = arith.constant 0 : index
    %c0_265 = arith.constant 0 : index
    %299 = vector.load %arg12[%c0_264, %c0_265] : memref<2x512xf32, #tpu.memory_space<vmem>>, vector<2x512xf32>
    tpu.vector_store %arg12[%c0_264, %c0_265], %298 {strides = array<i32>} : memref<2x512xf32, #tpu.memory_space<vmem>>, vector<2x512xf32>,
    %c0_266 = arith.constant 0 : index
    %c0_267 = arith.constant 0 : index
    %300 = vector.load %arg12[%c0_266, %c0_267] : memref<2x512xf32, #tpu.memory_space<vmem>>, vector<2x512xf32>
    %c11 = arith.constant 11 : index
    %c0_268 = arith.constant 0 : index
    %c0_269 = arith.constant 0 : index
    %301 = vector.load %arg1[%c11, %c0_268, %c0_269] : memref<16x2x512xbf16, #tpu.memory_space<vmem>>, vector<1x2x512xbf16>
    %302 = vector.shape_cast %301 : vector<1x2x512xbf16> to vector<2x512xbf16>
    %c11_270 = arith.constant 11 : index
    %c0_271 = arith.constant 0 : index
    %c0_272 = arith.constant 0 : index
    %303 = vector.load %arg2[%c11_270, %c0_271, %c0_272] : memref<16x512x32xbf16, #tpu.memory_space<vmem>>, vector<1x512x32xbf16>
    %304 = vector.shape_cast %303 : vector<1x512x32xbf16> to vector<512x32xbf16>
    %c11_273 = arith.constant 11 : index
    %c0_274 = arith.constant 0 : index
    %c0_275 = arith.constant 0 : index
    %305 = vector.load %arg3[%c11_273, %c0_274, %c0_275] : memref<16x1x32xf32, #tpu.memory_space<vmem>>, vector<1x1x32xf32>
    %306 = vector.shape_cast %305 : vector<1x1x32xf32> to vector<1x32xf32>
    %c11_276 = arith.constant 11 : index
    %c0_277 = arith.constant 0 : index
    %c0_278 = arith.constant 0 : index
    %307 = vector.load %arg4[%c11_276, %c0_277, %c0_278] : memref<16x32x8xbf16, #tpu.memory_space<vmem>>, vector<1x32x8xbf16>
    %308 = vector.shape_cast %307 : vector<1x32x8xbf16> to vector<32x8xbf16>
    %c11_279 = arith.constant 11 : index
    %c0_280 = arith.constant 0 : index
    %c0_281 = arith.constant 0 : index
    %309 = vector.load %arg5[%c11_279, %c0_280, %c0_281] : memref<16x1x8xf32, #tpu.memory_space<vmem>>, vector<1x1x8xf32>
    %310 = vector.shape_cast %309 : vector<1x1x8xf32> to vector<1x8xf32>
    %c88 = arith.constant 88 : index
    %c0_282 = arith.constant 0 : index
    %311 = vector.load %arg6[%c88, %c0_282] : memref<128x512xbf16, #tpu.memory_space<vmem>>, vector<8x512xbf16>
    %cst_283 = arith.constant dense<0.000000e+00> : vector<2x32xf32>
    %312 = tpu.matmul %302, %304, %cst_283 {dimension_numbers = #tpu.dot_dimension_numbers<[1], [0], [0], [1], [0, 0, 1, 1], [], []>} : vector<2x512xbf16>, vector<512x32xbf16>, vector<2x32xf32> -> vector<2x32xf32>
    %313 = vector.broadcast %306 : vector<1x32xf32> to vector<2x32xf32>
    %314 = arith.addf %312, %313 : vector<2x32xf32>
    %cst_284 = arith.constant 0.000000e+00 : f32
    %315 = vector.broadcast %cst_284 : f32 to vector<2x32xf32>
    %316 = arith.maximumf %314, %315 : vector<2x32xf32>
    %317 = arith.truncf %316 : vector<2x32xf32> to vector<2x32xbf16>
    %cst_285 = arith.constant dense<0.000000e+00> : vector<2x8xf32>
    %318 = tpu.matmul %317, %308, %cst_285 {dimension_numbers = #tpu.dot_dimension_numbers<[1], [0], [0], [1], [0, 0, 1, 1], [], []>} : vector<2x32xbf16>, vector<32x8xbf16>, vector<2x8xf32> -> vector<2x8xf32>
    %319 = vector.broadcast %310 : vector<1x8xf32> to vector<2x8xf32>
    %320 = arith.addf %318, %319 : vector<2x8xf32>
    %cst_286 = arith.constant 0.000000e+00 : f32
    %321 = vector.broadcast %cst_286 : f32 to vector<2x8xf32>
    %322 = arith.maximumf %320, %321 : vector<2x8xf32>
    %323 = arith.truncf %322 : vector<2x8xf32> to vector<2x8xbf16>
    %cst_287 = arith.constant dense<0.000000e+00> : vector<2x512xf32>
    %324 = tpu.matmul %323, %311, %cst_287 {dimension_numbers = #tpu.dot_dimension_numbers<[1], [0], [0], [1], [0, 0, 1, 1], [], []>} : vector<2x8xbf16>, vector<8x512xbf16>, vector<2x512xf32> -> vector<2x512xf32>
    %325 = arith.addf %300, %324 : vector<2x512xf32>
    %c0_288 = arith.constant 0 : index
    %c0_289 = arith.constant 0 : index
    %326 = vector.load %arg12[%c0_288, %c0_289] : memref<2x512xf32, #tpu.memory_space<vmem>>, vector<2x512xf32>
    tpu.vector_store %arg12[%c0_288, %c0_289], %325 {strides = array<i32>} : memref<2x512xf32, #tpu.memory_space<vmem>>, vector<2x512xf32>,
    %c0_290 = arith.constant 0 : index
    %c0_291 = arith.constant 0 : index
    %327 = vector.load %arg12[%c0_290, %c0_291] : memref<2x512xf32, #tpu.memory_space<vmem>>, vector<2x512xf32>
    %c12 = arith.constant 12 : index
    %c0_292 = arith.constant 0 : index
    %c0_293 = arith.constant 0 : index
    %328 = vector.load %arg1[%c12, %c0_292, %c0_293] : memref<16x2x512xbf16, #tpu.memory_space<vmem>>, vector<1x2x512xbf16>
    %329 = vector.shape_cast %328 : vector<1x2x512xbf16> to vector<2x512xbf16>
    %c12_294 = arith.constant 12 : index
    %c0_295 = arith.constant 0 : index
    %c0_296 = arith.constant 0 : index
    %330 = vector.load %arg2[%c12_294, %c0_295, %c0_296] : memref<16x512x32xbf16, #tpu.memory_space<vmem>>, vector<1x512x32xbf16>
    %331 = vector.shape_cast %330 : vector<1x512x32xbf16> to vector<512x32xbf16>
    %c12_297 = arith.constant 12 : index
    %c0_298 = arith.constant 0 : index
    %c0_299 = arith.constant 0 : index
    %332 = vector.load %arg3[%c12_297, %c0_298, %c0_299] : memref<16x1x32xf32, #tpu.memory_space<vmem>>, vector<1x1x32xf32>
    %333 = vector.shape_cast %332 : vector<1x1x32xf32> to vector<1x32xf32>
    %c12_300 = arith.constant 12 : index
    %c0_301 = arith.constant 0 : index
    %c0_302 = arith.constant 0 : index
    %334 = vector.load %arg4[%c12_300, %c0_301, %c0_302] : memref<16x32x8xbf16, #tpu.memory_space<vmem>>, vector<1x32x8xbf16>
    %335 = vector.shape_cast %334 : vector<1x32x8xbf16> to vector<32x8xbf16>
    %c12_303 = arith.constant 12 : index
    %c0_304 = arith.constant 0 : index
    %c0_305 = arith.constant 0 : index
    %336 = vector.load %arg5[%c12_303, %c0_304, %c0_305] : memref<16x1x8xf32, #tpu.memory_space<vmem>>, vector<1x1x8xf32>
    %337 = vector.shape_cast %336 : vector<1x1x8xf32> to vector<1x8xf32>
    %c96 = arith.constant 96 : index
    %c0_306 = arith.constant 0 : index
    %338 = vector.load %arg6[%c96, %c0_306] : memref<128x512xbf16, #tpu.memory_space<vmem>>, vector<8x512xbf16>
    %cst_307 = arith.constant dense<0.000000e+00> : vector<2x32xf32>
    %339 = tpu.matmul %329, %331, %cst_307 {dimension_numbers = #tpu.dot_dimension_numbers<[1], [0], [0], [1], [0, 0, 1, 1], [], []>} : vector<2x512xbf16>, vector<512x32xbf16>, vector<2x32xf32> -> vector<2x32xf32>
    %340 = vector.broadcast %333 : vector<1x32xf32> to vector<2x32xf32>
    %341 = arith.addf %339, %340 : vector<2x32xf32>
    %cst_308 = arith.constant 0.000000e+00 : f32
    %342 = vector.broadcast %cst_308 : f32 to vector<2x32xf32>
    %343 = arith.maximumf %341, %342 : vector<2x32xf32>
    %344 = arith.truncf %343 : vector<2x32xf32> to vector<2x32xbf16>
    %cst_309 = arith.constant dense<0.000000e+00> : vector<2x8xf32>
    %345 = tpu.matmul %344, %335, %cst_309 {dimension_numbers = #tpu.dot_dimension_numbers<[1], [0], [0], [1], [0, 0, 1, 1], [], []>} : vector<2x32xbf16>, vector<32x8xbf16>, vector<2x8xf32> -> vector<2x8xf32>
    %346 = vector.broadcast %337 : vector<1x8xf32> to vector<2x8xf32>
    %347 = arith.addf %345, %346 : vector<2x8xf32>
    %cst_310 = arith.constant 0.000000e+00 : f32
    %348 = vector.broadcast %cst_310 : f32 to vector<2x8xf32>
    %349 = arith.maximumf %347, %348 : vector<2x8xf32>
    %350 = arith.truncf %349 : vector<2x8xf32> to vector<2x8xbf16>
    %cst_311 = arith.constant dense<0.000000e+00> : vector<2x512xf32>
    %351 = tpu.matmul %350, %338, %cst_311 {dimension_numbers = #tpu.dot_dimension_numbers<[1], [0], [0], [1], [0, 0, 1, 1], [], []>} : vector<2x8xbf16>, vector<8x512xbf16>, vector<2x512xf32> -> vector<2x512xf32>
    %352 = arith.addf %327, %351 : vector<2x512xf32>
    %c0_312 = arith.constant 0 : index
    %c0_313 = arith.constant 0 : index
    %353 = vector.load %arg12[%c0_312, %c0_313] : memref<2x512xf32, #tpu.memory_space<vmem>>, vector<2x512xf32>
    tpu.vector_store %arg12[%c0_312, %c0_313], %352 {strides = array<i32>} : memref<2x512xf32, #tpu.memory_space<vmem>>, vector<2x512xf32>,
    %c0_314 = arith.constant 0 : index
    %c0_315 = arith.constant 0 : index
    %354 = vector.load %arg12[%c0_314, %c0_315] : memref<2x512xf32, #tpu.memory_space<vmem>>, vector<2x512xf32>
    %c13 = arith.constant 13 : index
    %c0_316 = arith.constant 0 : index
    %c0_317 = arith.constant 0 : index
    %355 = vector.load %arg1[%c13, %c0_316, %c0_317] : memref<16x2x512xbf16, #tpu.memory_space<vmem>>, vector<1x2x512xbf16>
    %356 = vector.shape_cast %355 : vector<1x2x512xbf16> to vector<2x512xbf16>
    %c13_318 = arith.constant 13 : index
    %c0_319 = arith.constant 0 : index
    %c0_320 = arith.constant 0 : index
    %357 = vector.load %arg2[%c13_318, %c0_319, %c0_320] : memref<16x512x32xbf16, #tpu.memory_space<vmem>>, vector<1x512x32xbf16>
    %358 = vector.shape_cast %357 : vector<1x512x32xbf16> to vector<512x32xbf16>
    %c13_321 = arith.constant 13 : index
    %c0_322 = arith.constant 0 : index
    %c0_323 = arith.constant 0 : index
    %359 = vector.load %arg3[%c13_321, %c0_322, %c0_323] : memref<16x1x32xf32, #tpu.memory_space<vmem>>, vector<1x1x32xf32>
    %360 = vector.shape_cast %359 : vector<1x1x32xf32> to vector<1x32xf32>
    %c13_324 = arith.constant 13 : index
    %c0_325 = arith.constant 0 : index
    %c0_326 = arith.constant 0 : index
    %361 = vector.load %arg4[%c13_324, %c0_325, %c0_326] : memref<16x32x8xbf16, #tpu.memory_space<vmem>>, vector<1x32x8xbf16>
    %362 = vector.shape_cast %361 : vector<1x32x8xbf16> to vector<32x8xbf16>
    %c13_327 = arith.constant 13 : index
    %c0_328 = arith.constant 0 : index
    %c0_329 = arith.constant 0 : index
    %363 = vector.load %arg5[%c13_327, %c0_328, %c0_329] : memref<16x1x8xf32, #tpu.memory_space<vmem>>, vector<1x1x8xf32>
    %364 = vector.shape_cast %363 : vector<1x1x8xf32> to vector<1x8xf32>
    %c104 = arith.constant 104 : index
    %c0_330 = arith.constant 0 : index
    %365 = vector.load %arg6[%c104, %c0_330] : memref<128x512xbf16, #tpu.memory_space<vmem>>, vector<8x512xbf16>
    %cst_331 = arith.constant dense<0.000000e+00> : vector<2x32xf32>
    %366 = tpu.matmul %356, %358, %cst_331 {dimension_numbers = #tpu.dot_dimension_numbers<[1], [0], [0], [1], [0, 0, 1, 1], [], []>} : vector<2x512xbf16>, vector<512x32xbf16>, vector<2x32xf32> -> vector<2x32xf32>
    %367 = vector.broadcast %360 : vector<1x32xf32> to vector<2x32xf32>
    %368 = arith.addf %366, %367 : vector<2x32xf32>
    %cst_332 = arith.constant 0.000000e+00 : f32
    %369 = vector.broadcast %cst_332 : f32 to vector<2x32xf32>
    %370 = arith.maximumf %368, %369 : vector<2x32xf32>
    %371 = arith.truncf %370 : vector<2x32xf32> to vector<2x32xbf16>
    %cst_333 = arith.constant dense<0.000000e+00> : vector<2x8xf32>
    %372 = tpu.matmul %371, %362, %cst_333 {dimension_numbers = #tpu.dot_dimension_numbers<[1], [0], [0], [1], [0, 0, 1, 1], [], []>} : vector<2x32xbf16>, vector<32x8xbf16>, vector<2x8xf32> -> vector<2x8xf32>
    %373 = vector.broadcast %364 : vector<1x8xf32> to vector<2x8xf32>
    %374 = arith.addf %372, %373 : vector<2x8xf32>
    %cst_334 = arith.constant 0.000000e+00 : f32
    %375 = vector.broadcast %cst_334 : f32 to vector<2x8xf32>
    %376 = arith.maximumf %374, %375 : vector<2x8xf32>
    %377 = arith.truncf %376 : vector<2x8xf32> to vector<2x8xbf16>
    %cst_335 = arith.constant dense<0.000000e+00> : vector<2x512xf32>
    %378 = tpu.matmul %377, %365, %cst_335 {dimension_numbers = #tpu.dot_dimension_numbers<[1], [0], [0], [1], [0, 0, 1, 1], [], []>} : vector<2x8xbf16>, vector<8x512xbf16>, vector<2x512xf32> -> vector<2x512xf32>
    %379 = arith.addf %354, %378 : vector<2x512xf32>
    %c0_336 = arith.constant 0 : index
    %c0_337 = arith.constant 0 : index
    %380 = vector.load %arg12[%c0_336, %c0_337] : memref<2x512xf32, #tpu.memory_space<vmem>>, vector<2x512xf32>
    tpu.vector_store %arg12[%c0_336, %c0_337], %379 {strides = array<i32>} : memref<2x512xf32, #tpu.memory_space<vmem>>, vector<2x512xf32>,
    %c0_338 = arith.constant 0 : index
    %c0_339 = arith.constant 0 : index
    %381 = vector.load %arg12[%c0_338, %c0_339] : memref<2x512xf32, #tpu.memory_space<vmem>>, vector<2x512xf32>
    %c14 = arith.constant 14 : index
    %c0_340 = arith.constant 0 : index
    %c0_341 = arith.constant 0 : index
    %382 = vector.load %arg1[%c14, %c0_340, %c0_341] : memref<16x2x512xbf16, #tpu.memory_space<vmem>>, vector<1x2x512xbf16>
    %383 = vector.shape_cast %382 : vector<1x2x512xbf16> to vector<2x512xbf16>
    %c14_342 = arith.constant 14 : index
    %c0_343 = arith.constant 0 : index
    %c0_344 = arith.constant 0 : index
    %384 = vector.load %arg2[%c14_342, %c0_343, %c0_344] : memref<16x512x32xbf16, #tpu.memory_space<vmem>>, vector<1x512x32xbf16>
    %385 = vector.shape_cast %384 : vector<1x512x32xbf16> to vector<512x32xbf16>
    %c14_345 = arith.constant 14 : index
    %c0_346 = arith.constant 0 : index
    %c0_347 = arith.constant 0 : index
    %386 = vector.load %arg3[%c14_345, %c0_346, %c0_347] : memref<16x1x32xf32, #tpu.memory_space<vmem>>, vector<1x1x32xf32>
    %387 = vector.shape_cast %386 : vector<1x1x32xf32> to vector<1x32xf32>
    %c14_348 = arith.constant 14 : index
    %c0_349 = arith.constant 0 : index
    %c0_350 = arith.constant 0 : index
    %388 = vector.load %arg4[%c14_348, %c0_349, %c0_350] : memref<16x32x8xbf16, #tpu.memory_space<vmem>>, vector<1x32x8xbf16>
    %389 = vector.shape_cast %388 : vector<1x32x8xbf16> to vector<32x8xbf16>
    %c14_351 = arith.constant 14 : index
    %c0_352 = arith.constant 0 : index
    %c0_353 = arith.constant 0 : index
    %390 = vector.load %arg5[%c14_351, %c0_352, %c0_353] : memref<16x1x8xf32, #tpu.memory_space<vmem>>, vector<1x1x8xf32>
    %391 = vector.shape_cast %390 : vector<1x1x8xf32> to vector<1x8xf32>
    %c112 = arith.constant 112 : index
    %c0_354 = arith.constant 0 : index
    %392 = vector.load %arg6[%c112, %c0_354] : memref<128x512xbf16, #tpu.memory_space<vmem>>, vector<8x512xbf16>
    %cst_355 = arith.constant dense<0.000000e+00> : vector<2x32xf32>
    %393 = tpu.matmul %383, %385, %cst_355 {dimension_numbers = #tpu.dot_dimension_numbers<[1], [0], [0], [1], [0, 0, 1, 1], [], []>} : vector<2x512xbf16>, vector<512x32xbf16>, vector<2x32xf32> -> vector<2x32xf32>
    %394 = vector.broadcast %387 : vector<1x32xf32> to vector<2x32xf32>
    %395 = arith.addf %393, %394 : vector<2x32xf32>
    %cst_356 = arith.constant 0.000000e+00 : f32
    %396 = vector.broadcast %cst_356 : f32 to vector<2x32xf32>
    %397 = arith.maximumf %395, %396 : vector<2x32xf32>
    %398 = arith.truncf %397 : vector<2x32xf32> to vector<2x32xbf16>
    %cst_357 = arith.constant dense<0.000000e+00> : vector<2x8xf32>
    %399 = tpu.matmul %398, %389, %cst_357 {dimension_numbers = #tpu.dot_dimension_numbers<[1], [0], [0], [1], [0, 0, 1, 1], [], []>} : vector<2x32xbf16>, vector<32x8xbf16>, vector<2x8xf32> -> vector<2x8xf32>
    %400 = vector.broadcast %391 : vector<1x8xf32> to vector<2x8xf32>
    %401 = arith.addf %399, %400 : vector<2x8xf32>
    %cst_358 = arith.constant 0.000000e+00 : f32
    %402 = vector.broadcast %cst_358 : f32 to vector<2x8xf32>
    %403 = arith.maximumf %401, %402 : vector<2x8xf32>
    %404 = arith.truncf %403 : vector<2x8xf32> to vector<2x8xbf16>
    %cst_359 = arith.constant dense<0.000000e+00> : vector<2x512xf32>
    %405 = tpu.matmul %404, %392, %cst_359 {dimension_numbers = #tpu.dot_dimension_numbers<[1], [0], [0], [1], [0, 0, 1, 1], [], []>} : vector<2x8xbf16>, vector<8x512xbf16>, vector<2x512xf32> -> vector<2x512xf32>
    %406 = arith.addf %381, %405 : vector<2x512xf32>
    %c0_360 = arith.constant 0 : index
    %c0_361 = arith.constant 0 : index
    %407 = vector.load %arg12[%c0_360, %c0_361] : memref<2x512xf32, #tpu.memory_space<vmem>>, vector<2x512xf32>
    tpu.vector_store %arg12[%c0_360, %c0_361], %406 {strides = array<i32>} : memref<2x512xf32, #tpu.memory_space<vmem>>, vector<2x512xf32>,
    %c0_362 = arith.constant 0 : index
    %c0_363 = arith.constant 0 : index
    %408 = vector.load %arg12[%c0_362, %c0_363] : memref<2x512xf32, #tpu.memory_space<vmem>>, vector<2x512xf32>
    %c15 = arith.constant 15 : index
    %c0_364 = arith.constant 0 : index
    %c0_365 = arith.constant 0 : index
    %409 = vector.load %arg1[%c15, %c0_364, %c0_365] : memref<16x2x512xbf16, #tpu.memory_space<vmem>>, vector<1x2x512xbf16>
    %410 = vector.shape_cast %409 : vector<1x2x512xbf16> to vector<2x512xbf16>
    %c15_366 = arith.constant 15 : index
    %c0_367 = arith.constant 0 : index
    %c0_368 = arith.constant 0 : index
    %411 = vector.load %arg2[%c15_366, %c0_367, %c0_368] : memref<16x512x32xbf16, #tpu.memory_space<vmem>>, vector<1x512x32xbf16>
    %412 = vector.shape_cast %411 : vector<1x512x32xbf16> to vector<512x32xbf16>
    %c15_369 = arith.constant 15 : index
    %c0_370 = arith.constant 0 : index
    %c0_371 = arith.constant 0 : index
    %413 = vector.load %arg3[%c15_369, %c0_370, %c0_371] : memref<16x1x32xf32, #tpu.memory_space<vmem>>, vector<1x1x32xf32>
    %414 = vector.shape_cast %413 : vector<1x1x32xf32> to vector<1x32xf32>
    %c15_372 = arith.constant 15 : index
    %c0_373 = arith.constant 0 : index
    %c0_374 = arith.constant 0 : index
    %415 = vector.load %arg4[%c15_372, %c0_373, %c0_374] : memref<16x32x8xbf16, #tpu.memory_space<vmem>>, vector<1x32x8xbf16>
    %416 = vector.shape_cast %415 : vector<1x32x8xbf16> to vector<32x8xbf16>
    %c15_375 = arith.constant 15 : index
    %c0_376 = arith.constant 0 : index
    %c0_377 = arith.constant 0 : index
    %417 = vector.load %arg5[%c15_375, %c0_376, %c0_377] : memref<16x1x8xf32, #tpu.memory_space<vmem>>, vector<1x1x8xf32>
    %418 = vector.shape_cast %417 : vector<1x1x8xf32> to vector<1x8xf32>
    %c120 = arith.constant 120 : index
    %c0_378 = arith.constant 0 : index
    %419 = vector.load %arg6[%c120, %c0_378] : memref<128x512xbf16, #tpu.memory_space<vmem>>, vector<8x512xbf16>
    %cst_379 = arith.constant dense<0.000000e+00> : vector<2x32xf32>
    %420 = tpu.matmul %410, %412, %cst_379 {dimension_numbers = #tpu.dot_dimension_numbers<[1], [0], [0], [1], [0, 0, 1, 1], [], []>} : vector<2x512xbf16>, vector<512x32xbf16>, vector<2x32xf32> -> vector<2x32xf32>
    %421 = vector.broadcast %414 : vector<1x32xf32> to vector<2x32xf32>
    %422 = arith.addf %420, %421 : vector<2x32xf32>
    %cst_380 = arith.constant 0.000000e+00 : f32
    %423 = vector.broadcast %cst_380 : f32 to vector<2x32xf32>
    %424 = arith.maximumf %422, %423 : vector<2x32xf32>
    %425 = arith.truncf %424 : vector<2x32xf32> to vector<2x32xbf16>
    %cst_381 = arith.constant dense<0.000000e+00> : vector<2x8xf32>
    %426 = tpu.matmul %425, %416, %cst_381 {dimension_numbers = #tpu.dot_dimension_numbers<[1], [0], [0], [1], [0, 0, 1, 1], [], []>} : vector<2x32xbf16>, vector<32x8xbf16>, vector<2x8xf32> -> vector<2x8xf32>
    %427 = vector.broadcast %418 : vector<1x8xf32> to vector<2x8xf32>
    %428 = arith.addf %426, %427 : vector<2x8xf32>
    %cst_382 = arith.constant 0.000000e+00 : f32
    %429 = vector.broadcast %cst_382 : f32 to vector<2x8xf32>
    %430 = arith.maximumf %428, %429 : vector<2x8xf32>
    %431 = arith.truncf %430 : vector<2x8xf32> to vector<2x8xbf16>
    %cst_383 = arith.constant dense<0.000000e+00> : vector<2x512xf32>
    %432 = tpu.matmul %431, %419, %cst_383 {dimension_numbers = #tpu.dot_dimension_numbers<[1], [0], [0], [1], [0, 0, 1, 1], [], []>} : vector<2x8xbf16>, vector<8x512xbf16>, vector<2x512xf32> -> vector<2x512xf32>
    %433 = arith.addf %408, %432 : vector<2x512xf32>
    %c0_384 = arith.constant 0 : index
    %c0_385 = arith.constant 0 : index
    %434 = vector.load %arg12[%c0_384, %c0_385] : memref<2x512xf32, #tpu.memory_space<vmem>>, vector<2x512xf32>
    tpu.vector_store %arg12[%c0_384, %c0_385], %433 {strides = array<i32>} : memref<2x512xf32, #tpu.memory_space<vmem>>, vector<2x512xf32>,
    %c1_i32 = arith.constant 1 : i32
    %435 = arith.cmpi eq, %arg0, %c1_i32 : i32
    %436 = arith.extui %435 : i1 to i32
    %c0_i32_386 = arith.constant 0 : i32
    %437 = arith.cmpi ne, %436, %c0_i32_386 : i32
    scf.if %437 {
      %c0_387 = arith.constant 0 : index
      %c0_388 = arith.constant 0 : index
      %438 = vector.load %arg12[%c0_387, %c0_388] : memref<2x512xf32, #tpu.memory_space<vmem>>, vector<2x512xf32>
      %c0_389 = arith.constant 0 : index
      %c0_390 = arith.constant 0 : index
      %439 = vector.load %arg7[%c0_389, %c0_390] : memref<1x512xf32, #tpu.memory_space<vmem>>, vector<1x512xf32>
      %440 = vector.broadcast %439 : vector<1x512xf32> to vector<2x512xf32>
      %441 = arith.addf %438, %440 : vector<2x512xf32>
      %cst_391 = arith.constant 0.000000e+00 : f32
      %442 = vector.broadcast %cst_391 : f32 to vector<2x512xf32>
      %443 = arith.maximumf %441, %442 : vector<2x512xf32>
      %444 = arith.truncf %443 : vector<2x512xf32> to vector<2x512xbf16>
      %c0_392 = arith.constant 0 : index
      %c0_393 = arith.constant 0 : index
      %445 = vector.load %arg8[%c0_392, %c0_393] : memref<512x256xbf16, #tpu.memory_space<vmem>>, vector<512x256xbf16>
      %cst_394 = arith.constant dense<0.000000e+00> : vector<2x256xf32>
      %446 = tpu.matmul %444, %445, %cst_394 {dimension_numbers = #tpu.dot_dimension_numbers<[1], [0], [0], [1], [0, 0, 1, 1], [], []>} : vector<2x512xbf16>, vector<512x256xbf16>, vector<2x256xf32> -> vector<2x256xf32>
      %c0_395 = arith.constant 0 : index
      %c0_396 = arith.constant 0 : index
      %447 = vector.load %arg9[%c0_395, %c0_396] : memref<1x256xf32, #tpu.memory_space<vmem>>, vector<1x256xf32>
      %448 = vector.broadcast %447 : vector<1x256xf32> to vector<2x256xf32>
      %449 = arith.addf %446, %448 : vector<2x256xf32>
      %cst_397 = arith.constant 0.000000e+00 : f32
      %450 = vector.broadcast %cst_397 : f32 to vector<2x256xf32>
      %451 = arith.maximumf %449, %450 : vector<2x256xf32>
      %452 = arith.truncf %451 : vector<2x256xf32> to vector<2x256xbf16>
      %c0_398 = arith.constant 0 : index
      %c0_399 = arith.constant 0 : index
      %453 = vector.load %arg10[%c0_398, %c0_399] : memref<256x6xbf16, #tpu.memory_space<vmem>>, vector<256x6xbf16>
      %cst_400 = arith.constant dense<0.000000e+00> : vector<2x6xf32>
      %454 = tpu.matmul %452, %453, %cst_400 {dimension_numbers = #tpu.dot_dimension_numbers<[1], [0], [0], [1], [0, 0, 1, 1], [], []>} : vector<2x256xbf16>, vector<256x6xbf16>, vector<2x6xf32> -> vector<2x6xf32>
      %cst_401 = arith.constant 0.000000e+00 : f32
      %cst_402 = arith.constant 6.000000e+00 : f32
      %455 = vector.broadcast %cst_401 : f32 to vector<2x6xf32>
      %456 = arith.maximumf %455, %454 : vector<2x6xf32>
      %457 = vector.broadcast %cst_402 : f32 to vector<2x6xf32>
      %458 = arith.minimumf %457, %456 : vector<2x6xf32>
      %c0_403 = arith.constant 0 : index
      %c0_404 = arith.constant 0 : index
      %459 = vector.load %arg11[%c0_403, %c0_404] : memref<2x6xf32, #tpu.memory_space<vmem>>, vector<2x6xf32>
      tpu.vector_store %arg11[%c0_403, %c0_404], %458 {strides = array<i32>} : memref<2x6xf32, #tpu.memory_space<vmem>>, vector<2x6xf32>,
    } else {
    }
    return
  }
  func.func @transform_0(%arg0: i32) -> (i32, i32, i32) {
    %c0_i32 = arith.constant 0 : i32
    %c0_i32_0 = arith.constant 0 : i32
    %c0_i32_1 = arith.constant 0 : i32
    return %arg0, %c0_i32, %c0_i32_0 : i32, i32, i32
  }
  func.func @transform_1(%arg0: i32) -> (i32, i32, i32) {
    %c0_i32 = arith.constant 0 : i32
    %c0_i32_0 = arith.constant 0 : i32
    %c0_i32_1 = arith.constant 0 : i32
    return %arg0, %c0_i32, %c0_i32_0 : i32, i32, i32
  }
  func.func @transform_2(%arg0: i32) -> (i32, i32, i32) {
    %c0_i32 = arith.constant 0 : i32
    %c0_i32_0 = arith.constant 0 : i32
    %c0_i32_1 = arith.constant 0 : i32
    return %arg0, %c0_i32, %c0_i32_0 : i32, i32, i32
  }
  func.func @transform_3(%arg0: i32) -> (i32, i32, i32) {
    %c0_i32 = arith.constant 0 : i32
    %c0_i32_0 = arith.constant 0 : i32
    %c0_i32_1 = arith.constant 0 : i32
    return %arg0, %c0_i32, %c0_i32_0 : i32, i32, i32
  }
  func.func @transform_4(%arg0: i32) -> (i32, i32, i32) {
    %c0_i32 = arith.constant 0 : i32
    %c0_i32_0 = arith.constant 0 : i32
    %c0_i32_1 = arith.constant 0 : i32
    return %arg0, %c0_i32, %c0_i32_0 : i32, i32, i32
  }
  func.func @transform_5(%arg0: i32) -> (i32, i32) {
    %c0_i32 = arith.constant 0 : i32
    %c0_i32_0 = arith.constant 0 : i32
    return %arg0, %c0_i32 : i32, i32
  }
  func.func @transform_6(%arg0: i32) -> (i32, i32) {
    %c0_i32 = arith.constant 0 : i32
    %c0_i32_0 = arith.constant 0 : i32
    %c0_i32_1 = arith.constant 0 : i32
    return %c0_i32, %c0_i32_0 : i32, i32
  }
  func.func @transform_7(%arg0: i32) -> (i32, i32) {
    %c0_i32 = arith.constant 0 : i32
    %c0_i32_0 = arith.constant 0 : i32
    %c0_i32_1 = arith.constant 0 : i32
    return %c0_i32, %c0_i32_0 : i32, i32
  }
  func.func @transform_8(%arg0: i32) -> (i32, i32) {
    %c0_i32 = arith.constant 0 : i32
    %c0_i32_0 = arith.constant 0 : i32
    %c0_i32_1 = arith.constant 0 : i32
    return %c0_i32, %c0_i32_0 : i32, i32
  }
  func.func @transform_9(%arg0: i32) -> (i32, i32) {
    %c0_i32 = arith.constant 0 : i32
    %c0_i32_0 = arith.constant 0 : i32
    %c0_i32_1 = arith.constant 0 : i32
    return %c0_i32, %c0_i32_0 : i32, i32
  }
  func.func @transform_10(%arg0: i32) -> (i32, i32) {
    %c0_i32 = arith.constant 0 : i32
    %c0_i32_0 = arith.constant 0 : i32
    %c0_i32_1 = arith.constant 0 : i32
    return %c0_i32, %c0_i32_0 : i32, i32
  }
}

</mosaic_0001>

<bundles_post_ra>
// kernel: encoder_ocd_forward.1
= control target key start
LH: loop header
LB: loop body
LE: loop exit
PB: predicated region body
PF: predicated region fallthrough
CT: control target
= control target key end

     0   :  { %15 = vsyncpa [#allocation4], 0  ;;  %s14254_s13 = smov 0   ;;  %s15612_s0 = inlined_call_operand.vmem [shape: bf16[32,2,512], index: 0, kind: input, shape index: {}]   ;;  %s15613_s1 = inlined_call_operand.vmem [shape: bf16[32,512,32], index: 1, kind: input, shape index: {}]   ;;  %s15614_s2 = inlined_call_operand.vmem [shape: f32[32,1,32], index: 2, kind: input, shape index: {}]   ;;  %s15615_s3 = inlined_call_operand.vmem [shape: bf16[32,32,8], index: 3, kind: input, shape index: {}]   ;;  %s15616_s4 = inlined_call_operand.vmem [shape: f32[32,1,8], index: 4, kind: input, shape index: {}]   ;;  %s15617_s5 = inlined_call_operand.vmem [shape: bf16[256,512], index: 5, kind: input, shape index: {}]   ;;  %s15618_s6 = inlined_call_operand.vmem [shape: f32[1,512], index: 6, kind: input, shape index: {}]   ;;  %s15619_s7 = inlined_call_operand.vmem [shape: bf16[512,256], index: 7, kind: input, shape index: {}]   ;;  %s15620_s8 = inlined_call_operand.vmem [shape: f32[1,256], index: 8, kind: input, shape index: {}]   ;;  %s15621_s9 = inlined_call_operand.vmem [shape: bf16[256,6], index: 9, kind: input, shape index: {}]   ;;  %s15622_s10 = inlined_call_operand.hbm [shape: f32[2,6], index: 10, kind: output, shape index: {}]  }
   0x1 LB: > { %s14260_s14 = sadd.s32 4294967295, %s14190_s13   ;;  %p10603_p0 = scmp.ge.s32.totalorder %s14190_s13, 1  ;;  %s14190_s13 = sphi %s14254_s13, %s21_s13  }
   0x2   : > { %p365_p1 = scmp.lt.s32.totalorder %s14190_s13, 3 }
   0x4   : > { %p366_p2 = pnand %p10603_p0, %p365_p1 }
   0x5   : > { %s10604_s15 = sshll.u32 (!%p366_p2), %s14260_s14, 4  ;;  %p10617_p4 = scmp.ne.s32.totalorder (!%p366_p2), %s14260_s14, 0 }
   0x6   : > { %369 = sbr.rel (%p366_p2) target bundleno = 8320 (0x2080), region = 60  ;;  %p425_p3 = scmp.lt.s32.totalorder (!%p366_p2), %s10604_s15, 31 }
   0xd   : > { %s15624_s15 = smov (!%p425_p3, %s10604_s15), 31  ;;  %465 = sbr.rel (%p10617_p4) target bundleno = 20 (0x14), region = 64 }
   0xe   : > { %s10605_s16 = sshll.u32 %s15624_s15, 2  ;;  %s12504_s17 = sshll.u32 %s15624_s15, 8  ;;  %v14192_v0 = vmov (!%p10617_p4), 0.0  }
   0xf   : > { %s14268_s20 = scalar_lea.vmem %s15612_s0, %s10605_s16  ;;  %s14273_s23 = scalar_lea.vmem %s15613_s1, %s12504_s17  ;;  %466 = vst [vmem:[#allocation2] sm:$0xff] (!%p10617_p4), %v14192_v0 }
  0x10   : > { %s14278_s26 = scalar_lea.vmem %s15614_s2, %s15624_s15  ;;  %s12505_s27 = sshll.u32 %s15624_s15, 4 }
  0x11   : > { %s14283_s30 = scalar_lea.vmem %s15615_s3, %s12505_s27  ;;  %s14288_s16 = scalar_lea.vmem %s15616_s4, %s15624_s15 }
  0x12   : > { %s14293_s17 = scalar_lea.vmem %s15617_s5, %s12505_s27 }
  0x14 PF: > { %v13434_v1 = vld [vmem:[%s14273_s23 + $0x40] sm:$0xff]   ;;  %v13438_v5 = vld [vmem:[%s14273_s23 + $0x48] sm:$0xff]   ;;  %v13442_v9 = vld [vmem:[%s14273_s23 + $0x50] sm:$0xff]   ;;  %v559_v29 = vlaneseq  ;;  %v14193_v36 = vmov 1966171168   ;;  %v14194_v46 = vmov 0.0  }
  0x15   : > { %v13435_v2 = vld [vmem:[%s14273_s23 + $0xc0] sm:$0xff]   ;;  %12507 = vmatprep.subr.bf16.mxu0 %v13434_v1  ;;  %v13439_v6 = vld [vmem:[%s14273_s23 + $0xc8] sm:$0xff]   ;;  %v13443_v10 = vld [vmem:[%s14273_s23 + $0xd0] sm:$0xff]   ;;  %v557_v37 = vunpack.c.l.s4 %v14193_v36  ;;  %vm14195_vm0 = vmmov 0   ;;  %vm928_vm1 = vcmask 1043456   ;;  %vm868_vm2 = vcmask 261120  }
  0x16   : > { %v13436_v3 = vld [vmem:[%s14273_s23] sm:$0xff]   ;;  %12529 = vmatprep.subr.bf16.mxu1 %v13435_v2  ;;  %v13440_v7 = vld [vmem:[%s14273_s23 + $0x8] sm:$0xff]   ;;  %v13444_v11 = vld [vmem:[%s14273_s23 + $0x10] sm:$0xff]   ;;  %v14328_v34 = vshrl.u32 %v559_v29, 7  ;;  %vm924_vm3 = vcmask 64512   ;;  %p12419_p5 = scmp.ne.s32.totalorder %s14260_s14, 1 }
  0x17   : > { %v13437_v4 = vld [vmem:[%s14273_s23 + $0x80] sm:$0xff]   ;;  %12508 = vmatpush3.bf16.msra.mxu0 %v13436_v3  ;;  %v13441_v8 = vld [vmem:[%s14273_s23 + $0x88] sm:$0xff]   ;;  %v13445_v12 = vld [vmem:[%s14273_s23 + $0x90] sm:$0xff]   ;;  %v558_v39 = vunpack.c.0.s8 %v557_v37  ;;  %vm10498_vm4 = vcmask (!%p12419_p5), 41984  }
  0x18   : > { %12530 = vmatpush3.bf16.msra.mxu1 %v13437_v4  ;;  %12509 = vmatprep.subr.bf16.mxu0 %v13438_v5  ;;  %v13446_v13 = vld [vmem:[%s14273_s23 + $0x58] sm:$0xff]   ;;  %v13450_v17 = vld [vmem:[%s14273_s23 + $0x60] sm:$0xff]   ;;  %v13454_v21 = vld [vmem:[%s14273_s23 + $0x68] sm:$0xff]  }
  0x19   : > { %12531 = vmatprep.subr.bf16.mxu1 %v13439_v6  ;;  %v13447_v14 = vld [vmem:[%s14273_s23 + $0xd8] sm:$0xff]   ;;  %v13451_v18 = vld [vmem:[%s14273_s23 + $0xe0] sm:$0xff]   ;;  %v13455_v22 = vld [vmem:[%s14273_s23 + $0xe8] sm:$0xff]   ;;  %v14332_v40 = vsub.s32 %v558_v39, %v14328_v34 }
  0x1a   : > { %v13448_v15 = vld [vmem:[%s14273_s23 + $0x18] sm:$0xff]   ;;  %v13452_v19 = vld [vmem:[%s14273_s23 + $0x20] sm:$0xff]   ;;  %v13456_v23 = vld [vmem:[%s14273_s23 + $0x28] sm:$0xff]  }
  0x1b   : > { %12510 = vmatpush3.bf16.msra.mxu0 %v13440_v7  ;;  %v13449_v16 = vld [vmem:[%s14273_s23 + $0x98] sm:$0xff]   ;;  %v13453_v20 = vld [vmem:[%s14273_s23 + $0xa0] sm:$0xff]   ;;  %v13457_v24 = vld [vmem:[%s14273_s23 + $0xa8] sm:$0xff]  }
  0x1c   : > { %12532 = vmatpush3.bf16.msra.mxu1 %v13441_v8  ;;  %12511 = vmatprep.subr.bf16.mxu0 %v13442_v9  ;;  %v13458_v25 = vld [vmem:[%s14273_s23 + $0x70] sm:$0xff]   ;;  %v13462_v30 = vld [vmem:[%s14273_s23 + $0x78] sm:$0xff]   ;;  %v10619_v35 = vld.sshfl [vmem:[%s14268_s20] sm:$0x33 pattern:$0x75316420] }
  0x1d   : > { %12533 = vmatprep.subr.bf16.mxu1 %v13443_v10  ;;  %v13459_v26 = vld [vmem:[%s14273_s23 + $0xf0] sm:$0xff]   ;;  %v13463_v31 = vld [vmem:[%s14273_s23 + $0xf8] sm:$0xff]   ;;  %v555_v38 = vcombine.high %v10619_v35, %v10619_v35  ;;  %v562_v42 = vrot.slane %v10619_v35, %v14332_v40  ;;  %v13466_v45 = vld [vmem:[%s14283_s30] sm:$0xff]   ;;  %v14196_v9 = vmov 0  }
  0x1e   : > { %v13460_v27 = vld [vmem:[%s14273_s23 + $0x30] sm:$0xff]   ;;  %v13464_v32 = vld [vmem:[%s14273_s23 + $0x38] sm:$0xff]   ;;  %v13467_v47 = vld [vmem:[%s14283_s30 + $0x8] sm:$0xff]  }
  0x1f   : > { %12512 = vmatpush3.bf16.msra.mxu0 %v13444_v11  ;;  %v13461_v28 = vld [vmem:[%s14273_s23 + $0xb0] sm:$0xff]   ;;  %v13465_v33 = vld [vmem:[%s14273_s23 + $0xb8] sm:$0xff]   ;;  %v569_v41 = vrot.slane %v555_v38, %v14332_v40  ;;  %v570_v44 = vcombine.high %v562_v42, %v562_v42  ;;  %v539_v48 = vld [vmem:[%s14293_s17] sm:$0xff] }
  0x20   : > { %12534 = vmatpush3.bf16.msra.mxu1 %v13445_v12  ;;  %12513 = vmatprep.subr.bf16.mxu0 %v13446_v13  ;;  %v10657_v49 = vcombine.high %v539_v48, %v539_v48  ;;  %v10656_v50 = vcombine.low %v539_v48, %v539_v48  ;;  %v10618_v52 = vld [vmem:[%s14278_s26] ss:$0 sm:$0xff]  ;;  %v540_v3 = vld [vmem:[%s14293_s17 + $0x8] sm:$0xff]  ;;  %v13481_v29 = vld [vmem:[%s14273_s23 + $0x1d0] sm:$0xff]  }
  0x21   : > { %12535 = vmatprep.subr.bf16.mxu1 %v13447_v14  ;;  %800 = vmatprep.mubr.bf16.mxu0 %v569_v41  ;;  %v571_v43 = vcombine.high %v569_v41, %v569_v41  ;;  %v10659_v4 = vcombine.high %v540_v3, %v540_v3  ;;  %v10658_v5 = vcombine.low %v540_v3, %v540_v3  ;;  %v13472_v7 = vld [vmem:[%s14273_s23 + $0x140] sm:$0xff]   ;;  %v13486_v35 = vld [vmem:[%s14273_s23 + $0x118] sm:$0xff]   ;;  %v13497_v48 = vld [vmem:[%s14273_s23 + $0x1f0] sm:$0xff]  }
  0x22   : > { %v930_v51 = vsel %vm928_vm1, %v10656_v50, 0  ;;  %v13473_v8 = vld [vmem:[%s14273_s23 + $0x1c0] sm:$0xff]   ;;  %v13487_v36 = vld [vmem:[%s14273_s23 + $0x198] sm:$0xff]   ;;  %v13499_v50 = vld [vmem:[%s14273_s23 + $0x1b0] sm:$0xff]  }
  0x23   : > { %12514 = vmatpush3.bf16.msra.mxu0 %v13448_v15  ;;  %840 = vmatprep.mubr.bf16.mxu1 %v571_v43  ;;  %v936_v6 = vsel %vm928_vm1, %v10658_v5, 0  ;;  %v14355_v10 = vld.sshfl [vmem:[%s14268_s20 + $0x4] sm:$0x33 pattern:$0x75316420]  ;;  %v13493_v43 = vld [vmem:[%s14273_s23 + $0x1e8] sm:$0xff]  }
  0x24   : > { %12536 = vmatpush3.bf16.msra.mxu1 %v13449_v16  ;;  %12515 = vmatprep.subr.bf16.mxu0 %v13450_v17  ;;  %v10652_v11 = vld [vmem:[%s14288_s16] ss:$0 sm:$0xff]  ;;  %v1140_v12 = vcombine.high %v14355_v10, %v14355_v10 }
  0x25   : > { %12537 = vmatprep.subr.bf16.mxu1 %v13451_v18  ;;  %v13488_v37 = vld [vmem:[%s14273_s23 + $0x160] sm:$0xff]  }
  0x26   : > { %v1154_v17 = vrot.slane %v1140_v12, %v14332_v40  ;;  %v13489_v38 = vld [vmem:[%s14273_s23 + $0x1e0] sm:$0xff]  }
  0x27   : > { %12516 = vmatpush3.bf16.msra.mxu0 %v13452_v19  ;;  %v13490_v39 = vld [vmem:[%s14273_s23 + $0x120] sm:$0xff]  }
  0x28   : > { %12538 = vmatpush3.bf16.msra.mxu1 %v13453_v20  ;;  %12517 = vmatprep.subr.bf16.mxu0 %v13454_v21  ;;  %v13474_v20 = vld [vmem:[%s14273_s23 + $0x100] sm:$0xff]  }
  0x29   : > { %12539 = vmatprep.subr.bf16.mxu1 %v13455_v22  ;;  %v13475_v21 = vld [vmem:[%s14273_s23 + $0x180] sm:$0xff]  }
  0x2a   : > { %v13491_v41 = vld [vmem:[%s14273_s23 + $0x1a0] sm:$0xff]  }
  0x2b   : > { %12518 = vmatpush3.bf16.msra.mxu0 %v13456_v23  ;;  %v13476_v23 = vld [vmem:[%s14273_s23 + $0x148] sm:$0xff]  }
  0x2c   : > { %12540 = vmatpush3.bf16.msra.mxu1 %v13457_v24  ;;  %12519 = vmatprep.subr.bf16.mxu0 %v13458_v25  ;;  %v13477_v24 = vld [vmem:[%s14273_s23 + $0x1c8] sm:$0xff]   ;;  %v1156_v25 = vcombine.high %v1154_v17, %v1154_v17 }
  0x2d   : > { %12541 = vmatprep.subr.bf16.mxu1 %v13459_v26  ;;  %v13478_v26 = vld [vmem:[%s14273_s23 + $0x108] sm:$0xff]  }
  0x2f   : > { %12520 = vmatpush3.bf16.msra.mxu0 %v13460_v27  ;;  %v13479_v27 = vld [vmem:[%s14273_s23 + $0x188] sm:$0xff]  }
  0x30   : > { %12542 = vmatpush3.bf16.msra.mxu1 %v13461_v28  ;;  %12521 = vmatprep.subr.bf16.mxu0 %v13462_v30  ;;  %v13480_v28 = vld [vmem:[%s14273_s23 + $0x150] sm:$0xff]  }
  0x31   : > { %12543 = vmatprep.subr.bf16.mxu1 %v13463_v31  ;;  %v13482_v30 = vld [vmem:[%s14273_s23 + $0x110] sm:$0xff]  }
  0x32   : > { %v13483_v31 = vld [vmem:[%s14273_s23 + $0x190] sm:$0xff]  }
  0x33   : > { %12522 = vmatpush3.bf16.msra.mxu0 %v13464_v32  ;;  %v13484_v32 = vld [vmem:[%s14273_s23 + $0x158] sm:$0xff]  }
  0x34   : > { %12544 = vmatpush3.bf16.msra.mxu1 %v13465_v33  ;;  %13281 = vmatprep.subr.bf16.mxu0 %v14194_v46  ;;  %v13485_v33 = vld [vmem:[%s14273_s23 + $0x1d8] sm:$0xff]  }
  0x35   : > { %10660 = vmatprep.subr.msk.bf16.mxu1 %vm928_vm1, %v10657_v49  ;;  %v13498_v49 = vld [vmem:[%s14273_s23 + $0x130] sm:$0xff]  }
  0x36   : > { %801 = vmatmul.mubr.bf16.vlgmr.msra.gmra.mrb[0].mxu0 %v562_v42  ;;  %v13492_v42 = vld [vmem:[%s14273_s23 + $0x168] sm:$0xff]  }
  0x37   : > { %841 = vmatmul.mubr.bf16.vlgmr.msra.gmra.mrb[0].mxu1 %v570_v44  ;;  %13282 = vmatpush3.bf16.msra.mxu0 %v13466_v45  ;;  %v13494_v44 = vld [vmem:[%s14273_s23 + $0x128] sm:$0xff]  }
  0x38   : > { %13283 = vmatprep.subr.bf16.mxu0 %v14194_v46  ;;  %13285 = vmatprep.mubr.msk.bf16.mxu0 %vm14195_vm0, %v14194_v46  ;;  %v13495_v45 = vld [vmem:[%s14273_s23 + $0x1a8] sm:$0xff]  }
  0x39   : > { %942 = vmatpush1.bf16.msra.mxu1 %v930_v51  ;;  %973 = vmatprep.mubr.bf16.mxu1 %v14196_v9  ;;  %v13500_v51 = vld [vmem:[%s14273_s23 + $0x178] sm:$0xff]  }
  0x3a   : > { %12554 = vmatprep.subr.bf16.mxu1 %v13472_v7 }
  0x3b   : > { %13284 = vmatpush3.bf16.msra.mxu0 %v13467_v47  ;;  %v13496_v47 = vld [vmem:[%s14273_s23 + $0x170] sm:$0xff]  }
  0x3c   : > { %10662 = vmatprep.subr.msk.bf16.mxu0 %vm928_vm1, %v10659_v4 }
 0x109   : > { %v12523_v53 = vpop.f32.mrb[0].mxu0 }
 0x10a   : > { %v12524_v54 = vpop.f32.mrb[1].mxu0  ;;  %v12545_v55 = vpop.f32.mrb[0].mxu1 }
 0x10b   : > { %v12525_v56 = vadd.f32 %v12524_v54, %v12523_v53  ;;  %v12526_v57 = vpop.f32.mrb[2].mxu0  ;;  %v12546_v58 = vpop.f32.mrb[1].mxu1  ;;  %v1147_v53 = vrot.slane %v14355_v10, %v14332_v40  ;;  %v13502_v54 = vld [vmem:[%s14273_s23 + $0x138] sm:$0xff]  }
 0x10c   : > { %v12527_v59 = vpop.f32.mrb[3].mxu0  ;;  %v12547_v61 = vadd.f32 %v12546_v58, %v12545_v55  ;;  %v12548_v62 = vpop.f32.mrb[2].mxu1  ;;  %v13503_v55 = vld [vmem:[%s14273_s23 + $0x1b8] sm:$0xff]   ;;  %v13504_v57 = vld [vmem:[%s14283_s30 + $0x10] sm:$0xff]  }
 0x10d   : > { %v803_v60 = vadd.f32 %v12525_v56, %v10618_v52  ;;  %v12549_v63 = vpop.f32.mrb[3].mxu1  ;;  %v13501_v52 = vld [vmem:[%s14273_s23 + $0x1f8] sm:$0xff]   ;;  %v1155_v56 = vcombine.high %v1147_v53, %v1147_v53  ;;  %v1124_v59 = vld [vmem:[%s14293_s17 + $0x10] sm:$0xff] }
 0x10e   : > { %v13505_v58 = vld [vmem:[%s14283_s30 + $0x18] sm:$0xff]   ;;  %v14197_v63 = vmov 1983009808  }
 0x10f   : > { %v843_v0 = vadd.f32 %v12547_v61, %v803_v60  ;;  %v10774_v60 = vcombine.high %v1124_v59, %v1124_v59  ;;  %v10773_v61 = vcombine.low %v1124_v59, %v1124_v59  ;;  %v13518_v59 = vld [vmem:[%s14273_s23 + $0x250] sm:$0xff]  }
 0x111   : > { %v848_v1 = vmax.f32 %v843_v0, 0.0  ;;  %v1512_v62 = vsel %vm928_vm1, %v10773_v61, 0  ;;  %v1030_v0 = vunpack.c.l.s4 %v14197_v63  ;;  %v13520_v61 = vld [vmem:[%s14273_s23 + $0x210] sm:$0xff]   ;;  %v13522_v63 = vld [vmem:[%s14273_s23 + $0x258] sm:$0xff]  }
 0x113   : > { %v849_v2 = vpack.c.bf16 %v848_v1, %v848_v1  ;;  %v1031_v1 = vunpack.c.0.s8 %v1030_v0  ;;  %v13523_v0 = vld [vmem:[%s14273_s23 + $0x2d8] sm:$0xff]  }
 0x115   : > { %13286 = vmatmul.mubr.msk.bf16.vlgmr.msra.gmra.mrb[4].mxu0 %vm868_vm2, %v849_v2  ;;  %v14406_v4 = vsub.s32 %v1031_v1, %v14328_v34  ;;  %v13524_v1 = vld [vmem:[%s14273_s23 + $0x218] sm:$0xff]  }
 0x116   : > { %983 = vmatpush1.bf16.msra.mxu0 %v936_v6  ;;  %1014 = vmatprep.mubr.bf16.mxu0 %v14196_v9 }
 0x117   : > { %12576 = vmatprep.subr.bf16.mxu0 %v13473_v8 }
 0x1e8   : > { %v906_v13 = vpop.f32.mrb[4].mxu0 }
 0x1e9   : > { %v907_v14 = vadd.f32 %v10652_v11, %v906_v13  ;;  %v13287_v15 = vpop.f32.mrb[5].mxu0 }
 0x1ea   : > { %v909_v16 = vpop.f32.mrb[6].mxu0 }
 0x1eb   : > { %v912_v18 = vmax.f32 %v907_v14, 0.0  ;;  %v13288_v19 = vpop.f32.mrb[7].mxu0 }
 0x1ec   : > { %v10735_v19 = vld [vmem:[%s14278_s26 + $0x1] ss:$0 sm:$0xff] }
 0x1ed   : > { %v913_v22 = vpack.c.bf16 %v912_v18, %v912_v18 }
 0x1ef   : > { %10661 = vmatmul.mubr.msk.bf16.vlgmr.msra.gmra.mrb[4].mxu1 %vm924_vm3, %v913_v22  ;;  %10663 = vmatmul.mubr.msk.bf16.vlgmr.msra.gmra.mrb[8].mxu0 %vm924_vm3, %v913_v22 }
 0x1f0   : > { %12555 = vmatpush3.bf16.msra.mxu1 %v13474_v20  ;;  %12577 = vmatpush3.bf16.msra.mxu0 %v13475_v21 }
 0x1f1   : > { %12556 = vmatprep.subr.bf16.mxu1 %v13476_v23  ;;  %12578 = vmatprep.subr.bf16.mxu0 %v13477_v24 }
 0x1f2   : > { %1385 = vmatprep.mubr.bf16.mxu1 %v1154_v17  ;;  %1425 = vmatprep.mubr.bf16.mxu0 %v1156_v25 }
 0x1f4   : > { %12557 = vmatpush3.bf16.msra.mxu1 %v13478_v26  ;;  %12579 = vmatpush3.bf16.msra.mxu0 %v13479_v27 }
 0x1f5   : > { %12558 = vmatprep.subr.bf16.mxu1 %v13480_v28  ;;  %12580 = vmatprep.subr.bf16.mxu0 %v13481_v29 }
 0x1f8   : > { %12559 = vmatpush3.bf16.msra.mxu1 %v13482_v30  ;;  %12581 = vmatpush3.bf16.msra.mxu0 %v13483_v31 }
 0x1f9   : > { %12560 = vmatprep.subr.bf16.mxu1 %v13484_v32  ;;  %12582 = vmatprep.subr.bf16.mxu0 %v13485_v33  ;;  %v1125_v32 = vld [vmem:[%s14293_s17 + $0x18] sm:$0xff] }
 0x1fa   : > { %v10776_v33 = vcombine.high %v1125_v32, %v1125_v32 }
 0x1fc   : > { %12561 = vmatpush3.bf16.msra.mxu1 %v13486_v35  ;;  %12583 = vmatpush3.bf16.msra.mxu0 %v13487_v36  ;;  %v10775_v35 = vcombine.low %v1125_v32, %v1125_v32 }
 0x1fd   : > { %12562 = vmatprep.subr.bf16.mxu1 %v13488_v37  ;;  %12584 = vmatprep.subr.bf16.mxu0 %v13489_v38  ;;  %v13510_v37 = vld [vmem:[%s14273_s23 + $0x240] sm:$0xff]  }
 0x1fe   : > { %v1518_v36 = vsel %vm928_vm1, %v10775_v35, 0  ;;  %v13511_v38 = vld [vmem:[%s14273_s23 + $0x2c0] sm:$0xff]  }
 0x200   : > { %12563 = vmatpush3.bf16.msra.mxu1 %v13490_v39  ;;  %12585 = vmatpush3.bf16.msra.mxu0 %v13491_v41  ;;  %v14425_v39 = vld.sshfl [vmem:[%s14268_s20 + $0x8] sm:$0x33 pattern:$0x75316420]  ;;  %v10769_v41 = vld [vmem:[%s14288_s16 + $0x1] ss:$0 sm:$0xff] }
 0x201   : > { %12564 = vmatprep.subr.bf16.mxu1 %v13492_v42  ;;  %12586 = vmatprep.subr.bf16.mxu0 %v13493_v43  ;;  %v1722_v42 = vcombine.high %v14425_v39, %v14425_v39 }
 0x204   : > { %12565 = vmatpush3.bf16.msra.mxu1 %v13494_v44  ;;  %12587 = vmatpush3.bf16.msra.mxu0 %v13495_v45 }
 0x205   : > { %12566 = vmatprep.subr.bf16.mxu1 %v13496_v47  ;;  %12588 = vmatprep.subr.bf16.mxu0 %v13497_v48  ;;  %v1736_v48 = vrot.slane %v1722_v42, %v14332_v40  ;;  %v467_v42 = vld [vmem:[#allocation2] sm:$0xff] }
 0x208   : > { %12567 = vmatpush3.bf16.msra.mxu1 %v13498_v49  ;;  %12589 = vmatpush3.bf16.msra.mxu0 %v13499_v50 }
 0x209   : > { %12568 = vmatprep.subr.bf16.mxu1 %v13500_v51  ;;  %12590 = vmatprep.subr.bf16.mxu0 %v13501_v52  ;;  %v13512_v51 = vld [vmem:[%s14273_s23 + $0x200] sm:$0xff]  }
 0x20a   : > { %v13513_v52 = vld [vmem:[%s14273_s23 + $0x280] sm:$0xff]  }
 0x20c   : > { %12569 = vmatpush3.bf16.msra.mxu1 %v13502_v54  ;;  %12591 = vmatpush3.bf16.msra.mxu0 %v13503_v55  ;;  %v13514_v54 = vld [vmem:[%s14273_s23 + $0x248] sm:$0xff]  }
 0x20d   : > { %13289 = vmatprep.subr.bf16.mxu1 %v14194_v46  ;;  %10777 = vmatprep.subr.msk.bf16.mxu0 %vm928_vm1, %v10774_v60  ;;  %v13515_v55 = vld [vmem:[%s14273_s23 + $0x2c8] sm:$0xff]   ;;  %v13519_v60 = vld [vmem:[%s14273_s23 + $0x2d0] sm:$0xff]  }
 0x20f   : > { %1386 = vmatmul.mubr.bf16.vlgmr.msra.gmra.mrb[8].mxu1 %v1147_v53  ;;  %1426 = vmatmul.mubr.bf16.vlgmr.msra.gmra.mrb[12].mxu0 %v1155_v56  ;;  %v1738_v56 = vcombine.high %v1736_v48, %v1736_v48 }
 0x210   : > { %13293 = vmatprep.mubr.msk.bf16.mxu1 %vm14195_vm0, %v14194_v46  ;;  %1555 = vmatprep.mubr.bf16.mxu0 %v14196_v9 }
 0x211   : > { %13290 = vmatpush3.bf16.msra.mxu1 %v13504_v57  ;;  %1524 = vmatpush1.bf16.msra.mxu0 %v1512_v62  ;;  %v13516_v57 = vld [vmem:[%s14273_s23 + $0x208] sm:$0xff]   ;;  %v13521_v62 = vld [vmem:[%s14273_s23 + $0x290] sm:$0xff]  }
 0x212   : > { %13291 = vmatprep.subr.bf16.mxu1 %v14194_v46  ;;  %12601 = vmatprep.subr.bf16.mxu0 %v13510_v37 }
 0x215   : > { %13292 = vmatpush3.bf16.msra.mxu1 %v13505_v58  ;;  %v13517_v58 = vld [vmem:[%s14273_s23 + $0x288] sm:$0xff]  }
 0x216   : > { %10779 = vmatprep.subr.msk.bf16.mxu1 %vm928_vm1, %v10776_v33 }
 0x2c2   : > { %v975_v2 = vpop.f32.mrb[4].mxu1  ;;  %v1016_v3 = vpop.f32.mrb[8].mxu0 }
 0x2c3   : > { %v977_v5 = vpop.f32.mrb[5].mxu1  ;;  %v1018_v6 = vpop.f32.mrb[9].mxu0 }
 0x2c4   : > { %v1027_v7 = vcombine.low %v975_v2, %v977_v5  ;;  %v1028_v8 = vcombine.low %v1016_v3, %v1018_v6  ;;  %v979_v10 = vpop.f32.mrb[6].mxu1  ;;  %v1020_v11 = vpop.f32.mrb[10].mxu0  ;;  %v13525_v2 = vld [vmem:[%s14273_s23 + $0x298] sm:$0xff]   ;;  %v13526_v3 = vld [vmem:[%s14273_s23 + $0x260] sm:$0xff]  }
 0x2c5   : > { %v980_v12 = vpop.f32.mrb[7].mxu1  ;;  %v1021_v13 = vpop.f32.mrb[11].mxu0  ;;  %v13527_v5 = vld [vmem:[%s14273_s23 + $0x2e0] sm:$0xff]   ;;  %v13531_v10 = vld [vmem:[%s14273_s23 + $0x2e8] sm:$0xff]  }
 0x2c6   : > { %v14409_v14 = vrot.slane %v1027_v7, %v14406_v4  ;;  %v14412_v15 = vrot.slane %v1028_v8, %v14406_v4  ;;  %v13528_v6 = vld [vmem:[%s14273_s23 + $0x220] sm:$0xff]   ;;  %v13530_v8 = vld [vmem:[%s14273_s23 + $0x268] sm:$0xff]   ;;  %v13534_v13 = vld [vmem:[%s14273_s23 + $0x270] sm:$0xff]  }
 0x2c7   : > { %v13529_v7 = vld [vmem:[%s14273_s23 + $0x2a0] sm:$0xff]   ;;  %v13532_v11 = vld [vmem:[%s14273_s23 + $0x228] sm:$0xff]  }
 0x2c8   : > { %v1043_v16 = vcombine.low %v14409_v14, %v14412_v15  ;;  %v13533_v12 = vld [vmem:[%s14273_s23 + $0x2a8] sm:$0xff]  }
 0x2e2   : > { %v12570_v17 = vpop.f32.mrb[8].mxu1  ;;  %v12592_v18 = vpop.f32.mrb[12].mxu0 }
 0x2e3   : > { %v12571_v20 = vpop.f32.mrb[9].mxu1  ;;  %v12593_v21 = vpop.f32.mrb[13].mxu0 }
 0x2e4   : > { %v12572_v22 = vadd.f32 %v12571_v20, %v12570_v17  ;;  %v12594_v23 = vadd.f32 %v12593_v21, %v12592_v18  ;;  %v12573_v24 = vpop.f32.mrb[10].mxu1  ;;  %v12595_v25 = vpop.f32.mrb[14].mxu0  ;;  %v13535_v17 = vld [vmem:[%s14273_s23 + $0x2f0] sm:$0xff]   ;;  %v13538_v20 = vld [vmem:[%s14273_s23 + $0x278] sm:$0xff]  }
 0x2e5   : > { %v12574_v26 = vpop.f32.mrb[11].mxu1  ;;  %v12596_v27 = vpop.f32.mrb[15].mxu0  ;;  %v13536_v18 = vld [vmem:[%s14273_s23 + $0x230] sm:$0xff]   ;;  %v13539_v21 = vld [vmem:[%s14273_s23 + $0x2f8] sm:$0xff]  }
 0x2e6   : > { %v1388_v28 = vadd.f32 %v12572_v22, %v10735_v19  ;;  %v13537_v19 = vld [vmem:[%s14273_s23 + $0x2b0] sm:$0xff]   ;;  %v1729_v22 = vrot.slane %v14425_v39, %v14332_v40  ;;  %v13541_v24 = vld [vmem:[%s14273_s23 + $0x2b8] sm:$0xff]   ;;  %v13542_v26 = vld [vmem:[%s14283_s30 + $0x20] sm:$0xff]  }
 0x2e7   : > { %v13543_v27 = vld [vmem:[%s14283_s30 + $0x28] sm:$0xff]  }
 0x2e8   : > { %v1428_v29 = vadd.f32 %v12594_v23, %v1388_v28  ;;  %v13540_v23 = vld [vmem:[%s14273_s23 + $0x238] sm:$0xff]   ;;  %v1737_v25 = vcombine.high %v1729_v22, %v1729_v22  ;;  %v1706_v28 = vld [vmem:[%s14293_s17 + $0x20] sm:$0xff] }
 0x2ea   : > { %v1433_v30 = vmax.f32 %v1428_v29, 0.0  ;;  %v10891_v29 = vcombine.high %v1706_v28, %v1706_v28 }
 0x2ec   : > { %v1434_v31 = vpack.c.bf16 %v1433_v30, %v1433_v30  ;;  %v10890_v30 = vcombine.low %v1706_v28, %v1706_v28  ;;  %v13556_v28 = vld [vmem:[%s14273_s23 + $0x350] sm:$0xff]  }
 0x2ee   : > { %13294 = vmatmul.mubr.msk.bf16.vlgmr.msra.gmra.mrb[12].mxu1 %vm868_vm2, %v1434_v31  ;;  %v2094_v31 = vsel %vm928_vm1, %v10890_v30, 0  ;;  %v13558_v30 = vld [vmem:[%s14273_s23 + $0x310] sm:$0xff]  }
 0x2ef   : > { %1596 = vmatprep.mubr.bf16.mxu1 %v14196_v9  ;;  %1565 = vmatpush1.bf16.msra.mxu1 %v1518_v36 }
 0x2f0   : > { %12623 = vmatprep.subr.bf16.mxu1 %v13511_v38 }
 0x3c1   : > { %v1490_v43 = vpop.f32.mrb[12].mxu1 }
 0x3c2   : > { %v1491_v44 = vadd.f32 %v10769_v41, %v1490_v43  ;;  %v13295_v45 = vpop.f32.mrb[13].mxu1 }
 0x3c3   : > { %v1493_v47 = vpop.f32.mrb[14].mxu1 }
 0x3c4   : > { %v1496_v49 = vmax.f32 %v1491_v44, 0.0  ;;  %v13296_v50 = vpop.f32.mrb[15].mxu1 }
 0x3c6   : > { %v1497_v53 = vpack.c.bf16 %v1496_v49, %v1496_v49 }
 0x3c8   : > { %10778 = vmatmul.mubr.msk.bf16.vlgmr.msra.gmra.mrb[16].mxu0 %vm924_vm3, %v1497_v53  ;;  %10780 = vmatmul.mubr.msk.bf16.vlgmr.msra.gmra.mrb[16].mxu1 %vm924_vm3, %v1497_v53  ;;  %v10852_v53 = vld [vmem:[%s14278_s26 + $0x2] ss:$0 sm:$0xff] }
 0x3c9   : > { %12602 = vmatpush3.bf16.msra.mxu0 %v13512_v51  ;;  %12624 = vmatpush3.bf16.msra.mxu1 %v13513_v52 }
 0x3ca   : > { %12603 = vmatprep.subr.bf16.mxu0 %v13514_v54  ;;  %12625 = vmatprep.subr.bf16.mxu1 %v13515_v55 }
 0x3cb   : > { %1967 = vmatprep.mubr.bf16.mxu0 %v1736_v48  ;;  %2007 = vmatprep.mubr.bf16.mxu1 %v1738_v56  ;;  %v1045_v48 = vadd.f32 %v1043_v16, %v467_v42  ;;  %v13568_v42 = vld [vmem:[%s14273_s23 + $0x368] sm:$0xff]  }
 0x3cd   : > { %12604 = vmatpush3.bf16.msra.mxu0 %v13516_v57  ;;  %12626 = vmatpush3.bf16.msra.mxu1 %v13517_v58 }
 0x3ce   : > { %12605 = vmatprep.subr.bf16.mxu0 %v13518_v59  ;;  %12627 = vmatprep.subr.bf16.mxu1 %v13519_v60 }
 0x3d1   : > { %12606 = vmatpush3.bf16.msra.mxu0 %v13520_v61  ;;  %12628 = vmatpush3.bf16.msra.mxu1 %v13521_v62 }
 0x3d2   : > { %12607 = vmatprep.subr.bf16.mxu0 %v13522_v63  ;;  %12629 = vmatprep.subr.bf16.mxu1 %v13523_v0  ;;  %v1707_v63 = vld [vmem:[%s14293_s17 + $0x28] sm:$0xff] }
 0x3d3   : > { %v10893_v0 = vcombine.high %v1707_v63, %v1707_v63 }
 0x3d5   : > { %12608 = vmatpush3.bf16.msra.mxu0 %v13524_v1  ;;  %12630 = vmatpush3.bf16.msra.mxu1 %v13525_v2  ;;  %v10892_v1 = vcombine.low %v1707_v63, %v1707_v63 }
 0x3d6   : > { %12609 = vmatprep.subr.bf16.mxu0 %v13526_v3  ;;  %12631 = vmatprep.subr.bf16.mxu1 %v13527_v5  ;;  %v13548_v3 = vld [vmem:[%s14273_s23 + $0x340] sm:$0xff]  }
 0x3d7   : > { %v2100_v2 = vsel %vm928_vm1, %v10892_v1, 0  ;;  %v13549_v5 = vld [vmem:[%s14273_s23 + $0x3c0] sm:$0xff]  }
 0x3d9   : > { %12610 = vmatpush3.bf16.msra.mxu0 %v13528_v6  ;;  %12632 = vmatpush3.bf16.msra.mxu1 %v13529_v7  ;;  %v14491_v6 = vld.sshfl [vmem:[%s14268_s20 + $0xc] sm:$0x33 pattern:$0x75316420]  ;;  %v10886_v7 = vld [vmem:[%s14288_s16 + $0x2] ss:$0 sm:$0xff] }
 0x3da   : > { %12611 = vmatprep.subr.bf16.mxu0 %v13530_v8  ;;  %12633 = vmatprep.subr.bf16.mxu1 %v13531_v10  ;;  %v2304_v8 = vcombine.high %v14491_v6, %v14491_v6 }
 0x3dd   : > { %12612 = vmatpush3.bf16.msra.mxu0 %v13532_v11  ;;  %12634 = vmatpush3.bf16.msra.mxu1 %v13533_v12 }
 0x3de   : > { %12613 = vmatprep.subr.bf16.mxu0 %v13534_v13  ;;  %12635 = vmatprep.subr.bf16.mxu1 %v13535_v17  ;;  %v2318_v17 = vrot.slane %v2304_v8, %v14332_v40 }
 0x3e1   : > { %12614 = vmatpush3.bf16.msra.mxu0 %v13536_v18  ;;  %12636 = vmatpush3.bf16.msra.mxu1 %v13537_v19 }
 0x3e2   : > { %12615 = vmatprep.subr.bf16.mxu0 %v13538_v20  ;;  %12637 = vmatprep.subr.bf16.mxu1 %v13539_v21  ;;  %v13550_v20 = vld [vmem:[%s14273_s23 + $0x300] sm:$0xff]  }
 0x3e3   : > { %v13551_v21 = vld [vmem:[%s14273_s23 + $0x380] sm:$0xff]  }
 0x3e5   : > { %12616 = vmatpush3.bf16.msra.mxu0 %v13540_v23  ;;  %12638 = vmatpush3.bf16.msra.mxu1 %v13541_v24  ;;  %v13552_v23 = vld [vmem:[%s14273_s23 + $0x348] sm:$0xff]  }
 0x3e6   : > { %13297 = vmatprep.subr.bf16.mxu0 %v14194_v46  ;;  %10894 = vmatprep.subr.msk.bf16.mxu1 %vm928_vm1, %v10891_v29  ;;  %v13553_v24 = vld [vmem:[%s14273_s23 + $0x3c8] sm:$0xff]   ;;  %v13557_v29 = vld [vmem:[%s14273_s23 + $0x3d0] sm:$0xff]  }
 0x3e8   : > { %1968 = vmatmul.mubr.bf16.vlgmr.msra.gmra.mrb[20].mxu0 %v1729_v22  ;;  %2008 = vmatmul.mubr.bf16.vlgmr.msra.gmra.mrb[20].mxu1 %v1737_v25  ;;  %v2320_v25 = vcombine.high %v2318_v17, %v2318_v17 }
 0x3e9   : > { %13301 = vmatprep.mubr.msk.bf16.mxu0 %vm14195_vm0, %v14194_v46  ;;  %2137 = vmatprep.mubr.bf16.mxu1 %v14196_v9 }
 0x3ea   : > { %13298 = vmatpush3.bf16.msra.mxu0 %v13542_v26  ;;  %2106 = vmatpush1.bf16.msra.mxu1 %v2094_v31  ;;  %v13554_v26 = vld [vmem:[%s14273_s23 + $0x308] sm:$0xff]   ;;  %v13559_v31 = vld [vmem:[%s14273_s23 + $0x390] sm:$0xff]  }
 0x3eb   : > { %13299 = vmatprep.subr.bf16.mxu0 %v14194_v46  ;;  %12648 = vmatprep.subr.bf16.mxu1 %v13548_v3 }
 0x3ee   : > { %13300 = vmatpush3.bf16.msra.mxu0 %v13543_v27  ;;  %v13555_v27 = vld [vmem:[%s14273_s23 + $0x388] sm:$0xff]  }
 0x3ef   : > { %10896 = vmatprep.subr.msk.bf16.mxu0 %vm928_vm1, %v10893_v0 }
 0x49b   : > { %v1557_v32 = vpop.f32.mrb[16].mxu0  ;;  %v1598_v33 = vpop.f32.mrb[16].mxu1 }
 0x49c   : > { %v1559_v35 = vpop.f32.mrb[17].mxu0  ;;  %v1600_v36 = vpop.f32.mrb[17].mxu1 }
 0x49d   : > { %v1609_v37 = vcombine.low %v1557_v32, %v1559_v35  ;;  %v1610_v38 = vcombine.low %v1598_v33, %v1600_v36  ;;  %v1561_v39 = vpop.f32.mrb[18].mxu0  ;;  %v1602_v41 = vpop.f32.mrb[18].mxu1  ;;  %v13560_v32 = vld [vmem:[%s14273_s23 + $0x358] sm:$0xff]  }
 0x49e   : > { %v1562_v43 = vpop.f32.mrb[19].mxu0  ;;  %v1603_v44 = vpop.f32.mrb[19].mxu1  ;;  %v13561_v33 = vld [vmem:[%s14273_s23 + $0x3d8] sm:$0xff]   ;;  %v13566_v39 = vld [vmem:[%s14273_s23 + $0x320] sm:$0xff]  }
 0x49f   : > { %v1617_v45 = vrot.slane %v1609_v37, %v14406_v4  ;;  %v1624_v47 = vrot.slane %v1610_v38, %v14406_v4  ;;  %v13562_v35 = vld [vmem:[%s14273_s23 + $0x318] sm:$0xff]   ;;  %v13564_v37 = vld [vmem:[%s14273_s23 + $0x360] sm:$0xff]   ;;  %v13569_v43 = vld [vmem:[%s14273_s23 + $0x3e8] sm:$0xff]  }
 0x4a0   : > { %v13563_v36 = vld [vmem:[%s14273_s23 + $0x398] sm:$0xff]   ;;  %v13565_v38 = vld [vmem:[%s14273_s23 + $0x3e0] sm:$0xff]   ;;  %v13570_v44 = vld [vmem:[%s14273_s23 + $0x328] sm:$0xff]  }
 0x4a1   : > { %v1625_v49 = vcombine.low %v1617_v45, %v1624_v47  ;;  %v13567_v41 = vld [vmem:[%s14273_s23 + $0x3a0] sm:$0xff]   ;;  %v13571_v45 = vld [vmem:[%s14273_s23 + $0x3a8] sm:$0xff]   ;;  %v13572_v47 = vld [vmem:[%s14273_s23 + $0x370] sm:$0xff]  }
 0x4a3   : > { %v14480_v50 = vadd.f32 %v1625_v49, %v1045_v48  ;;  %v13573_v48 = vld [vmem:[%s14273_s23 + $0x3f0] sm:$0xff]  }
 0x4a4   : > { %v13574_v49 = vld [vmem:[%s14273_s23 + $0x330] sm:$0xff]  }
 0x4bb   : > { %v12617_v51 = vpop.f32.mrb[20].mxu0  ;;  %v12639_v52 = vpop.f32.mrb[20].mxu1 }
 0x4bc   : > { %v12618_v54 = vpop.f32.mrb[21].mxu0  ;;  %v12640_v55 = vpop.f32.mrb[21].mxu1 }
 0x4bd   : > { %v12619_v56 = vadd.f32 %v12618_v54, %v12617_v51  ;;  %v12641_v57 = vadd.f32 %v12640_v55, %v12639_v52  ;;  %v12620_v58 = vpop.f32.mrb[22].mxu0  ;;  %v12642_v59 = vpop.f32.mrb[22].mxu1  ;;  %v13575_v51 = vld [vmem:[%s14273_s23 + $0x3b0] sm:$0xff]   ;;  %v13576_v52 = vld [vmem:[%s14273_s23 + $0x378] sm:$0xff]   ;;  %v2311_v54 = vrot.slane %v14491_v6, %v14332_v40 }
 0x4be   : > { %v12621_v60 = vpop.f32.mrb[23].mxu0  ;;  %v12643_v61 = vpop.f32.mrb[23].mxu1  ;;  %v13578_v55 = vld [vmem:[%s14273_s23 + $0x338] sm:$0xff]   ;;  %v13580_v58 = vld [vmem:[%s14283_s30 + $0x30] sm:$0xff]  }
 0x4bf   : > { %v1970_v62 = vadd.f32 %v12619_v56, %v10852_v53  ;;  %v13577_v53 = vld [vmem:[%s14273_s23 + $0x3f8] sm:$0xff]   ;;  %v2288_v60 = vld [vmem:[%s14293_s17 + $0x30] sm:$0xff] }
 0x4c0   : > { %v13579_v56 = vld [vmem:[%s14273_s23 + $0x3b8] sm:$0xff]   ;;  %v11008_v61 = vcombine.high %v2288_v60, %v2288_v60 }
 0x4c1   : > { %v2010_v14 = vadd.f32 %v12641_v57, %v1970_v62  ;;  %v2319_v57 = vcombine.high %v2311_v54, %v2311_v54  ;;  %v13581_v59 = vld [vmem:[%s14283_s30 + $0x38] sm:$0xff]   ;;  %v11007_v62 = vcombine.low %v2288_v60, %v2288_v60  ;;  %v13596_v60 = vld [vmem:[%s14273_s23 + $0x410] sm:$0xff]  }
 0x4c3   : > { %v2015_v15 = vmax.f32 %v2010_v14, 0.0  ;;  %v2676_v14 = vsel %vm928_vm1, %v11007_v62, 0  ;;  %v13598_v62 = vld [vmem:[%s14273_s23 + $0x458] sm:$0xff]  }
 0x4c5   : > { %v2016_v16 = vpack.c.bf16 %v2015_v15, %v2015_v15 }
 0x4c7   : > { %13302 = vmatmul.mubr.msk.bf16.vlgmr.msra.gmra.mrb[24].mxu0 %vm868_vm2, %v2016_v16 }
 0x4c8   : > { %2178 = vmatprep.mubr.bf16.mxu0 %v14196_v9  ;;  %2147 = vmatpush1.bf16.msra.mxu0 %v2100_v2 }
 0x4c9   : > { %12670 = vmatprep.subr.bf16.mxu0 %v13549_v5 }
 0x59a   : > { %v2072_v10 = vpop.f32.mrb[24].mxu0 }
 0x59b   : > { %v2073_v11 = vadd.f32 %v10886_v7, %v2072_v10  ;;  %v13303_v12 = vpop.f32.mrb[25].mxu0 }
 0x59c   : > { %v2075_v13 = vpop.f32.mrb[26].mxu0 }
 0x59d   : > { %v2078_v18 = vmax.f32 %v2073_v11, 0.0  ;;  %v13304_v19 = vpop.f32.mrb[27].mxu0 }
 0x59f   : > { %v2079_v22 = vpack.c.bf16 %v2078_v18, %v2078_v18  ;;  %v10969_v18 = vld [vmem:[%s14278_s26 + $0x3] ss:$0 sm:$0xff] }
 0x5a1   : > { %10895 = vmatmul.mubr.msk.bf16.vlgmr.msra.gmra.mrb[24].mxu1 %vm924_vm3, %v2079_v22  ;;  %10897 = vmatmul.mubr.msk.bf16.vlgmr.msra.gmra.mrb[28].mxu0 %vm924_vm3, %v2079_v22 }
 0x5a2   : > { %12649 = vmatpush3.bf16.msra.mxu1 %v13550_v20  ;;  %12671 = vmatpush3.bf16.msra.mxu0 %v13551_v21 }
 0x5a3   : > { %12650 = vmatprep.subr.bf16.mxu1 %v13552_v23  ;;  %12672 = vmatprep.subr.bf16.mxu0 %v13553_v24 }
 0x5a4   : > { %2549 = vmatprep.mubr.bf16.mxu1 %v2318_v17  ;;  %2589 = vmatprep.mubr.bf16.mxu0 %v2320_v25 }
 0x5a6   : > { %12651 = vmatpush3.bf16.msra.mxu1 %v13554_v26  ;;  %12673 = vmatpush3.bf16.msra.mxu0 %v13555_v27 }
 0x5a7   : > { %12652 = vmatprep.subr.bf16.mxu1 %v13556_v28  ;;  %12674 = vmatprep.subr.bf16.mxu0 %v13557_v29 }
 0x5aa   : > { %12653 = vmatpush3.bf16.msra.mxu1 %v13558_v30  ;;  %12675 = vmatpush3.bf16.msra.mxu0 %v13559_v31  ;;  %v2289_v30 = vld [vmem:[%s14293_s17 + $0x38] sm:$0xff] }
 0x5ab   : > { %12654 = vmatprep.subr.bf16.mxu1 %v13560_v32  ;;  %12676 = vmatprep.subr.bf16.mxu0 %v13561_v33  ;;  %v11010_v31 = vcombine.high %v2289_v30, %v2289_v30  ;;  %v11009_v32 = vcombine.low %v2289_v30, %v2289_v30 }
 0x5ad   : > { %v2682_v33 = vsel %vm928_vm1, %v11009_v32, 0 }
 0x5ae   : > { %12655 = vmatpush3.bf16.msra.mxu1 %v13562_v35  ;;  %12677 = vmatpush3.bf16.msra.mxu0 %v13563_v36  ;;  %v13586_v35 = vld [vmem:[%s14273_s23 + $0x440] sm:$0xff]  }
 0x5af   : > { %12656 = vmatprep.subr.bf16.mxu1 %v13564_v37  ;;  %12678 = vmatprep.subr.bf16.mxu0 %v13565_v38  ;;  %v13587_v36 = vld [vmem:[%s14273_s23 + $0x4c0] sm:$0xff]   ;;  %v14555_v37 = vld.sshfl [vmem:[%s14268_s20 + $0x10] sm:$0x33 pattern:$0x75316420] }
 0x5b0   : > { %v11003_v38 = vld [vmem:[%s14288_s16 + $0x3] ss:$0 sm:$0xff] }
 0x5b2   : > { %12657 = vmatpush3.bf16.msra.mxu1 %v13566_v39  ;;  %12679 = vmatpush3.bf16.msra.mxu0 %v13567_v41  ;;  %v2886_v39 = vcombine.high %v14555_v37, %v14555_v37 }
 0x5b3   : > { %12658 = vmatprep.subr.bf16.mxu1 %v13568_v42  ;;  %12680 = vmatprep.subr.bf16.mxu0 %v13569_v43 }
 0x5b6   : > { %12659 = vmatpush3.bf16.msra.mxu1 %v13570_v44  ;;  %12681 = vmatpush3.bf16.msra.mxu0 %v13571_v45  ;;  %v2900_v45 = vrot.slane %v2886_v39, %v14332_v40 }
 0x5b7   : > { %12660 = vmatprep.subr.bf16.mxu1 %v13572_v47  ;;  %12682 = vmatprep.subr.bf16.mxu0 %v13573_v48 }
 0x5ba   : > { %12661 = vmatpush3.bf16.msra.mxu1 %v13574_v49  ;;  %12683 = vmatpush3.bf16.msra.mxu0 %v13575_v51  ;;  %v13588_v49 = vld [vmem:[%s14273_s23 + $0x400] sm:$0xff]  }
 0x5bb   : > { %12662 = vmatprep.subr.bf16.mxu1 %v13576_v52  ;;  %12684 = vmatprep.subr.bf16.mxu0 %v13577_v53  ;;  %v13589_v51 = vld [vmem:[%s14273_s23 + $0x480] sm:$0xff]   ;;  %v13590_v53 = vld [vmem:[%s14273_s23 + $0x448] sm:$0xff]  }
 0x5be   : > { %12663 = vmatpush3.bf16.msra.mxu1 %v13578_v55  ;;  %12685 = vmatpush3.bf16.msra.mxu0 %v13579_v56  ;;  %v2902_v55 = vcombine.high %v2900_v45, %v2900_v45  ;;  %v13592_v56 = vld [vmem:[%s14273_s23 + $0x408] sm:$0xff]  }
 0x5bf   : > { %13305 = vmatprep.subr.bf16.mxu1 %v14194_v46  ;;  %11011 = vmatprep.subr.msk.bf16.mxu0 %vm928_vm1, %v11008_v61  ;;  %v13597_v61 = vld [vmem:[%s14273_s23 + $0x490] sm:$0xff]  }
 0x5c1   : > { %2550 = vmatmul.mubr.bf16.vlgmr.msra.gmra.mrb[28].mxu1 %v2311_v54  ;;  %2590 = vmatmul.mubr.bf16.vlgmr.msra.gmra.mrb[32].mxu0 %v2319_v57  ;;  %v13591_v54 = vld [vmem:[%s14273_s23 + $0x4c8] sm:$0xff]  }
 0x5c2   : > { %13309 = vmatprep.mubr.msk.bf16.mxu1 %vm14195_vm0, %v14194_v46  ;;  %2719 = vmatprep.mubr.bf16.mxu0 %v14196_v9  ;;  %v13593_v57 = vld [vmem:[%s14273_s23 + $0x488] sm:$0xff]  }
 0x5c3   : > { %13306 = vmatpush3.bf16.msra.mxu1 %v13580_v58  ;;  %2688 = vmatpush1.bf16.msra.mxu0 %v2676_v14  ;;  %v13594_v58 = vld [vmem:[%s14273_s23 + $0x450] sm:$0xff]   ;;  %v13599_v14 = vld [vmem:[%s14273_s23 + $0x4d8] sm:$0xff]  }
 0x5c4   : > { %13307 = vmatprep.subr.bf16.mxu1 %v14194_v46  ;;  %12695 = vmatprep.subr.bf16.mxu0 %v13586_v35 }
 0x5c7   : > { %13308 = vmatpush3.bf16.msra.mxu1 %v13581_v59  ;;  %v13595_v59 = vld [vmem:[%s14273_s23 + $0x4d0] sm:$0xff]  }
 0x5c8   : > { %11013 = vmatprep.subr.msk.bf16.mxu1 %vm928_vm1, %v11010_v31 }
 0x674   : > { %v2139_v15 = vpop.f32.mrb[24].mxu1  ;;  %v2180_v16 = vpop.f32.mrb[28].mxu0 }
 0x675   : > { %v2141_v63 = vpop.f32.mrb[25].mxu1  ;;  %v2182_v0 = vpop.f32.mrb[29].mxu0 }
 0x676   : > { %v2191_v1 = vcombine.low %v2139_v15, %v2141_v63  ;;  %v2192_v2 = vcombine.low %v2180_v16, %v2182_v0  ;;  %v2143_v3 = vpop.f32.mrb[26].mxu1  ;;  %v2184_v5 = vpop.f32.mrb[30].mxu0  ;;  %v13600_v15 = vld [vmem:[%s14273_s23 + $0x418] sm:$0xff]   ;;  %v13602_v63 = vld [vmem:[%s14273_s23 + $0x460] sm:$0xff]  }
 0x677   : > { %v2144_v6 = vpop.f32.mrb[27].mxu1  ;;  %v2185_v7 = vpop.f32.mrb[31].mxu0  ;;  %v13601_v16 = vld [vmem:[%s14273_s23 + $0x498] sm:$0xff]   ;;  %v13603_v0 = vld [vmem:[%s14273_s23 + $0x4e0] sm:$0xff]   ;;  %v13606_v3 = vld [vmem:[%s14273_s23 + $0x468] sm:$0xff]  }
 0x678   : > { %v2199_v8 = vrot.slane %v2191_v1, %v14406_v4  ;;  %v2206_v10 = vrot.slane %v2192_v2, %v14406_v4  ;;  %v13604_v1 = vld [vmem:[%s14273_s23 + $0x420] sm:$0xff]   ;;  %v13607_v5 = vld [vmem:[%s14273_s23 + $0x4e8] sm:$0xff]  }
 0x679   : > { %v13605_v2 = vld [vmem:[%s14273_s23 + $0x4a0] sm:$0xff]   ;;  %v13608_v6 = vld [vmem:[%s14273_s23 + $0x428] sm:$0xff]  }
 0x67a   : > { %v2207_v11 = vcombine.low %v2199_v8, %v2206_v10  ;;  %v13609_v7 = vld [vmem:[%s14273_s23 + $0x4a8] sm:$0xff]   ;;  %v13610_v8 = vld [vmem:[%s14273_s23 + $0x470] sm:$0xff]  }
 0x67b   : > { %v13611_v10 = vld [vmem:[%s14273_s23 + $0x4f0] sm:$0xff]  }
 0x67c   : > { %v14544_v12 = vadd.f32 %v2207_v11, %v14480_v50  ;;  %v13612_v11 = vld [vmem:[%s14273_s23 + $0x430] sm:$0xff]  }
 0x694   : > { %v12664_v13 = vpop.f32.mrb[28].mxu1  ;;  %v12686_v17 = vpop.f32.mrb[32].mxu0 }
 0x695   : > { %v12665_v19 = vpop.f32.mrb[29].mxu1  ;;  %v12687_v20 = vpop.f32.mrb[33].mxu0 }
 0x696   : > { %v12666_v21 = vadd.f32 %v12665_v19, %v12664_v13  ;;  %v12688_v22 = vadd.f32 %v12687_v20, %v12686_v17  ;;  %v12667_v23 = vpop.f32.mrb[30].mxu1  ;;  %v12689_v24 = vpop.f32.mrb[34].mxu0  ;;  %v13613_v13 = vld [vmem:[%s14273_s23 + $0x4b0] sm:$0xff]   ;;  %v13614_v17 = vld [vmem:[%s14273_s23 + $0x478] sm:$0xff]   ;;  %v2893_v19 = vrot.slane %v14555_v37, %v14332_v40 }
 0x697   : > { %v12668_v25 = vpop.f32.mrb[31].mxu1  ;;  %v12690_v26 = vpop.f32.mrb[35].mxu0  ;;  %v13616_v20 = vld [vmem:[%s14273_s23 + $0x438] sm:$0xff]   ;;  %v13618_v23 = vld [vmem:[%s14283_s30 + $0x40] sm:$0xff]   ;;  %v13619_v24 = vld [vmem:[%s14283_s30 + $0x48] sm:$0xff]  }
 0x698   : > { %v2552_v27 = vadd.f32 %v12666_v21, %v10969_v18  ;;  %v13615_v18 = vld [vmem:[%s14273_s23 + $0x4f8] sm:$0xff]   ;;  %v2870_v25 = vld [vmem:[%s14293_s17 + $0x40] sm:$0xff] }
 0x699   : > { %v13617_v21 = vld [vmem:[%s14273_s23 + $0x4b8] sm:$0xff]   ;;  %v11125_v26 = vcombine.high %v2870_v25, %v2870_v25 }
 0x69a   : > { %v2592_v28 = vadd.f32 %v12688_v22, %v2552_v27  ;;  %v2901_v22 = vcombine.high %v2893_v19, %v2893_v19  ;;  %v11124_v27 = vcombine.low %v2870_v25, %v2870_v25  ;;  %v13634_v25 = vld [vmem:[%s14273_s23 + $0x510] sm:$0xff]  }
 0x69c   : > { %v2597_v50 = vmax.f32 %v2592_v28, 0.0  ;;  %v3258_v28 = vsel %vm928_vm1, %v11124_v27, 0  ;;  %v13636_v27 = vld [vmem:[%s14273_s23 + $0x558] sm:$0xff]  }
 0x69e   : > { %v2598_v29 = vpack.c.bf16 %v2597_v50, %v2597_v50 }
 0x6a0   : > { %13310 = vmatmul.mubr.msk.bf16.vlgmr.msra.gmra.mrb[32].mxu1 %vm868_vm2, %v2598_v29 }
 0x6a1   : > { %2760 = vmatprep.mubr.bf16.mxu1 %v14196_v9  ;;  %2729 = vmatpush1.bf16.msra.mxu1 %v2682_v33 }
 0x6a2   : > { %12717 = vmatprep.subr.bf16.mxu1 %v13587_v36 }
 0x773   : > { %v2654_v41 = vpop.f32.mrb[32].mxu1 }
 0x774   : > { %v2655_v42 = vadd.f32 %v11003_v38, %v2654_v41  ;;  %v13311_v43 = vpop.f32.mrb[33].mxu1 }
 0x775   : > { %v2657_v44 = vpop.f32.mrb[34].mxu1 }
 0x776   : > { %v2660_v47 = vmax.f32 %v2655_v42, 0.0  ;;  %v13312_v48 = vpop.f32.mrb[35].mxu1 }
 0x778   : > { %v2661_v52 = vpack.c.bf16 %v2660_v47, %v2660_v47  ;;  %v11086_v47 = vld [vmem:[%s14278_s26 + $0x4] ss:$0 sm:$0xff] }
 0x77a   : > { %11012 = vmatmul.mubr.msk.bf16.vlgmr.msra.gmra.mrb[36].mxu0 %vm924_vm3, %v2661_v52  ;;  %11014 = vmatmul.mubr.msk.bf16.vlgmr.msra.gmra.mrb[36].mxu1 %vm924_vm3, %v2661_v52 }
 0x77b   : > { %12696 = vmatpush3.bf16.msra.mxu0 %v13588_v49  ;;  %12718 = vmatpush3.bf16.msra.mxu1 %v13589_v51 }
 0x77c   : > { %12697 = vmatprep.subr.bf16.mxu0 %v13590_v53  ;;  %12719 = vmatprep.subr.bf16.mxu1 %v13591_v54 }
 0x77d   : > { %3131 = vmatprep.mubr.bf16.mxu0 %v2900_v45  ;;  %3171 = vmatprep.mubr.bf16.mxu1 %v2902_v55 }
 0x77f   : > { %12698 = vmatpush3.bf16.msra.mxu0 %v13592_v56  ;;  %12720 = vmatpush3.bf16.msra.mxu1 %v13593_v57 }
 0x780   : > { %12699 = vmatprep.subr.bf16.mxu0 %v13594_v58  ;;  %12721 = vmatprep.subr.bf16.mxu1 %v13595_v59 }
 0x783   : > { %12700 = vmatpush3.bf16.msra.mxu0 %v13596_v60  ;;  %12722 = vmatpush3.bf16.msra.mxu1 %v13597_v61  ;;  %v2871_v60 = vld [vmem:[%s14293_s17 + $0x48] sm:$0xff] }
 0x784   : > { %12701 = vmatprep.subr.bf16.mxu0 %v13598_v62  ;;  %12723 = vmatprep.subr.bf16.mxu1 %v13599_v14  ;;  %v11127_v61 = vcombine.high %v2871_v60, %v2871_v60  ;;  %v11126_v62 = vcombine.low %v2871_v60, %v2871_v60 }
 0x786   : > { %v3264_v14 = vsel %vm928_vm1, %v11126_v62, 0 }
 0x787   : > { %12702 = vmatpush3.bf16.msra.mxu0 %v13600_v15  ;;  %12724 = vmatpush3.bf16.msra.mxu1 %v13601_v16  ;;  %v13624_v15 = vld [vmem:[%s14273_s23 + $0x540] sm:$0xff]  }
 0x788   : > { %12703 = vmatprep.subr.bf16.mxu0 %v13602_v63  ;;  %12725 = vmatprep.subr.bf16.mxu1 %v13603_v0  ;;  %v13625_v16 = vld [vmem:[%s14273_s23 + $0x5c0] sm:$0xff]   ;;  %v14619_v63 = vld.sshfl [vmem:[%s14268_s20 + $0x14] sm:$0x33 pattern:$0x75316420] }
 0x789   : > { %v11120_v0 = vld [vmem:[%s14288_s16 + $0x4] ss:$0 sm:$0xff] }
 0x78b   : > { %12704 = vmatpush3.bf16.msra.mxu0 %v13604_v1  ;;  %12726 = vmatpush3.bf16.msra.mxu1 %v13605_v2  ;;  %v3468_v1 = vcombine.high %v14619_v63, %v14619_v63 }
 0x78c   : > { %12705 = vmatprep.subr.bf16.mxu0 %v13606_v3  ;;  %12727 = vmatprep.subr.bf16.mxu1 %v13607_v5 }
 0x78f   : > { %12706 = vmatpush3.bf16.msra.mxu0 %v13608_v6  ;;  %12728 = vmatpush3.bf16.msra.mxu1 %v13609_v7  ;;  %v3482_v7 = vrot.slane %v3468_v1, %v14332_v40 }
 0x790   : > { %12707 = vmatprep.subr.bf16.mxu0 %v13610_v8  ;;  %12729 = vmatprep.subr.bf16.mxu1 %v13611_v10 }
 0x793   : > { %12708 = vmatpush3.bf16.msra.mxu0 %v13612_v11  ;;  %12730 = vmatpush3.bf16.msra.mxu1 %v13613_v13  ;;  %v13626_v11 = vld [vmem:[%s14273_s23 + $0x500] sm:$0xff]  }
 0x794   : > { %12709 = vmatprep.subr.bf16.mxu0 %v13614_v17  ;;  %12731 = vmatprep.subr.bf16.mxu1 %v13615_v18  ;;  %v13627_v13 = vld [vmem:[%s14273_s23 + $0x580] sm:$0xff]   ;;  %v13628_v18 = vld [vmem:[%s14273_s23 + $0x548] sm:$0xff]  }
 0x797   : > { %12710 = vmatpush3.bf16.msra.mxu0 %v13616_v20  ;;  %12732 = vmatpush3.bf16.msra.mxu1 %v13617_v21  ;;  %v3484_v20 = vcombine.high %v3482_v7, %v3482_v7  ;;  %v13630_v21 = vld [vmem:[%s14273_s23 + $0x508] sm:$0xff]  }
 0x798   : > { %13313 = vmatprep.subr.bf16.mxu0 %v14194_v46  ;;  %11128 = vmatprep.subr.msk.bf16.mxu1 %vm928_vm1, %v11125_v26  ;;  %v13635_v26 = vld [vmem:[%s14273_s23 + $0x590] sm:$0xff]  }
 0x79a   : > { %3132 = vmatmul.mubr.bf16.vlgmr.msra.gmra.mrb[40].mxu0 %v2893_v19  ;;  %3172 = vmatmul.mubr.bf16.vlgmr.msra.gmra.mrb[40].mxu1 %v2901_v22  ;;  %v13629_v19 = vld [vmem:[%s14273_s23 + $0x5c8] sm:$0xff]  }
 0x79b   : > { %13317 = vmatprep.mubr.msk.bf16.mxu0 %vm14195_vm0, %v14194_v46  ;;  %3301 = vmatprep.mubr.bf16.mxu1 %v14196_v9  ;;  %v13631_v22 = vld [vmem:[%s14273_s23 + $0x588] sm:$0xff]  }
 0x79c   : > { %13314 = vmatpush3.bf16.msra.mxu0 %v13618_v23  ;;  %3270 = vmatpush1.bf16.msra.mxu1 %v3258_v28  ;;  %v13632_v23 = vld [vmem:[%s14273_s23 + $0x550] sm:$0xff]   ;;  %v13637_v28 = vld [vmem:[%s14273_s23 + $0x5d8] sm:$0xff]  }
 0x79d   : > { %13315 = vmatprep.subr.bf16.mxu0 %v14194_v46  ;;  %12742 = vmatprep.subr.bf16.mxu1 %v13624_v15 }
 0x7a0   : > { %13316 = vmatpush3.bf16.msra.mxu0 %v13619_v24  ;;  %v13633_v24 = vld [vmem:[%s14273_s23 + $0x5d0] sm:$0xff]  }
 0x7a1   : > { %11130 = vmatprep.subr.msk.bf16.mxu0 %vm928_vm1, %v11127_v61 }
 0x84d   : > { %v2721_v50 = vpop.f32.mrb[36].mxu0  ;;  %v2762_v29 = vpop.f32.mrb[36].mxu1 }
 0x84e   : > { %v2723_v30 = vpop.f32.mrb[37].mxu0  ;;  %v2764_v31 = vpop.f32.mrb[37].mxu1 }
 0x84f   : > { %v2773_v32 = vcombine.low %v2721_v50, %v2723_v30  ;;  %v2774_v33 = vcombine.low %v2762_v29, %v2764_v31  ;;  %v2725_v35 = vpop.f32.mrb[38].mxu0  ;;  %v2766_v36 = vpop.f32.mrb[38].mxu1  ;;  %v13638_v50 = vld [vmem:[%s14273_s23 + $0x518] sm:$0xff]   ;;  %v13640_v30 = vld [vmem:[%s14273_s23 + $0x560] sm:$0xff]  }
 0x850   : > { %v2726_v37 = vpop.f32.mrb[39].mxu0  ;;  %v2767_v38 = vpop.f32.mrb[39].mxu1  ;;  %v13639_v29 = vld [vmem:[%s14273_s23 + $0x598] sm:$0xff]   ;;  %v13641_v31 = vld [vmem:[%s14273_s23 + $0x5e0] sm:$0xff]   ;;  %v13644_v35 = vld [vmem:[%s14273_s23 + $0x568] sm:$0xff]  }
 0x851   : > { %v2781_v39 = vrot.slane %v2773_v32, %v14406_v4  ;;  %v2788_v41 = vrot.slane %v2774_v33, %v14406_v4  ;;  %v13642_v32 = vld [vmem:[%s14273_s23 + $0x520] sm:$0xff]   ;;  %v13645_v36 = vld [vmem:[%s14273_s23 + $0x5e8] sm:$0xff]  }
 0x852   : > { %v13643_v33 = vld [vmem:[%s14273_s23 + $0x5a0] sm:$0xff]   ;;  %v13646_v37 = vld [vmem:[%s14273_s23 + $0x528] sm:$0xff]  }
 0x853   : > { %v2789_v42 = vcombine.low %v2781_v39, %v2788_v41  ;;  %v13647_v38 = vld [vmem:[%s14273_s23 + $0x5a8] sm:$0xff]   ;;  %v13648_v39 = vld [vmem:[%s14273_s23 + $0x570] sm:$0xff]  }
 0x854   : > { %v13649_v41 = vld [vmem:[%s14273_s23 + $0x5f0] sm:$0xff]  }
 0x855   : > { %v14608_v43 = vadd.f32 %v2789_v42, %v14544_v12  ;;  %v13650_v42 = vld [vmem:[%s14273_s23 + $0x530] sm:$0xff]  }
 0x86d   : > { %v12711_v44 = vpop.f32.mrb[40].mxu0  ;;  %v12733_v45 = vpop.f32.mrb[40].mxu1 }
 0x86e   : > { %v12712_v48 = vpop.f32.mrb[41].mxu0  ;;  %v12734_v49 = vpop.f32.mrb[41].mxu1 }
 0x86f   : > { %v12713_v51 = vadd.f32 %v12712_v48, %v12711_v44  ;;  %v12735_v52 = vadd.f32 %v12734_v49, %v12733_v45  ;;  %v12714_v53 = vpop.f32.mrb[42].mxu0  ;;  %v12736_v54 = vpop.f32.mrb[42].mxu1  ;;  %v13651_v44 = vld [vmem:[%s14273_s23 + $0x5b0] sm:$0xff]   ;;  %v13652_v45 = vld [vmem:[%s14273_s23 + $0x578] sm:$0xff]   ;;  %v3475_v48 = vrot.slane %v14619_v63, %v14332_v40 }
 0x870   : > { %v12715_v55 = vpop.f32.mrb[43].mxu0  ;;  %v12737_v56 = vpop.f32.mrb[43].mxu1  ;;  %v13654_v49 = vld [vmem:[%s14273_s23 + $0x538] sm:$0xff]   ;;  %v13656_v53 = vld [vmem:[%s14283_s30 + $0x50] sm:$0xff]  }
 0x871   : > { %v3134_v57 = vadd.f32 %v12713_v51, %v11086_v47  ;;  %v13653_v47 = vld [vmem:[%s14273_s23 + $0x5f8] sm:$0xff]   ;;  %v3452_v55 = vld [vmem:[%s14293_s17 + $0x50] sm:$0xff] }
 0x872   : > { %v13655_v51 = vld [vmem:[%s14273_s23 + $0x5b8] sm:$0xff]   ;;  %v11242_v56 = vcombine.high %v3452_v55, %v3452_v55 }
 0x873   : > { %v3174_v58 = vadd.f32 %v12735_v52, %v3134_v57  ;;  %v3483_v52 = vcombine.high %v3475_v48, %v3475_v48  ;;  %v13657_v54 = vld [vmem:[%s14283_s30 + $0x58] sm:$0xff]   ;;  %v11241_v57 = vcombine.low %v3452_v55, %v3452_v55  ;;  %v13672_v55 = vld [vmem:[%s14273_s23 + $0x610] sm:$0xff]  }
 0x875   : > { %v3179_v12 = vmax.f32 %v3174_v58, 0.0  ;;  %v3840_v58 = vsel %vm928_vm1, %v11241_v57, 0  ;;  %v13674_v57 = vld [vmem:[%s14273_s23 + $0x658] sm:$0xff]  }
 0x877   : > { %v3180_v59 = vpack.c.bf16 %v3179_v12, %v3179_v12 }
 0x879   : > { %13318 = vmatmul.mubr.msk.bf16.vlgmr.msra.gmra.mrb[44].mxu0 %vm868_vm2, %v3180_v59 }
 0x87a   : > { %3342 = vmatprep.mubr.bf16.mxu0 %v14196_v9  ;;  %3311 = vmatpush1.bf16.msra.mxu0 %v3264_v14 }
 0x87b   : > { %12764 = vmatprep.subr.bf16.mxu0 %v13625_v16 }
 0x94c   : > { %v3236_v2 = vpop.f32.mrb[44].mxu0 }
 0x94d   : > { %v3237_v3 = vadd.f32 %v11120_v0, %v3236_v2  ;;  %v13319_v5 = vpop.f32.mrb[45].mxu0 }
 0x94e   : > { %v3239_v6 = vpop.f32.mrb[46].mxu0 }
 0x94f   : > { %v3242_v8 = vmax.f32 %v3237_v3, 0.0  ;;  %v13320_v10 = vpop.f32.mrb[47].mxu0 }
 0x951   : > { %v3243_v17 = vpack.c.bf16 %v3242_v8, %v3242_v8  ;;  %v11203_v8 = vld [vmem:[%s14278_s26 + $0x5] ss:$0 sm:$0xff] }
 0x953   : > { %11129 = vmatmul.mubr.msk.bf16.vlgmr.msra.gmra.mrb[44].mxu1 %vm924_vm3, %v3243_v17  ;;  %11131 = vmatmul.mubr.msk.bf16.vlgmr.msra.gmra.mrb[48].mxu0 %vm924_vm3, %v3243_v17 }
 0x954   : > { %12743 = vmatpush3.bf16.msra.mxu1 %v13626_v11  ;;  %12765 = vmatpush3.bf16.msra.mxu0 %v13627_v13 }
 0x955   : > { %12744 = vmatprep.subr.bf16.mxu1 %v13628_v18  ;;  %12766 = vmatprep.subr.bf16.mxu0 %v13629_v19 }
 0x956   : > { %3713 = vmatprep.mubr.bf16.mxu1 %v3482_v7  ;;  %3753 = vmatprep.mubr.bf16.mxu0 %v3484_v20 }
 0x958   : > { %12745 = vmatpush3.bf16.msra.mxu1 %v13630_v21  ;;  %12767 = vmatpush3.bf16.msra.mxu0 %v13631_v22 }
 0x959   : > { %12746 = vmatprep.subr.bf16.mxu1 %v13632_v23  ;;  %12768 = vmatprep.subr.bf16.mxu0 %v13633_v24 }
 0x95c   : > { %12747 = vmatpush3.bf16.msra.mxu1 %v13634_v25  ;;  %12769 = vmatpush3.bf16.msra.mxu0 %v13635_v26  ;;  %v3453_v25 = vld [vmem:[%s14293_s17 + $0x58] sm:$0xff] }
 0x95d   : > { %12748 = vmatprep.subr.bf16.mxu1 %v13636_v27  ;;  %12770 = vmatprep.subr.bf16.mxu0 %v13637_v28  ;;  %v11244_v26 = vcombine.high %v3453_v25, %v3453_v25  ;;  %v11243_v27 = vcombine.low %v3453_v25, %v3453_v25 }
 0x95f   : > { %v3846_v28 = vsel %vm928_vm1, %v11243_v27, 0 }
 0x960   : > { %12749 = vmatpush3.bf16.msra.mxu1 %v13638_v50  ;;  %12771 = vmatpush3.bf16.msra.mxu0 %v13639_v29  ;;  %v13662_v50 = vld [vmem:[%s14273_s23 + $0x640] sm:$0xff]  }
 0x961   : > { %12750 = vmatprep.subr.bf16.mxu1 %v13640_v30  ;;  %12772 = vmatprep.subr.bf16.mxu0 %v13641_v31  ;;  %v13663_v29 = vld [vmem:[%s14273_s23 + $0x6c0] sm:$0xff]   ;;  %v14683_v30 = vld.sshfl [vmem:[%s14268_s20 + $0x18] sm:$0x33 pattern:$0x75316420] }
 0x962   : > { %v11237_v31 = vld [vmem:[%s14288_s16 + $0x5] ss:$0 sm:$0xff] }
 0x964   : > { %12751 = vmatpush3.bf16.msra.mxu1 %v13642_v32  ;;  %12773 = vmatpush3.bf16.msra.mxu0 %v13643_v33  ;;  %v4050_v32 = vcombine.high %v14683_v30, %v14683_v30 }
 0x965   : > { %12752 = vmatprep.subr.bf16.mxu1 %v13644_v35  ;;  %12774 = vmatprep.subr.bf16.mxu0 %v13645_v36 }
 0x968   : > { %12753 = vmatpush3.bf16.msra.mxu1 %v13646_v37  ;;  %12775 = vmatpush3.bf16.msra.mxu0 %v13647_v38  ;;  %v4064_v38 = vrot.slane %v4050_v32, %v14332_v40 }
 0x969   : > { %12754 = vmatprep.subr.bf16.mxu1 %v13648_v39  ;;  %12776 = vmatprep.subr.bf16.mxu0 %v13649_v41 }
 0x96c   : > { %12755 = vmatpush3.bf16.msra.mxu1 %v13650_v42  ;;  %12777 = vmatpush3.bf16.msra.mxu0 %v13651_v44  ;;  %v13664_v42 = vld [vmem:[%s14273_s23 + $0x600] sm:$0xff]  }
 0x96d   : > { %12756 = vmatprep.subr.bf16.mxu1 %v13652_v45  ;;  %12778 = vmatprep.subr.bf16.mxu0 %v13653_v47  ;;  %v13665_v44 = vld [vmem:[%s14273_s23 + $0x680] sm:$0xff]   ;;  %v13666_v47 = vld [vmem:[%s14273_s23 + $0x648] sm:$0xff]  }
 0x970   : > { %12757 = vmatpush3.bf16.msra.mxu1 %v13654_v49  ;;  %12779 = vmatpush3.bf16.msra.mxu0 %v13655_v51  ;;  %v4066_v49 = vcombine.high %v4064_v38, %v4064_v38  ;;  %v13668_v51 = vld [vmem:[%s14273_s23 + $0x608] sm:$0xff]  }
 0x971   : > { %13321 = vmatprep.subr.bf16.mxu1 %v14194_v46  ;;  %11245 = vmatprep.subr.msk.bf16.mxu0 %vm928_vm1, %v11242_v56  ;;  %v13673_v56 = vld [vmem:[%s14273_s23 + $0x690] sm:$0xff]  }
 0x973   : > { %3714 = vmatmul.mubr.bf16.vlgmr.msra.gmra.mrb[48].mxu1 %v3475_v48  ;;  %3754 = vmatmul.mubr.bf16.vlgmr.msra.gmra.mrb[52].mxu0 %v3483_v52  ;;  %v13667_v48 = vld [vmem:[%s14273_s23 + $0x6c8] sm:$0xff]  }
 0x974   : > { %13325 = vmatprep.mubr.msk.bf16.mxu1 %vm14195_vm0, %v14194_v46  ;;  %3883 = vmatprep.mubr.bf16.mxu0 %v14196_v9  ;;  %v13669_v52 = vld [vmem:[%s14273_s23 + $0x688] sm:$0xff]  }
 0x975   : > { %13322 = vmatpush3.bf16.msra.mxu1 %v13656_v53  ;;  %3852 = vmatpush1.bf16.msra.mxu0 %v3840_v58  ;;  %v13670_v53 = vld [vmem:[%s14273_s23 + $0x650] sm:$0xff]   ;;  %v13675_v58 = vld [vmem:[%s14273_s23 + $0x6d8] sm:$0xff]  }
 0x976   : > { %13323 = vmatprep.subr.bf16.mxu1 %v14194_v46  ;;  %12789 = vmatprep.subr.bf16.mxu0 %v13662_v50 }
 0x979   : > { %13324 = vmatpush3.bf16.msra.mxu1 %v13657_v54  ;;  %v13671_v54 = vld [vmem:[%s14273_s23 + $0x6d0] sm:$0xff]  }
 0x97a   : > { %11247 = vmatprep.subr.msk.bf16.mxu1 %vm928_vm1, %v11244_v26 }
 0xa26   : > { %v3303_v12 = vpop.f32.mrb[44].mxu1  ;;  %v3344_v59 = vpop.f32.mrb[48].mxu0 }
 0xa27   : > { %v3305_v60 = vpop.f32.mrb[45].mxu1  ;;  %v3346_v61 = vpop.f32.mrb[49].mxu0 }
 0xa28   : > { %v3355_v62 = vcombine.low %v3303_v12, %v3305_v60  ;;  %v3356_v14 = vcombine.low %v3344_v59, %v3346_v61  ;;  %v3307_v15 = vpop.f32.mrb[46].mxu1  ;;  %v3348_v16 = vpop.f32.mrb[50].mxu0  ;;  %v13676_v12 = vld [vmem:[%s14273_s23 + $0x618] sm:$0xff]   ;;  %v13678_v60 = vld [vmem:[%s14273_s23 + $0x660] sm:$0xff]  }
 0xa29   : > { %v3308_v63 = vpop.f32.mrb[47].mxu1  ;;  %v3349_v0 = vpop.f32.mrb[51].mxu0  ;;  %v13677_v59 = vld [vmem:[%s14273_s23 + $0x698] sm:$0xff]   ;;  %v13679_v61 = vld [vmem:[%s14273_s23 + $0x6e0] sm:$0xff]   ;;  %v13682_v15 = vld [vmem:[%s14273_s23 + $0x668] sm:$0xff]  }
 0xa2a   : > { %v3363_v1 = vrot.slane %v3355_v62, %v14406_v4  ;;  %v3370_v2 = vrot.slane %v3356_v14, %v14406_v4  ;;  %v13680_v62 = vld [vmem:[%s14273_s23 + $0x620] sm:$0xff]   ;;  %v13683_v16 = vld [vmem:[%s14273_s23 + $0x6e8] sm:$0xff]  }
 0xa2b   : > { %v13681_v14 = vld [vmem:[%s14273_s23 + $0x6a0] sm:$0xff]   ;;  %v13684_v63 = vld [vmem:[%s14273_s23 + $0x628] sm:$0xff]  }
 0xa2c   : > { %v3371_v3 = vcombine.low %v3363_v1, %v3370_v2  ;;  %v13685_v0 = vld [vmem:[%s14273_s23 + $0x6a8] sm:$0xff]   ;;  %v13686_v1 = vld [vmem:[%s14273_s23 + $0x670] sm:$0xff]  }
 0xa2d   : > { %v13687_v2 = vld [vmem:[%s14273_s23 + $0x6f0] sm:$0xff]  }
 0xa2e   : > { %v14672_v5 = vadd.f32 %v3371_v3, %v14608_v43  ;;  %v13688_v3 = vld [vmem:[%s14273_s23 + $0x630] sm:$0xff]  }
 0xa46   : > { %v12758_v6 = vpop.f32.mrb[48].mxu1  ;;  %v12780_v7 = vpop.f32.mrb[52].mxu0 }
 0xa47   : > { %v12759_v10 = vpop.f32.mrb[49].mxu1  ;;  %v12781_v11 = vpop.f32.mrb[53].mxu0 }
 0xa48   : > { %v12760_v13 = vadd.f32 %v12759_v10, %v12758_v6  ;;  %v12782_v17 = vadd.f32 %v12781_v11, %v12780_v7  ;;  %v12761_v18 = vpop.f32.mrb[50].mxu1  ;;  %v12783_v19 = vpop.f32.mrb[54].mxu0  ;;  %v13689_v6 = vld [vmem:[%s14273_s23 + $0x6b0] sm:$0xff]   ;;  %v13690_v7 = vld [vmem:[%s14273_s23 + $0x678] sm:$0xff]   ;;  %v4057_v10 = vrot.slane %v14683_v30, %v14332_v40 }
 0xa49   : > { %v12762_v20 = vpop.f32.mrb[51].mxu1  ;;  %v12784_v21 = vpop.f32.mrb[55].mxu0  ;;  %v13692_v11 = vld [vmem:[%s14273_s23 + $0x638] sm:$0xff]   ;;  %v13694_v18 = vld [vmem:[%s14283_s30 + $0x60] sm:$0xff]   ;;  %v13695_v19 = vld [vmem:[%s14283_s30 + $0x68] sm:$0xff]  }
 0xa4a   : > { %v3716_v22 = vadd.f32 %v12760_v13, %v11203_v8  ;;  %v13691_v8 = vld [vmem:[%s14273_s23 + $0x6f8] sm:$0xff]   ;;  %v4034_v20 = vld [vmem:[%s14293_s17 + $0x60] sm:$0xff] }
 0xa4b   : > { %v13693_v13 = vld [vmem:[%s14273_s23 + $0x6b8] sm:$0xff]   ;;  %v11359_v21 = vcombine.high %v4034_v20, %v4034_v20 }
 0xa4c   : > { %v3756_v23 = vadd.f32 %v12782_v17, %v3716_v22  ;;  %v4065_v17 = vcombine.high %v4057_v10, %v4057_v10  ;;  %v11358_v22 = vcombine.low %v4034_v20, %v4034_v20  ;;  %v13710_v20 = vld [vmem:[%s14273_s23 + $0x710] sm:$0xff]  }
 0xa4e   : > { %v3761_v43 = vmax.f32 %v3756_v23, 0.0  ;;  %v4422_v23 = vsel %vm928_vm1, %v11358_v22, 0  ;;  %v13712_v22 = vld [vmem:[%s14273_s23 + $0x758] sm:$0xff]  }
 0xa50   : > { %v3762_v24 = vpack.c.bf16 %v3761_v43, %v3761_v43 }
 0xa52   : > { %13326 = vmatmul.mubr.msk.bf16.vlgmr.msra.gmra.mrb[52].mxu1 %vm868_vm2, %v3762_v24 }
 0xa53   : > { %3924 = vmatprep.mubr.bf16.mxu1 %v14196_v9  ;;  %3893 = vmatpush1.bf16.msra.mxu1 %v3846_v28 }
 0xa54   : > { %12811 = vmatprep.subr.bf16.mxu1 %v13663_v29 }
 0xb25   : > { %v3818_v33 = vpop.f32.mrb[52].mxu1 }
 0xb26   : > { %v3819_v35 = vadd.f32 %v11237_v31, %v3818_v33  ;;  %v13327_v36 = vpop.f32.mrb[53].mxu1 }
 0xb27   : > { %v3821_v37 = vpop.f32.mrb[54].mxu1 }
 0xb28   : > { %v3824_v39 = vmax.f32 %v3819_v35, 0.0  ;;  %v13328_v41 = vpop.f32.mrb[55].mxu1 }
 0xb2a   : > { %v3825_v45 = vpack.c.bf16 %v3824_v39, %v3824_v39  ;;  %v11320_v39 = vld [vmem:[%s14278_s26 + $0x6] ss:$0 sm:$0xff] }
 0xb2c   : > { %11246 = vmatmul.mubr.msk.bf16.vlgmr.msra.gmra.mrb[56].mxu0 %vm924_vm3, %v3825_v45  ;;  %11248 = vmatmul.mubr.msk.bf16.vlgmr.msra.gmra.mrb[56].mxu1 %vm924_vm3, %v3825_v45 }
 0xb2d   : > { %12790 = vmatpush3.bf16.msra.mxu0 %v13664_v42  ;;  %12812 = vmatpush3.bf16.msra.mxu1 %v13665_v44 }
 0xb2e   : > { %12791 = vmatprep.subr.bf16.mxu0 %v13666_v47  ;;  %12813 = vmatprep.subr.bf16.mxu1 %v13667_v48 }
 0xb2f   : > { %4295 = vmatprep.mubr.bf16.mxu0 %v4064_v38  ;;  %4335 = vmatprep.mubr.bf16.mxu1 %v4066_v49 }
 0xb31   : > { %12792 = vmatpush3.bf16.msra.mxu0 %v13668_v51  ;;  %12814 = vmatpush3.bf16.msra.mxu1 %v13669_v52 }
 0xb32   : > { %12793 = vmatprep.subr.bf16.mxu0 %v13670_v53  ;;  %12815 = vmatprep.subr.bf16.mxu1 %v13671_v54 }
 0xb35   : > { %12794 = vmatpush3.bf16.msra.mxu0 %v13672_v55  ;;  %12816 = vmatpush3.bf16.msra.mxu1 %v13673_v56  ;;  %v4035_v55 = vld [vmem:[%s14293_s17 + $0x68] sm:$0xff] }
 0xb36   : > { %12795 = vmatprep.subr.bf16.mxu0 %v13674_v57  ;;  %12817 = vmatprep.subr.bf16.mxu1 %v13675_v58  ;;  %v11361_v56 = vcombine.high %v4035_v55, %v4035_v55  ;;  %v11360_v57 = vcombine.low %v4035_v55, %v4035_v55 }
 0xb38   : > { %v4428_v58 = vsel %vm928_vm1, %v11360_v57, 0 }
 0xb39   : > { %12796 = vmatpush3.bf16.msra.mxu0 %v13676_v12  ;;  %12818 = vmatpush3.bf16.msra.mxu1 %v13677_v59  ;;  %v13700_v12 = vld [vmem:[%s14273_s23 + $0x740] sm:$0xff]  }
 0xb3a   : > { %12797 = vmatprep.subr.bf16.mxu0 %v13678_v60  ;;  %12819 = vmatprep.subr.bf16.mxu1 %v13679_v61  ;;  %v13701_v59 = vld [vmem:[%s14273_s23 + $0x7c0] sm:$0xff]   ;;  %v14747_v60 = vld.sshfl [vmem:[%s14268_s20 + $0x1c] sm:$0x33 pattern:$0x75316420] }
 0xb3b   : > { %v11354_v61 = vld [vmem:[%s14288_s16 + $0x6] ss:$0 sm:$0xff] }
 0xb3d   : > { %12798 = vmatpush3.bf16.msra.mxu0 %v13680_v62  ;;  %12820 = vmatpush3.bf16.msra.mxu1 %v13681_v14  ;;  %v4632_v62 = vcombine.high %v14747_v60, %v14747_v60 }
 0xb3e   : > { %12799 = vmatprep.subr.bf16.mxu0 %v13682_v15  ;;  %12821 = vmatprep.subr.bf16.mxu1 %v13683_v16 }
 0xb41   : > { %12800 = vmatpush3.bf16.msra.mxu0 %v13684_v63  ;;  %12822 = vmatpush3.bf16.msra.mxu1 %v13685_v0  ;;  %v4646_v0 = vrot.slane %v4632_v62, %v14332_v40 }
 0xb42   : > { %12801 = vmatprep.subr.bf16.mxu0 %v13686_v1  ;;  %12823 = vmatprep.subr.bf16.mxu1 %v13687_v2 }
 0xb45   : > { %12802 = vmatpush3.bf16.msra.mxu0 %v13688_v3  ;;  %12824 = vmatpush3.bf16.msra.mxu1 %v13689_v6  ;;  %v13702_v3 = vld [vmem:[%s14273_s23 + $0x700] sm:$0xff]  }
 0xb46   : > { %12803 = vmatprep.subr.bf16.mxu0 %v13690_v7  ;;  %12825 = vmatprep.subr.bf16.mxu1 %v13691_v8  ;;  %v13703_v6 = vld [vmem:[%s14273_s23 + $0x780] sm:$0xff]   ;;  %v13704_v8 = vld [vmem:[%s14273_s23 + $0x748] sm:$0xff]  }
 0xb49   : > { %12804 = vmatpush3.bf16.msra.mxu0 %v13692_v11  ;;  %12826 = vmatpush3.bf16.msra.mxu1 %v13693_v13  ;;  %v4648_v11 = vcombine.high %v4646_v0, %v4646_v0  ;;  %v13706_v13 = vld [vmem:[%s14273_s23 + $0x708] sm:$0xff]  }
 0xb4a   : > { %13329 = vmatprep.subr.bf16.mxu0 %v14194_v46  ;;  %11362 = vmatprep.subr.msk.bf16.mxu1 %vm928_vm1, %v11359_v21  ;;  %v13711_v21 = vld [vmem:[%s14273_s23 + $0x790] sm:$0xff]  }
 0xb4c   : > { %4296 = vmatmul.mubr.bf16.vlgmr.msra.gmra.mrb[60].mxu0 %v4057_v10  ;;  %4336 = vmatmul.mubr.bf16.vlgmr.msra.gmra.mrb[60].mxu1 %v4065_v17  ;;  %v13705_v10 = vld [vmem:[%s14273_s23 + $0x7c8] sm:$0xff]  }
 0xb4d   : > { %13333 = vmatprep.mubr.msk.bf16.mxu0 %vm14195_vm0, %v14194_v46  ;;  %4465 = vmatprep.mubr.bf16.mxu1 %v14196_v9  ;;  %v13707_v17 = vld [vmem:[%s14273_s23 + $0x788] sm:$0xff]  }
 0xb4e   : > { %13330 = vmatpush3.bf16.msra.mxu0 %v13694_v18  ;;  %4434 = vmatpush1.bf16.msra.mxu1 %v4422_v23  ;;  %v13708_v18 = vld [vmem:[%s14273_s23 + $0x750] sm:$0xff]   ;;  %v13713_v23 = vld [vmem:[%s14273_s23 + $0x7d8] sm:$0xff]  }
 0xb4f   : > { %13331 = vmatprep.subr.bf16.mxu0 %v14194_v46  ;;  %12836 = vmatprep.subr.bf16.mxu1 %v13700_v12 }
 0xb52   : > { %13332 = vmatpush3.bf16.msra.mxu0 %v13695_v19  ;;  %v13709_v19 = vld [vmem:[%s14273_s23 + $0x7d0] sm:$0xff]  }
 0xb53   : > { %11364 = vmatprep.subr.msk.bf16.mxu0 %vm928_vm1, %v11361_v56 }
 0xbff   : > { %v3885_v43 = vpop.f32.mrb[56].mxu0  ;;  %v3926_v24 = vpop.f32.mrb[56].mxu1 }
 0xc00   : > { %v3887_v25 = vpop.f32.mrb[57].mxu0  ;;  %v3928_v26 = vpop.f32.mrb[57].mxu1 }
 0xc01   : > { %v3937_v27 = vcombine.low %v3885_v43, %v3887_v25  ;;  %v3938_v28 = vcombine.low %v3926_v24, %v3928_v26  ;;  %v3889_v50 = vpop.f32.mrb[58].mxu0  ;;  %v3930_v29 = vpop.f32.mrb[58].mxu1  ;;  %v13714_v43 = vld [vmem:[%s14273_s23 + $0x718] sm:$0xff]   ;;  %v13716_v25 = vld [vmem:[%s14273_s23 + $0x760] sm:$0xff]  }
 0xc02   : > { %v3890_v30 = vpop.f32.mrb[59].mxu0  ;;  %v3931_v31 = vpop.f32.mrb[59].mxu1  ;;  %v13715_v24 = vld [vmem:[%s14273_s23 + $0x798] sm:$0xff]   ;;  %v13717_v26 = vld [vmem:[%s14273_s23 + $0x7e0] sm:$0xff]   ;;  %v13720_v50 = vld [vmem:[%s14273_s23 + $0x768] sm:$0xff]  }
 0xc03   : > { %v3945_v32 = vrot.slane %v3937_v27, %v14406_v4  ;;  %v3952_v33 = vrot.slane %v3938_v28, %v14406_v4  ;;  %v13718_v27 = vld [vmem:[%s14273_s23 + $0x720] sm:$0xff]   ;;  %v13721_v29 = vld [vmem:[%s14273_s23 + $0x7e8] sm:$0xff]  }
 0xc04   : > { %v13719_v28 = vld [vmem:[%s14273_s23 + $0x7a0] sm:$0xff]   ;;  %v13722_v30 = vld [vmem:[%s14273_s23 + $0x728] sm:$0xff]  }
 0xc05   : > { %v3953_v35 = vcombine.low %v3945_v32, %v3952_v33  ;;  %v13723_v31 = vld [vmem:[%s14273_s23 + $0x7a8] sm:$0xff]   ;;  %v13724_v32 = vld [vmem:[%s14273_s23 + $0x770] sm:$0xff]  }
 0xc06   : > { %v13725_v33 = vld [vmem:[%s14273_s23 + $0x7f0] sm:$0xff]  }
 0xc07   : > { %v14736_v36 = vadd.f32 %v3953_v35, %v14672_v5  ;;  %v13726_v35 = vld [vmem:[%s14273_s23 + $0x730] sm:$0xff]  }
 0xc1f   : > { %v12805_v37 = vpop.f32.mrb[60].mxu0  ;;  %v12827_v38 = vpop.f32.mrb[60].mxu1 }
 0xc20   : > { %v12806_v41 = vpop.f32.mrb[61].mxu0  ;;  %v12828_v42 = vpop.f32.mrb[61].mxu1 }
 0xc21   : > { %v12807_v44 = vadd.f32 %v12806_v41, %v12805_v37  ;;  %v12829_v45 = vadd.f32 %v12828_v42, %v12827_v38  ;;  %v12808_v47 = vpop.f32.mrb[62].mxu0  ;;  %v12830_v48 = vpop.f32.mrb[62].mxu1  ;;  %v13727_v37 = vld [vmem:[%s14273_s23 + $0x7b0] sm:$0xff]   ;;  %v13728_v38 = vld [vmem:[%s14273_s23 + $0x778] sm:$0xff]   ;;  %v4639_v41 = vrot.slane %v14747_v60, %v14332_v40 }
 0xc22   : > { %v12809_v49 = vpop.f32.mrb[63].mxu0  ;;  %v12831_v51 = vpop.f32.mrb[63].mxu1  ;;  %v13730_v42 = vld [vmem:[%s14273_s23 + $0x738] sm:$0xff]   ;;  %v13732_v47 = vld [vmem:[%s14283_s30 + $0x70] sm:$0xff]  }
 0xc23   : > { %v4298_v52 = vadd.f32 %v12807_v44, %v11320_v39  ;;  %v13729_v39 = vld [vmem:[%s14273_s23 + $0x7f8] sm:$0xff]   ;;  %v4616_v49 = vld [vmem:[%s14293_s17 + $0x70] sm:$0xff] }
 0xc24   : > { %v13731_v44 = vld [vmem:[%s14273_s23 + $0x7b8] sm:$0xff]   ;;  %v11476_v51 = vcombine.high %v4616_v49, %v4616_v49 }
 0xc25   : > { %v4338_v53 = vadd.f32 %v12829_v45, %v4298_v52  ;;  %v4647_v45 = vcombine.high %v4639_v41, %v4639_v41  ;;  %v13733_v48 = vld [vmem:[%s14283_s30 + $0x78] sm:$0xff]   ;;  %v11475_v52 = vcombine.low %v4616_v49, %v4616_v49  ;;  %v13748_v49 = vld [vmem:[%s14273_s23 + $0x810] sm:$0xff]  }
 0xc27   : > { %v4343_v5 = vmax.f32 %v4338_v53, 0.0  ;;  %v5004_v53 = vsel %vm928_vm1, %v11475_v52, 0  ;;  %v13750_v52 = vld [vmem:[%s14273_s23 + $0x858] sm:$0xff]  }
 0xc29   : > { %v4344_v54 = vpack.c.bf16 %v4343_v5, %v4343_v5 }
 0xc2b   : > { %13334 = vmatmul.mubr.msk.bf16.vlgmr.msra.gmra.mrb[64].mxu0 %vm868_vm2, %v4344_v54 }
 0xc2c   : > { %4506 = vmatprep.mubr.bf16.mxu0 %v14196_v9  ;;  %4475 = vmatpush1.bf16.msra.mxu0 %v4428_v58 }
 0xc2d   : > { %12858 = vmatprep.subr.bf16.mxu0 %v13701_v59 }
 0xcfe   : > { %v4400_v14 = vpop.f32.mrb[64].mxu0 }
 0xcff   : > { %v4401_v15 = vadd.f32 %v11354_v61, %v4400_v14  ;;  %v13335_v16 = vpop.f32.mrb[65].mxu0 }
 0xd00   : > { %v4403_v63 = vpop.f32.mrb[66].mxu0 }
 0xd01   : > { %v4406_v1 = vmax.f32 %v4401_v15, 0.0  ;;  %v13336_v2 = vpop.f32.mrb[67].mxu0 }
 0xd03   : > { %v4407_v7 = vpack.c.bf16 %v4406_v1, %v4406_v1  ;;  %v11437_v1 = vld [vmem:[%s14278_s26 + $0x7] ss:$0 sm:$0xff] }
 0xd05   : > { %11363 = vmatmul.mubr.msk.bf16.vlgmr.msra.gmra.mrb[64].mxu1 %vm924_vm3, %v4407_v7  ;;  %11365 = vmatmul.mubr.msk.bf16.vlgmr.msra.gmra.mrb[68].mxu0 %vm924_vm3, %v4407_v7 }
 0xd06   : > { %12837 = vmatpush3.bf16.msra.mxu1 %v13702_v3  ;;  %12859 = vmatpush3.bf16.msra.mxu0 %v13703_v6 }
 0xd07   : > { %12838 = vmatprep.subr.bf16.mxu1 %v13704_v8  ;;  %12860 = vmatprep.subr.bf16.mxu0 %v13705_v10 }
 0xd08   : > { %4877 = vmatprep.mubr.bf16.mxu1 %v4646_v0  ;;  %4917 = vmatprep.mubr.bf16.mxu0 %v4648_v11 }
 0xd0a   : > { %12839 = vmatpush3.bf16.msra.mxu1 %v13706_v13  ;;  %12861 = vmatpush3.bf16.msra.mxu0 %v13707_v17 }
 0xd0b   : > { %12840 = vmatprep.subr.bf16.mxu1 %v13708_v18  ;;  %12862 = vmatprep.subr.bf16.mxu0 %v13709_v19 }
 0xd0e   : > { %12841 = vmatpush3.bf16.msra.mxu1 %v13710_v20  ;;  %12863 = vmatpush3.bf16.msra.mxu0 %v13711_v21  ;;  %v4617_v20 = vld [vmem:[%s14293_s17 + $0x78] sm:$0xff] }
 0xd0f   : > { %12842 = vmatprep.subr.bf16.mxu1 %v13712_v22  ;;  %12864 = vmatprep.subr.bf16.mxu0 %v13713_v23  ;;  %v11478_v21 = vcombine.high %v4617_v20, %v4617_v20  ;;  %v11477_v22 = vcombine.low %v4617_v20, %v4617_v20 }
 0xd11   : > { %v5010_v23 = vsel %vm928_vm1, %v11477_v22, 0 }
 0xd12   : > { %12843 = vmatpush3.bf16.msra.mxu1 %v13714_v43  ;;  %12865 = vmatpush3.bf16.msra.mxu0 %v13715_v24  ;;  %v13738_v43 = vld [vmem:[%s14273_s23 + $0x840] sm:$0xff]  }
 0xd13   : > { %12844 = vmatprep.subr.bf16.mxu1 %v13716_v25  ;;  %12866 = vmatprep.subr.bf16.mxu0 %v13717_v26  ;;  %v13739_v24 = vld [vmem:[%s14273_s23 + $0x8c0] sm:$0xff]  }
 0xd14   : > { %v14811_v25 = vld.sshfl [vmem:[%s14268_s20 + $0x20] sm:$0x33 pattern:$0x75316420]  ;;  %v11471_v26 = vld [vmem:[%s14288_s16 + $0x7] ss:$0 sm:$0xff] }
 0xd16   : > { %12845 = vmatpush3.bf16.msra.mxu1 %v13718_v27  ;;  %12867 = vmatpush3.bf16.msra.mxu0 %v13719_v28  ;;  %v5214_v27 = vcombine.high %v14811_v25, %v14811_v25 }
 0xd17   : > { %12846 = vmatprep.subr.bf16.mxu1 %v13720_v50  ;;  %12868 = vmatprep.subr.bf16.mxu0 %v13721_v29 }
 0xd1a   : > { %12847 = vmatpush3.bf16.msra.mxu1 %v13722_v30  ;;  %12869 = vmatpush3.bf16.msra.mxu0 %v13723_v31  ;;  %v5228_v31 = vrot.slane %v5214_v27, %v14332_v40 }
 0xd1b   : > { %12848 = vmatprep.subr.bf16.mxu1 %v13724_v32  ;;  %12870 = vmatprep.subr.bf16.mxu0 %v13725_v33 }
 0xd1e   : > { %12849 = vmatpush3.bf16.msra.mxu1 %v13726_v35  ;;  %12871 = vmatpush3.bf16.msra.mxu0 %v13727_v37  ;;  %v13740_v35 = vld [vmem:[%s14273_s23 + $0x800] sm:$0xff]  }
 0xd1f   : > { %12850 = vmatprep.subr.bf16.mxu1 %v13728_v38  ;;  %12872 = vmatprep.subr.bf16.mxu0 %v13729_v39  ;;  %v13741_v37 = vld [vmem:[%s14273_s23 + $0x880] sm:$0xff]   ;;  %v13742_v39 = vld [vmem:[%s14273_s23 + $0x848] sm:$0xff]  }
 0xd22   : > { %12851 = vmatpush3.bf16.msra.mxu1 %v13730_v42  ;;  %12873 = vmatpush3.bf16.msra.mxu0 %v13731_v44  ;;  %v5230_v42 = vcombine.high %v5228_v31, %v5228_v31  ;;  %v13744_v44 = vld [vmem:[%s14273_s23 + $0x808] sm:$0xff]  }
 0xd23   : > { %13337 = vmatprep.subr.bf16.mxu1 %v14194_v46  ;;  %11479 = vmatprep.subr.msk.bf16.mxu0 %vm928_vm1, %v11476_v51  ;;  %v13749_v51 = vld [vmem:[%s14273_s23 + $0x890] sm:$0xff]  }
 0xd25   : > { %4878 = vmatmul.mubr.bf16.vlgmr.msra.gmra.mrb[68].mxu1 %v4639_v41  ;;  %4918 = vmatmul.mubr.bf16.vlgmr.msra.gmra.mrb[72].mxu0 %v4647_v45  ;;  %v13743_v41 = vld [vmem:[%s14273_s23 + $0x8c8] sm:$0xff]  }
 0xd26   : > { %13341 = vmatprep.mubr.msk.bf16.mxu1 %vm14195_vm0, %v14194_v46  ;;  %5047 = vmatprep.mubr.bf16.mxu0 %v14196_v9  ;;  %v13745_v45 = vld [vmem:[%s14273_s23 + $0x888] sm:$0xff]  }
 0xd27   : > { %13338 = vmatpush3.bf16.msra.mxu1 %v13732_v47  ;;  %5016 = vmatpush1.bf16.msra.mxu0 %v5004_v53  ;;  %v13746_v47 = vld [vmem:[%s14273_s23 + $0x850] sm:$0xff]   ;;  %v13751_v53 = vld [vmem:[%s14273_s23 + $0x8d8] sm:$0xff]  }
 0xd28   : > { %13339 = vmatprep.subr.bf16.mxu1 %v14194_v46  ;;  %12883 = vmatprep.subr.bf16.mxu0 %v13738_v43 }
 0xd2b   : > { %13340 = vmatpush3.bf16.msra.mxu1 %v13733_v48  ;;  %v13747_v48 = vld [vmem:[%s14273_s23 + $0x8d0] sm:$0xff]  }
 0xd2c   : > { %11481 = vmatprep.subr.msk.bf16.mxu1 %vm928_vm1, %v11478_v21 }
 0xdd8   : > { %v4467_v5 = vpop.f32.mrb[64].mxu1  ;;  %v4508_v54 = vpop.f32.mrb[68].mxu0 }
 0xdd9   : > { %v4469_v55 = vpop.f32.mrb[65].mxu1  ;;  %v4510_v56 = vpop.f32.mrb[69].mxu0 }
 0xdda   : > { %v4519_v57 = vcombine.low %v4467_v5, %v4469_v55  ;;  %v4520_v58 = vcombine.low %v4508_v54, %v4510_v56  ;;  %v4471_v12 = vpop.f32.mrb[66].mxu1  ;;  %v4512_v59 = vpop.f32.mrb[70].mxu0  ;;  %v13752_v5 = vld [vmem:[%s14273_s23 + $0x818] sm:$0xff]   ;;  %v13754_v55 = vld [vmem:[%s14273_s23 + $0x860] sm:$0xff]  }
 0xddb   : > { %v4472_v60 = vpop.f32.mrb[67].mxu1  ;;  %v4513_v61 = vpop.f32.mrb[71].mxu0  ;;  %v13753_v54 = vld [vmem:[%s14273_s23 + $0x898] sm:$0xff]   ;;  %v13755_v56 = vld [vmem:[%s14273_s23 + $0x8e0] sm:$0xff]   ;;  %v13758_v12 = vld [vmem:[%s14273_s23 + $0x868] sm:$0xff]  }
 0xddc   : > { %v4527_v62 = vrot.slane %v4519_v57, %v14406_v4  ;;  %v4534_v14 = vrot.slane %v4520_v58, %v14406_v4  ;;  %v13756_v57 = vld [vmem:[%s14273_s23 + $0x820] sm:$0xff]   ;;  %v13759_v59 = vld [vmem:[%s14273_s23 + $0x8e8] sm:$0xff]  }
 0xddd   : > { %v13757_v58 = vld [vmem:[%s14273_s23 + $0x8a0] sm:$0xff]   ;;  %v13760_v60 = vld [vmem:[%s14273_s23 + $0x828] sm:$0xff]  }
 0xdde   : > { %v4535_v15 = vcombine.low %v4527_v62, %v4534_v14  ;;  %v13761_v61 = vld [vmem:[%s14273_s23 + $0x8a8] sm:$0xff]   ;;  %v13762_v62 = vld [vmem:[%s14273_s23 + $0x870] sm:$0xff]  }
 0xddf   : > { %v13763_v14 = vld [vmem:[%s14273_s23 + $0x8f0] sm:$0xff]  }
 0xde0   : > { %v14800_v16 = vadd.f32 %v4535_v15, %v14736_v36  ;;  %v13764_v15 = vld [vmem:[%s14273_s23 + $0x830] sm:$0xff]  }
 0xdf8   : > { %v12852_v63 = vpop.f32.mrb[68].mxu1  ;;  %v12874_v0 = vpop.f32.mrb[72].mxu0 }
 0xdf9   : > { %v12853_v2 = vpop.f32.mrb[69].mxu1  ;;  %v12875_v3 = vpop.f32.mrb[73].mxu0 }
 0xdfa   : > { %v12854_v6 = vadd.f32 %v12853_v2, %v12852_v63  ;;  %v12876_v7 = vadd.f32 %v12875_v3, %v12874_v0  ;;  %v12855_v8 = vpop.f32.mrb[70].mxu1  ;;  %v12877_v10 = vpop.f32.mrb[74].mxu0  ;;  %v13765_v63 = vld [vmem:[%s14273_s23 + $0x8b0] sm:$0xff]   ;;  %v13766_v0 = vld [vmem:[%s14273_s23 + $0x878] sm:$0xff]   ;;  %v5221_v2 = vrot.slane %v14811_v25, %v14332_v40 }
 0xdfb   : > { %v12856_v11 = vpop.f32.mrb[71].mxu1  ;;  %v12878_v13 = vpop.f32.mrb[75].mxu0  ;;  %v13768_v3 = vld [vmem:[%s14273_s23 + $0x838] sm:$0xff]   ;;  %v13770_v8 = vld [vmem:[%s14283_s30 + $0x80] sm:$0xff]   ;;  %v13771_v10 = vld [vmem:[%s14283_s30 + $0x88] sm:$0xff]  }
 0xdfc   : > { %v4880_v17 = vadd.f32 %v12854_v6, %v11437_v1  ;;  %v13767_v1 = vld [vmem:[%s14273_s23 + $0x8f8] sm:$0xff]   ;;  %v5198_v11 = vld [vmem:[%s14293_s17 + $0x80] sm:$0xff] }
 0xdfd   : > { %v13769_v6 = vld [vmem:[%s14273_s23 + $0x8b8] sm:$0xff]   ;;  %v11593_v13 = vcombine.high %v5198_v11, %v5198_v11 }
 0xdfe   : > { %v4920_v18 = vadd.f32 %v12876_v7, %v4880_v17  ;;  %v5229_v7 = vcombine.high %v5221_v2, %v5221_v2  ;;  %v11592_v17 = vcombine.low %v5198_v11, %v5198_v11  ;;  %v13786_v11 = vld [vmem:[%s14273_s23 + $0x910] sm:$0xff]  }
 0xe00   : > { %v4925_v36 = vmax.f32 %v4920_v18, 0.0  ;;  %v5586_v18 = vsel %vm928_vm1, %v11592_v17, 0  ;;  %v13788_v17 = vld [vmem:[%s14273_s23 + $0x958] sm:$0xff]  }
 0xe02   : > { %v4926_v19 = vpack.c.bf16 %v4925_v36, %v4925_v36 }
 0xe04   : > { %13342 = vmatmul.mubr.msk.bf16.vlgmr.msra.gmra.mrb[72].mxu1 %vm868_vm2, %v4926_v19 }
 0xe05   : > { %5088 = vmatprep.mubr.bf16.mxu1 %v14196_v9  ;;  %5057 = vmatpush1.bf16.msra.mxu1 %v5010_v23 }
 0xe06   : > { %12905 = vmatprep.subr.bf16.mxu1 %v13739_v24 }
 0xed7   : > { %v4982_v28 = vpop.f32.mrb[72].mxu1 }
 0xed8   : > { %v4983_v50 = vadd.f32 %v11471_v26, %v4982_v28  ;;  %v13343_v29 = vpop.f32.mrb[73].mxu1 }
 0xed9   : > { %v4985_v30 = vpop.f32.mrb[74].mxu1 }
 0xeda   : > { %v4988_v32 = vmax.f32 %v4983_v50, 0.0  ;;  %v13344_v33 = vpop.f32.mrb[75].mxu1 }
 0xedc   : > { %v4989_v38 = vpack.c.bf16 %v4988_v32, %v4988_v32  ;;  %v11554_v32 = vld [vmem:[%s14278_s26 + $0x8] ss:$0 sm:$0xff] }
 0xede   : > { %11480 = vmatmul.mubr.msk.bf16.vlgmr.msra.gmra.mrb[76].mxu0 %vm924_vm3, %v4989_v38  ;;  %11482 = vmatmul.mubr.msk.bf16.vlgmr.msra.gmra.mrb[76].mxu1 %vm924_vm3, %v4989_v38 }
 0xedf   : > { %12884 = vmatpush3.bf16.msra.mxu0 %v13740_v35  ;;  %12906 = vmatpush3.bf16.msra.mxu1 %v13741_v37 }
 0xee0   : > { %12885 = vmatprep.subr.bf16.mxu0 %v13742_v39  ;;  %12907 = vmatprep.subr.bf16.mxu1 %v13743_v41 }
 0xee1   : > { %5459 = vmatprep.mubr.bf16.mxu0 %v5228_v31  ;;  %5499 = vmatprep.mubr.bf16.mxu1 %v5230_v42 }
 0xee3   : > { %12886 = vmatpush3.bf16.msra.mxu0 %v13744_v44  ;;  %12908 = vmatpush3.bf16.msra.mxu1 %v13745_v45 }
 0xee4   : > { %12887 = vmatprep.subr.bf16.mxu0 %v13746_v47  ;;  %12909 = vmatprep.subr.bf16.mxu1 %v13747_v48 }
 0xee7   : > { %12888 = vmatpush3.bf16.msra.mxu0 %v13748_v49  ;;  %12910 = vmatpush3.bf16.msra.mxu1 %v13749_v51  ;;  %v5199_v49 = vld [vmem:[%s14293_s17 + $0x88] sm:$0xff] }
 0xee8   : > { %12889 = vmatprep.subr.bf16.mxu0 %v13750_v52  ;;  %12911 = vmatprep.subr.bf16.mxu1 %v13751_v53  ;;  %v11595_v51 = vcombine.high %v5199_v49, %v5199_v49  ;;  %v11594_v52 = vcombine.low %v5199_v49, %v5199_v49 }
 0xeea   : > { %v5592_v53 = vsel %vm928_vm1, %v11594_v52, 0 }
 0xeeb   : > { %12890 = vmatpush3.bf16.msra.mxu0 %v13752_v5  ;;  %12912 = vmatpush3.bf16.msra.mxu1 %v13753_v54  ;;  %v13776_v5 = vld [vmem:[%s14273_s23 + $0x940] sm:$0xff]  }
 0xeec   : > { %12891 = vmatprep.subr.bf16.mxu0 %v13754_v55  ;;  %12913 = vmatprep.subr.bf16.mxu1 %v13755_v56  ;;  %v13777_v54 = vld [vmem:[%s14273_s23 + $0x9c0] sm:$0xff]   ;;  %v11588_v56 = vld [vmem:[%s14288_s16 + $0x8] ss:$0 sm:$0xff] }
 0xeed   : > { %v14875_v55 = vld.sshfl [vmem:[%s14268_s20 + $0x24] sm:$0x33 pattern:$0x75316420] }
 0xeef   : > { %12892 = vmatpush3.bf16.msra.mxu0 %v13756_v57  ;;  %12914 = vmatpush3.bf16.msra.mxu1 %v13757_v58  ;;  %v5796_v57 = vcombine.high %v14875_v55, %v14875_v55 }
 0xef0   : > { %12893 = vmatprep.subr.bf16.mxu0 %v13758_v12  ;;  %12915 = vmatprep.subr.bf16.mxu1 %v13759_v59 }
 0xef3   : > { %12894 = vmatpush3.bf16.msra.mxu0 %v13760_v60  ;;  %12916 = vmatpush3.bf16.msra.mxu1 %v13761_v61  ;;  %v5810_v61 = vrot.slane %v5796_v57, %v14332_v40 }
 0xef4   : > { %12895 = vmatprep.subr.bf16.mxu0 %v13762_v62  ;;  %12917 = vmatprep.subr.bf16.mxu1 %v13763_v14 }
 0xef7   : > { %12896 = vmatpush3.bf16.msra.mxu0 %v13764_v15  ;;  %12918 = vmatpush3.bf16.msra.mxu1 %v13765_v63  ;;  %v13778_v15 = vld [vmem:[%s14273_s23 + $0x900] sm:$0xff]  }
 0xef8   : > { %12897 = vmatprep.subr.bf16.mxu0 %v13766_v0  ;;  %12919 = vmatprep.subr.bf16.mxu1 %v13767_v1  ;;  %v13779_v63 = vld [vmem:[%s14273_s23 + $0x980] sm:$0xff]   ;;  %v13780_v1 = vld [vmem:[%s14273_s23 + $0x948] sm:$0xff]  }
 0xefb   : > { %12898 = vmatpush3.bf16.msra.mxu0 %v13768_v3  ;;  %12920 = vmatpush3.bf16.msra.mxu1 %v13769_v6  ;;  %v5812_v3 = vcombine.high %v5810_v61, %v5810_v61  ;;  %v13782_v6 = vld [vmem:[%s14273_s23 + $0x908] sm:$0xff]  }
 0xefc   : > { %13345 = vmatprep.subr.bf16.mxu0 %v14194_v46  ;;  %11596 = vmatprep.subr.msk.bf16.mxu1 %vm928_vm1, %v11593_v13  ;;  %v13787_v13 = vld [vmem:[%s14273_s23 + $0x990] sm:$0xff]  }
 0xefe   : > { %5460 = vmatmul.mubr.bf16.vlgmr.msra.gmra.mrb[80].mxu0 %v5221_v2  ;;  %5500 = vmatmul.mubr.bf16.vlgmr.msra.gmra.mrb[80].mxu1 %v5229_v7  ;;  %v13781_v2 = vld [vmem:[%s14273_s23 + $0x9c8] sm:$0xff]  }
 0xeff   : > { %13349 = vmatprep.mubr.msk.bf16.mxu0 %vm14195_vm0, %v14194_v46  ;;  %5629 = vmatprep.mubr.bf16.mxu1 %v14196_v9  ;;  %v13783_v7 = vld [vmem:[%s14273_s23 + $0x988] sm:$0xff]  }
 0xf00   : > { %13346 = vmatpush3.bf16.msra.mxu0 %v13770_v8  ;;  %5598 = vmatpush1.bf16.msra.mxu1 %v5586_v18  ;;  %v13784_v8 = vld [vmem:[%s14273_s23 + $0x950] sm:$0xff]   ;;  %v13789_v18 = vld [vmem:[%s14273_s23 + $0x9d8] sm:$0xff]  }
 0xf01   : > { %13347 = vmatprep.subr.bf16.mxu0 %v14194_v46  ;;  %12930 = vmatprep.subr.bf16.mxu1 %v13776_v5 }
 0xf04   : > { %13348 = vmatpush3.bf16.msra.mxu0 %v13771_v10  ;;  %v13785_v10 = vld [vmem:[%s14273_s23 + $0x9d0] sm:$0xff]  }
 0xf05   : > { %11598 = vmatprep.subr.msk.bf16.mxu0 %vm928_vm1, %v11595_v51 }
 0xfb1   : > { %v5049_v36 = vpop.f32.mrb[76].mxu0  ;;  %v5090_v19 = vpop.f32.mrb[76].mxu1 }
 0xfb2   : > { %v5051_v20 = vpop.f32.mrb[77].mxu0  ;;  %v5092_v21 = vpop.f32.mrb[77].mxu1 }
 0xfb3   : > { %v5101_v22 = vcombine.low %v5049_v36, %v5051_v20  ;;  %v5102_v23 = vcombine.low %v5090_v19, %v5092_v21  ;;  %v5053_v43 = vpop.f32.mrb[78].mxu0  ;;  %v5094_v24 = vpop.f32.mrb[78].mxu1  ;;  %v13790_v36 = vld [vmem:[%s14273_s23 + $0x918] sm:$0xff]   ;;  %v13792_v20 = vld [vmem:[%s14273_s23 + $0x960] sm:$0xff]  }
 0xfb4   : > { %v5054_v25 = vpop.f32.mrb[79].mxu0  ;;  %v5095_v26 = vpop.f32.mrb[79].mxu1  ;;  %v13791_v19 = vld [vmem:[%s14273_s23 + $0x998] sm:$0xff]   ;;  %v13793_v21 = vld [vmem:[%s14273_s23 + $0x9e0] sm:$0xff]   ;;  %v13796_v43 = vld [vmem:[%s14273_s23 + $0x968] sm:$0xff]  }
 0xfb5   : > { %v5109_v27 = vrot.slane %v5101_v22, %v14406_v4  ;;  %v5116_v28 = vrot.slane %v5102_v23, %v14406_v4  ;;  %v13794_v22 = vld [vmem:[%s14273_s23 + $0x920] sm:$0xff]   ;;  %v13797_v24 = vld [vmem:[%s14273_s23 + $0x9e8] sm:$0xff]  }
 0xfb6   : > { %v13795_v23 = vld [vmem:[%s14273_s23 + $0x9a0] sm:$0xff]   ;;  %v13798_v25 = vld [vmem:[%s14273_s23 + $0x928] sm:$0xff]  }
 0xfb7   : > { %v5117_v50 = vcombine.low %v5109_v27, %v5116_v28  ;;  %v13799_v26 = vld [vmem:[%s14273_s23 + $0x9a8] sm:$0xff]   ;;  %v13800_v27 = vld [vmem:[%s14273_s23 + $0x970] sm:$0xff]  }
 0xfb8   : > { %v13801_v28 = vld [vmem:[%s14273_s23 + $0x9f0] sm:$0xff]  }
 0xfb9   : > { %v14864_v29 = vadd.f32 %v5117_v50, %v14800_v16  ;;  %v13802_v50 = vld [vmem:[%s14273_s23 + $0x930] sm:$0xff]  }
 0xfd1   : > { %v12899_v30 = vpop.f32.mrb[80].mxu0  ;;  %v12921_v31 = vpop.f32.mrb[80].mxu1 }
 0xfd2   : > { %v12900_v33 = vpop.f32.mrb[81].mxu0  ;;  %v12922_v35 = vpop.f32.mrb[81].mxu1 }
 0xfd3   : > { %v12901_v37 = vadd.f32 %v12900_v33, %v12899_v30  ;;  %v12923_v38 = vadd.f32 %v12922_v35, %v12921_v31  ;;  %v12902_v39 = vpop.f32.mrb[82].mxu0  ;;  %v12924_v41 = vpop.f32.mrb[82].mxu1  ;;  %v13803_v30 = vld [vmem:[%s14273_s23 + $0x9b0] sm:$0xff]   ;;  %v13804_v31 = vld [vmem:[%s14273_s23 + $0x978] sm:$0xff]   ;;  %v5803_v33 = vrot.slane %v14875_v55, %v14332_v40 }
 0xfd4   : > { %v12903_v42 = vpop.f32.mrb[83].mxu0  ;;  %v12925_v44 = vpop.f32.mrb[83].mxu1  ;;  %v13806_v35 = vld [vmem:[%s14273_s23 + $0x938] sm:$0xff]   ;;  %v13808_v39 = vld [vmem:[%s14283_s30 + $0x90] sm:$0xff]  }
 0xfd5   : > { %v5462_v45 = vadd.f32 %v12901_v37, %v11554_v32  ;;  %v13805_v32 = vld [vmem:[%s14273_s23 + $0x9f8] sm:$0xff]   ;;  %v5780_v42 = vld [vmem:[%s14293_s17 + $0x90] sm:$0xff] }
 0xfd6   : > { %v13807_v37 = vld [vmem:[%s14273_s23 + $0x9b8] sm:$0xff]   ;;  %v11710_v44 = vcombine.high %v5780_v42, %v5780_v42 }
 0xfd7   : > { %v5502_v47 = vadd.f32 %v12923_v38, %v5462_v45  ;;  %v5811_v38 = vcombine.high %v5803_v33, %v5803_v33  ;;  %v13809_v41 = vld [vmem:[%s14283_s30 + $0x98] sm:$0xff]   ;;  %v11709_v45 = vcombine.low %v5780_v42, %v5780_v42  ;;  %v13824_v42 = vld [vmem:[%s14273_s23 + $0xa10] sm:$0xff]  }
 0xfd9   : > { %v5507_v16 = vmax.f32 %v5502_v47, 0.0  ;;  %v6168_v47 = vsel %vm928_vm1, %v11709_v45, 0  ;;  %v13826_v45 = vld [vmem:[%s14273_s23 + $0xa58] sm:$0xff]  }
 0xfdb   : > { %v5508_v48 = vpack.c.bf16 %v5507_v16, %v5507_v16 }
 0xfdd   : > { %13350 = vmatmul.mubr.msk.bf16.vlgmr.msra.gmra.mrb[84].mxu0 %vm868_vm2, %v5508_v48 }
 0xfde   : > { %5670 = vmatprep.mubr.bf16.mxu0 %v14196_v9  ;;  %5639 = vmatpush1.bf16.msra.mxu0 %v5592_v53 }
 0xfdf   : > { %12952 = vmatprep.subr.bf16.mxu0 %v13777_v54 }
0x10b0   : > { %v5564_v58 = vpop.f32.mrb[84].mxu0 }
0x10b1   : > { %v5565_v12 = vadd.f32 %v11588_v56, %v5564_v58  ;;  %v13351_v59 = vpop.f32.mrb[85].mxu0 }
0x10b2   : > { %v5567_v60 = vpop.f32.mrb[86].mxu0 }
0x10b3   : > { %v5570_v62 = vmax.f32 %v5565_v12, 0.0  ;;  %v13352_v14 = vpop.f32.mrb[87].mxu0 }
0x10b5   : > { %v5571_v0 = vpack.c.bf16 %v5570_v62, %v5570_v62  ;;  %v11671_v62 = vld [vmem:[%s14278_s26 + $0x9] ss:$0 sm:$0xff] }
0x10b7   : > { %11597 = vmatmul.mubr.msk.bf16.vlgmr.msra.gmra.mrb[84].mxu1 %vm924_vm3, %v5571_v0  ;;  %11599 = vmatmul.mubr.msk.bf16.vlgmr.msra.gmra.mrb[88].mxu0 %vm924_vm3, %v5571_v0 }
0x10b8   : > { %12931 = vmatpush3.bf16.msra.mxu1 %v13778_v15  ;;  %12953 = vmatpush3.bf16.msra.mxu0 %v13779_v63 }
0x10b9   : > { %12932 = vmatprep.subr.bf16.mxu1 %v13780_v1  ;;  %12954 = vmatprep.subr.bf16.mxu0 %v13781_v2 }
0x10ba   : > { %6041 = vmatprep.mubr.bf16.mxu1 %v5810_v61  ;;  %6081 = vmatprep.mubr.bf16.mxu0 %v5812_v3 }
0x10bc   : > { %12933 = vmatpush3.bf16.msra.mxu1 %v13782_v6  ;;  %12955 = vmatpush3.bf16.msra.mxu0 %v13783_v7 }
0x10bd   : > { %12934 = vmatprep.subr.bf16.mxu1 %v13784_v8  ;;  %12956 = vmatprep.subr.bf16.mxu0 %v13785_v10 }
0x10c0   : > { %12935 = vmatpush3.bf16.msra.mxu1 %v13786_v11  ;;  %12957 = vmatpush3.bf16.msra.mxu0 %v13787_v13  ;;  %v5781_v11 = vld [vmem:[%s14293_s17 + $0x98] sm:$0xff] }
0x10c1   : > { %12936 = vmatprep.subr.bf16.mxu1 %v13788_v17  ;;  %12958 = vmatprep.subr.bf16.mxu0 %v13789_v18  ;;  %v11712_v13 = vcombine.high %v5781_v11, %v5781_v11  ;;  %v11711_v17 = vcombine.low %v5781_v11, %v5781_v11 }
0x10c3   : > { %v6174_v18 = vsel %vm928_vm1, %v11711_v17, 0 }
0x10c4   : > { %12937 = vmatpush3.bf16.msra.mxu1 %v13790_v36  ;;  %12959 = vmatpush3.bf16.msra.mxu0 %v13791_v19  ;;  %v13814_v36 = vld [vmem:[%s14273_s23 + $0xa40] sm:$0xff]  }
0x10c5   : > { %12938 = vmatprep.subr.bf16.mxu1 %v13792_v20  ;;  %12960 = vmatprep.subr.bf16.mxu0 %v13793_v21  ;;  %v13815_v19 = vld [vmem:[%s14273_s23 + $0xac0] sm:$0xff]   ;;  %v14939_v20 = vld.sshfl [vmem:[%s14268_s20 + $0x28] sm:$0x33 pattern:$0x75316420] }
0x10c6   : > { %v11705_v21 = vld [vmem:[%s14288_s16 + $0x9] ss:$0 sm:$0xff] }
0x10c8   : > { %12939 = vmatpush3.bf16.msra.mxu1 %v13794_v22  ;;  %12961 = vmatpush3.bf16.msra.mxu0 %v13795_v23  ;;  %v6378_v22 = vcombine.high %v14939_v20, %v14939_v20 }
0x10c9   : > { %12940 = vmatprep.subr.bf16.mxu1 %v13796_v43  ;;  %12962 = vmatprep.subr.bf16.mxu0 %v13797_v24 }
0x10cc   : > { %12941 = vmatpush3.bf16.msra.mxu1 %v13798_v25  ;;  %12963 = vmatpush3.bf16.msra.mxu0 %v13799_v26  ;;  %v6392_v26 = vrot.slane %v6378_v22, %v14332_v40 }
0x10cd   : > { %12942 = vmatprep.subr.bf16.mxu1 %v13800_v27  ;;  %12964 = vmatprep.subr.bf16.mxu0 %v13801_v28 }
0x10d0   : > { %12943 = vmatpush3.bf16.msra.mxu1 %v13802_v50  ;;  %12965 = vmatpush3.bf16.msra.mxu0 %v13803_v30  ;;  %v13816_v50 = vld [vmem:[%s14273_s23 + $0xa00] sm:$0xff]  }
0x10d1   : > { %12944 = vmatprep.subr.bf16.mxu1 %v13804_v31  ;;  %12966 = vmatprep.subr.bf16.mxu0 %v13805_v32  ;;  %v13817_v30 = vld [vmem:[%s14273_s23 + $0xa80] sm:$0xff]   ;;  %v13818_v32 = vld [vmem:[%s14273_s23 + $0xa48] sm:$0xff]  }
0x10d4   : > { %12945 = vmatpush3.bf16.msra.mxu1 %v13806_v35  ;;  %12967 = vmatpush3.bf16.msra.mxu0 %v13807_v37  ;;  %v6394_v35 = vcombine.high %v6392_v26, %v6392_v26  ;;  %v13820_v37 = vld [vmem:[%s14273_s23 + $0xa08] sm:$0xff]  }
0x10d5   : > { %13353 = vmatprep.subr.bf16.mxu1 %v14194_v46  ;;  %11713 = vmatprep.subr.msk.bf16.mxu0 %vm928_vm1, %v11710_v44  ;;  %v13825_v44 = vld [vmem:[%s14273_s23 + $0xa90] sm:$0xff]  }
0x10d7   : > { %6042 = vmatmul.mubr.bf16.vlgmr.msra.gmra.mrb[88].mxu1 %v5803_v33  ;;  %6082 = vmatmul.mubr.bf16.vlgmr.msra.gmra.mrb[92].mxu0 %v5811_v38  ;;  %v13819_v33 = vld [vmem:[%s14273_s23 + $0xac8] sm:$0xff]  }
0x10d8   : > { %13357 = vmatprep.mubr.msk.bf16.mxu1 %vm14195_vm0, %v14194_v46  ;;  %6211 = vmatprep.mubr.bf16.mxu0 %v14196_v9  ;;  %v13821_v38 = vld [vmem:[%s14273_s23 + $0xa88] sm:$0xff]  }
0x10d9   : > { %13354 = vmatpush3.bf16.msra.mxu1 %v13808_v39  ;;  %6180 = vmatpush1.bf16.msra.mxu0 %v6168_v47  ;;  %v13822_v39 = vld [vmem:[%s14273_s23 + $0xa50] sm:$0xff]   ;;  %v13827_v47 = vld [vmem:[%s14273_s23 + $0xad8] sm:$0xff]  }
0x10da   : > { %13355 = vmatprep.subr.bf16.mxu1 %v14194_v46  ;;  %12977 = vmatprep.subr.bf16.mxu0 %v13814_v36 }
0x10dd   : > { %13356 = vmatpush3.bf16.msra.mxu1 %v13809_v41  ;;  %v13823_v41 = vld [vmem:[%s14273_s23 + $0xad0] sm:$0xff]  }
0x10de   : > { %11715 = vmatprep.subr.msk.bf16.mxu1 %vm928_vm1, %v11712_v13 }
0x118a   : > { %v5631_v16 = vpop.f32.mrb[84].mxu1  ;;  %v5672_v48 = vpop.f32.mrb[88].mxu0 }
0x118b   : > { %v5633_v49 = vpop.f32.mrb[85].mxu1  ;;  %v5674_v51 = vpop.f32.mrb[89].mxu0 }
0x118c   : > { %v5683_v52 = vcombine.low %v5631_v16, %v5633_v49  ;;  %v5684_v53 = vcombine.low %v5672_v48, %v5674_v51  ;;  %v5635_v5 = vpop.f32.mrb[86].mxu1  ;;  %v5676_v54 = vpop.f32.mrb[90].mxu0  ;;  %v13828_v16 = vld [vmem:[%s14273_s23 + $0xa18] sm:$0xff]   ;;  %v13830_v49 = vld [vmem:[%s14273_s23 + $0xa60] sm:$0xff]  }
0x118d   : > { %v5636_v55 = vpop.f32.mrb[87].mxu1  ;;  %v5677_v56 = vpop.f32.mrb[91].mxu0  ;;  %v13829_v48 = vld [vmem:[%s14273_s23 + $0xa98] sm:$0xff]   ;;  %v13831_v51 = vld [vmem:[%s14273_s23 + $0xae0] sm:$0xff]   ;;  %v13834_v5 = vld [vmem:[%s14273_s23 + $0xa68] sm:$0xff]  }
0x118e   : > { %v5691_v57 = vrot.slane %v5683_v52, %v14406_v4  ;;  %v5698_v58 = vrot.slane %v5684_v53, %v14406_v4  ;;  %v13832_v52 = vld [vmem:[%s14273_s23 + $0xa20] sm:$0xff]   ;;  %v13835_v54 = vld [vmem:[%s14273_s23 + $0xae8] sm:$0xff]  }
0x118f   : > { %v13833_v53 = vld [vmem:[%s14273_s23 + $0xaa0] sm:$0xff]   ;;  %v13836_v55 = vld [vmem:[%s14273_s23 + $0xa28] sm:$0xff]  }
0x1190   : > { %v5699_v12 = vcombine.low %v5691_v57, %v5698_v58  ;;  %v13837_v56 = vld [vmem:[%s14273_s23 + $0xaa8] sm:$0xff]   ;;  %v13838_v57 = vld [vmem:[%s14273_s23 + $0xa70] sm:$0xff]  }
0x1191   : > { %v13839_v58 = vld [vmem:[%s14273_s23 + $0xaf0] sm:$0xff]  }
0x1192   : > { %v14928_v59 = vadd.f32 %v5699_v12, %v14864_v29  ;;  %v13840_v12 = vld [vmem:[%s14273_s23 + $0xa30] sm:$0xff]  }
0x11aa   : > { %v12946_v60 = vpop.f32.mrb[88].mxu1  ;;  %v12968_v61 = vpop.f32.mrb[92].mxu0 }
0x11ab   : > { %v12947_v14 = vpop.f32.mrb[89].mxu1  ;;  %v12969_v15 = vpop.f32.mrb[93].mxu0 }
0x11ac   : > { %v12948_v63 = vadd.f32 %v12947_v14, %v12946_v60  ;;  %v12970_v0 = vadd.f32 %v12969_v15, %v12968_v61  ;;  %v12949_v1 = vpop.f32.mrb[90].mxu1  ;;  %v12971_v2 = vpop.f32.mrb[94].mxu0  ;;  %v13841_v60 = vld [vmem:[%s14273_s23 + $0xab0] sm:$0xff]   ;;  %v13842_v61 = vld [vmem:[%s14273_s23 + $0xa78] sm:$0xff]   ;;  %v6385_v14 = vrot.slane %v14939_v20, %v14332_v40 }
0x11ad   : > { %v12950_v3 = vpop.f32.mrb[91].mxu1  ;;  %v12972_v6 = vpop.f32.mrb[95].mxu0  ;;  %v13844_v15 = vld [vmem:[%s14273_s23 + $0xa38] sm:$0xff]   ;;  %v13846_v1 = vld [vmem:[%s14283_s30 + $0xa0] sm:$0xff]   ;;  %v13847_v2 = vld [vmem:[%s14283_s30 + $0xa8] sm:$0xff]  }
0x11ae   : > { %v6044_v7 = vadd.f32 %v12948_v63, %v11671_v62  ;;  %v13843_v62 = vld [vmem:[%s14273_s23 + $0xaf8] sm:$0xff]   ;;  %v6362_v3 = vld [vmem:[%s14293_s17 + $0xa0] sm:$0xff] }
0x11af   : > { %v13845_v63 = vld [vmem:[%s14273_s23 + $0xab8] sm:$0xff]   ;;  %v11827_v6 = vcombine.high %v6362_v3, %v6362_v3 }
0x11b0   : > { %v6084_v8 = vadd.f32 %v12970_v0, %v6044_v7  ;;  %v6393_v0 = vcombine.high %v6385_v14, %v6385_v14  ;;  %v11826_v7 = vcombine.low %v6362_v3, %v6362_v3  ;;  %v13862_v3 = vld [vmem:[%s14273_s23 + $0xb10] sm:$0xff]  }
0x11b2   : > { %v6089_v29 = vmax.f32 %v6084_v8, 0.0  ;;  %v6750_v8 = vsel %vm928_vm1, %v11826_v7, 0  ;;  %v13864_v7 = vld [vmem:[%s14273_s23 + $0xb58] sm:$0xff]  }
0x11b4   : > { %v6090_v10 = vpack.c.bf16 %v6089_v29, %v6089_v29 }
0x11b6   : > { %13358 = vmatmul.mubr.msk.bf16.vlgmr.msra.gmra.mrb[92].mxu1 %vm868_vm2, %v6090_v10 }
0x11b7   : > { %6252 = vmatprep.mubr.bf16.mxu1 %v14196_v9  ;;  %6221 = vmatpush1.bf16.msra.mxu1 %v6174_v18 }
0x11b8   : > { %12999 = vmatprep.subr.bf16.mxu1 %v13815_v19 }
0x1289   : > { %v6146_v23 = vpop.f32.mrb[92].mxu1 }
0x128a   : > { %v6147_v43 = vadd.f32 %v11705_v21, %v6146_v23  ;;  %v13359_v24 = vpop.f32.mrb[93].mxu1 }
0x128b   : > { %v6149_v25 = vpop.f32.mrb[94].mxu1 }
0x128c   : > { %v6152_v27 = vmax.f32 %v6147_v43, 0.0  ;;  %v13360_v28 = vpop.f32.mrb[95].mxu1 }
0x128e   : > { %v6153_v31 = vpack.c.bf16 %v6152_v27, %v6152_v27  ;;  %v11788_v27 = vld [vmem:[%s14278_s26 + $0xa] ss:$0 sm:$0xff] }
0x1290   : > { %11714 = vmatmul.mubr.msk.bf16.vlgmr.msra.gmra.mrb[96].mxu0 %vm924_vm3, %v6153_v31  ;;  %11716 = vmatmul.mubr.msk.bf16.vlgmr.msra.gmra.mrb[96].mxu1 %vm924_vm3, %v6153_v31 }
0x1291   : > { %12978 = vmatpush3.bf16.msra.mxu0 %v13816_v50  ;;  %13000 = vmatpush3.bf16.msra.mxu1 %v13817_v30 }
0x1292   : > { %12979 = vmatprep.subr.bf16.mxu0 %v13818_v32  ;;  %13001 = vmatprep.subr.bf16.mxu1 %v13819_v33 }
0x1293   : > { %6623 = vmatprep.mubr.bf16.mxu0 %v6392_v26  ;;  %6663 = vmatprep.mubr.bf16.mxu1 %v6394_v35 }
0x1295   : > { %12980 = vmatpush3.bf16.msra.mxu0 %v13820_v37  ;;  %13002 = vmatpush3.bf16.msra.mxu1 %v13821_v38 }
0x1296   : > { %12981 = vmatprep.subr.bf16.mxu0 %v13822_v39  ;;  %13003 = vmatprep.subr.bf16.mxu1 %v13823_v41 }
0x1299   : > { %12982 = vmatpush3.bf16.msra.mxu0 %v13824_v42  ;;  %13004 = vmatpush3.bf16.msra.mxu1 %v13825_v44  ;;  %v6363_v42 = vld [vmem:[%s14293_s17 + $0xa8] sm:$0xff] }
0x129a   : > { %12983 = vmatprep.subr.bf16.mxu0 %v13826_v45  ;;  %13005 = vmatprep.subr.bf16.mxu1 %v13827_v47  ;;  %v11829_v44 = vcombine.high %v6363_v42, %v6363_v42  ;;  %v11828_v45 = vcombine.low %v6363_v42, %v6363_v42 }
0x129c   : > { %v6756_v47 = vsel %vm928_vm1, %v11828_v45, 0 }
0x129d   : > { %12984 = vmatpush3.bf16.msra.mxu0 %v13828_v16  ;;  %13006 = vmatpush3.bf16.msra.mxu1 %v13829_v48  ;;  %v13852_v16 = vld [vmem:[%s14273_s23 + $0xb40] sm:$0xff]  }
0x129e   : > { %12985 = vmatprep.subr.bf16.mxu0 %v13830_v49  ;;  %13007 = vmatprep.subr.bf16.mxu1 %v13831_v51  ;;  %v13853_v48 = vld [vmem:[%s14273_s23 + $0xbc0] sm:$0xff]   ;;  %v15003_v49 = vld.sshfl [vmem:[%s14268_s20 + $0x2c] sm:$0x33 pattern:$0x75316420] }
0x129f   : > { %v11822_v51 = vld [vmem:[%s14288_s16 + $0xa] ss:$0 sm:$0xff] }
0x12a1   : > { %12986 = vmatpush3.bf16.msra.mxu0 %v13832_v52  ;;  %13008 = vmatpush3.bf16.msra.mxu1 %v13833_v53  ;;  %v6960_v52 = vcombine.high %v15003_v49, %v15003_v49 }
0x12a2   : > { %12987 = vmatprep.subr.bf16.mxu0 %v13834_v5  ;;  %13009 = vmatprep.subr.bf16.mxu1 %v13835_v54 }
0x12a5   : > { %12988 = vmatpush3.bf16.msra.mxu0 %v13836_v55  ;;  %13010 = vmatpush3.bf16.msra.mxu1 %v13837_v56  ;;  %v6974_v56 = vrot.slane %v6960_v52, %v14332_v40 }
0x12a6   : > { %12989 = vmatprep.subr.bf16.mxu0 %v13838_v57  ;;  %13011 = vmatprep.subr.bf16.mxu1 %v13839_v58 }
0x12a9   : > { %12990 = vmatpush3.bf16.msra.mxu0 %v13840_v12  ;;  %13012 = vmatpush3.bf16.msra.mxu1 %v13841_v60  ;;  %v13854_v12 = vld [vmem:[%s14273_s23 + $0xb00] sm:$0xff]  }
0x12aa   : > { %12991 = vmatprep.subr.bf16.mxu0 %v13842_v61  ;;  %13013 = vmatprep.subr.bf16.mxu1 %v13843_v62  ;;  %v13855_v60 = vld [vmem:[%s14273_s23 + $0xb80] sm:$0xff]   ;;  %v13856_v62 = vld [vmem:[%s14273_s23 + $0xb48] sm:$0xff]  }
0x12ad   : > { %12992 = vmatpush3.bf16.msra.mxu0 %v13844_v15  ;;  %13014 = vmatpush3.bf16.msra.mxu1 %v13845_v63  ;;  %v6976_v15 = vcombine.high %v6974_v56, %v6974_v56  ;;  %v13858_v63 = vld [vmem:[%s14273_s23 + $0xb08] sm:$0xff]  }
0x12ae   : > { %13361 = vmatprep.subr.bf16.mxu0 %v14194_v46  ;;  %11830 = vmatprep.subr.msk.bf16.mxu1 %vm928_vm1, %v11827_v6  ;;  %v13863_v6 = vld [vmem:[%s14273_s23 + $0xb90] sm:$0xff]  }
0x12b0   : > { %6624 = vmatmul.mubr.bf16.vlgmr.msra.gmra.mrb[100].mxu0 %v6385_v14  ;;  %6664 = vmatmul.mubr.bf16.vlgmr.msra.gmra.mrb[100].mxu1 %v6393_v0  ;;  %v13857_v14 = vld [vmem:[%s14273_s23 + $0xbc8] sm:$0xff]  }
0x12b1   : > { %13365 = vmatprep.mubr.msk.bf16.mxu0 %vm14195_vm0, %v14194_v46  ;;  %6793 = vmatprep.mubr.bf16.mxu1 %v14196_v9  ;;  %v13859_v0 = vld [vmem:[%s14273_s23 + $0xb88] sm:$0xff]  }
0x12b2   : > { %13362 = vmatpush3.bf16.msra.mxu0 %v13846_v1  ;;  %6762 = vmatpush1.bf16.msra.mxu1 %v6750_v8  ;;  %v13860_v1 = vld [vmem:[%s14273_s23 + $0xb50] sm:$0xff]   ;;  %v13865_v8 = vld [vmem:[%s14273_s23 + $0xbd8] sm:$0xff]  }
0x12b3   : > { %13363 = vmatprep.subr.bf16.mxu0 %v14194_v46  ;;  %13024 = vmatprep.subr.bf16.mxu1 %v13852_v16 }
0x12b6   : > { %13364 = vmatpush3.bf16.msra.mxu0 %v13847_v2  ;;  %v13861_v2 = vld [vmem:[%s14273_s23 + $0xbd0] sm:$0xff]  }
0x12b7   : > { %11832 = vmatprep.subr.msk.bf16.mxu0 %vm928_vm1, %v11829_v44 }
0x1363   : > { %v6213_v29 = vpop.f32.mrb[96].mxu0  ;;  %v6254_v10 = vpop.f32.mrb[96].mxu1 }
0x1364   : > { %v6215_v11 = vpop.f32.mrb[97].mxu0  ;;  %v6256_v13 = vpop.f32.mrb[97].mxu1 }
0x1365   : > { %v6265_v17 = vcombine.low %v6213_v29, %v6215_v11  ;;  %v6266_v18 = vcombine.low %v6254_v10, %v6256_v13  ;;  %v6217_v36 = vpop.f32.mrb[98].mxu0  ;;  %v6258_v19 = vpop.f32.mrb[98].mxu1  ;;  %v13866_v29 = vld [vmem:[%s14273_s23 + $0xb18] sm:$0xff]   ;;  %v13868_v11 = vld [vmem:[%s14273_s23 + $0xb60] sm:$0xff]  }
0x1366   : > { %v6218_v20 = vpop.f32.mrb[99].mxu0  ;;  %v6259_v21 = vpop.f32.mrb[99].mxu1  ;;  %v13867_v10 = vld [vmem:[%s14273_s23 + $0xb98] sm:$0xff]   ;;  %v13869_v13 = vld [vmem:[%s14273_s23 + $0xbe0] sm:$0xff]   ;;  %v13872_v36 = vld [vmem:[%s14273_s23 + $0xb68] sm:$0xff]  }
0x1367   : > { %v6273_v22 = vrot.slane %v6265_v17, %v14406_v4  ;;  %v6280_v23 = vrot.slane %v6266_v18, %v14406_v4  ;;  %v13870_v17 = vld [vmem:[%s14273_s23 + $0xb20] sm:$0xff]   ;;  %v13873_v19 = vld [vmem:[%s14273_s23 + $0xbe8] sm:$0xff]  }
0x1368   : > { %v13871_v18 = vld [vmem:[%s14273_s23 + $0xba0] sm:$0xff]   ;;  %v13874_v20 = vld [vmem:[%s14273_s23 + $0xb28] sm:$0xff]  }
0x1369   : > { %v6281_v43 = vcombine.low %v6273_v22, %v6280_v23  ;;  %v13875_v21 = vld [vmem:[%s14273_s23 + $0xba8] sm:$0xff]   ;;  %v13876_v22 = vld [vmem:[%s14273_s23 + $0xb70] sm:$0xff]  }
0x136a   : > { %v13877_v23 = vld [vmem:[%s14273_s23 + $0xbf0] sm:$0xff]  }
0x136b   : > { %v14992_v24 = vadd.f32 %v6281_v43, %v14928_v59  ;;  %v13878_v43 = vld [vmem:[%s14273_s23 + $0xb30] sm:$0xff]  }
0x1383   : > { %v12993_v25 = vpop.f32.mrb[100].mxu0  ;;  %v13015_v26 = vpop.f32.mrb[100].mxu1 }
0x1384   : > { %v12994_v28 = vpop.f32.mrb[101].mxu0  ;;  %v13016_v50 = vpop.f32.mrb[101].mxu1 }
0x1385   : > { %v12995_v30 = vadd.f32 %v12994_v28, %v12993_v25  ;;  %v13017_v31 = vadd.f32 %v13016_v50, %v13015_v26  ;;  %v12996_v32 = vpop.f32.mrb[102].mxu0  ;;  %v13018_v33 = vpop.f32.mrb[102].mxu1  ;;  %v13879_v25 = vld [vmem:[%s14273_s23 + $0xbb0] sm:$0xff]   ;;  %v13880_v26 = vld [vmem:[%s14273_s23 + $0xb78] sm:$0xff]   ;;  %v6967_v28 = vrot.slane %v15003_v49, %v14332_v40 }
0x1386   : > { %v12997_v35 = vpop.f32.mrb[103].mxu0  ;;  %v13019_v37 = vpop.f32.mrb[103].mxu1  ;;  %v13882_v50 = vld [vmem:[%s14273_s23 + $0xb38] sm:$0xff]   ;;  %v13884_v32 = vld [vmem:[%s14283_s30 + $0xb0] sm:$0xff]  }
0x1387   : > { %v6626_v38 = vadd.f32 %v12995_v30, %v11788_v27  ;;  %v13881_v27 = vld [vmem:[%s14273_s23 + $0xbf8] sm:$0xff]   ;;  %v6944_v35 = vld [vmem:[%s14293_s17 + $0xb0] sm:$0xff] }
0x1388   : > { %v13883_v30 = vld [vmem:[%s14273_s23 + $0xbb8] sm:$0xff]   ;;  %v11944_v37 = vcombine.high %v6944_v35, %v6944_v35 }
0x1389   : > { %v6666_v39 = vadd.f32 %v13017_v31, %v6626_v38  ;;  %v6975_v31 = vcombine.high %v6967_v28, %v6967_v28  ;;  %v13885_v33 = vld [vmem:[%s14283_s30 + $0xb8] sm:$0xff]   ;;  %v11943_v38 = vcombine.low %v6944_v35, %v6944_v35  ;;  %v13900_v35 = vld [vmem:[%s14273_s23 + $0xc10] sm:$0xff]  }
0x138b   : > { %v6671_v59 = vmax.f32 %v6666_v39, 0.0  ;;  %v7332_v39 = vsel %vm928_vm1, %v11943_v38, 0  ;;  %v13902_v38 = vld [vmem:[%s14273_s23 + $0xc58] sm:$0xff]  }
0x138d   : > { %v6672_v41 = vpack.c.bf16 %v6671_v59, %v6671_v59 }
0x138f   : > { %13366 = vmatmul.mubr.msk.bf16.vlgmr.msra.gmra.mrb[104].mxu0 %vm868_vm2, %v6672_v41 }
0x1390   : > { %6834 = vmatprep.mubr.bf16.mxu0 %v14196_v9  ;;  %6803 = vmatpush1.bf16.msra.mxu0 %v6756_v47 }
0x1391   : > { %13046 = vmatprep.subr.bf16.mxu0 %v13853_v48 }
0x1462   : > { %v6728_v53 = vpop.f32.mrb[104].mxu0 }
0x1463   : > { %v6729_v5 = vadd.f32 %v11822_v51, %v6728_v53  ;;  %v13367_v54 = vpop.f32.mrb[105].mxu0 }
0x1464   : > { %v6731_v55 = vpop.f32.mrb[106].mxu0 }
0x1465   : > { %v6734_v57 = vmax.f32 %v6729_v5, 0.0  ;;  %v13368_v58 = vpop.f32.mrb[107].mxu0 }
0x1467   : > { %v6735_v61 = vpack.c.bf16 %v6734_v57, %v6734_v57  ;;  %v11905_v57 = vld [vmem:[%s14278_s26 + $0xb] ss:$0 sm:$0xff] }
0x1469   : > { %11831 = vmatmul.mubr.msk.bf16.vlgmr.msra.gmra.mrb[104].mxu1 %vm924_vm3, %v6735_v61  ;;  %11833 = vmatmul.mubr.msk.bf16.vlgmr.msra.gmra.mrb[108].mxu0 %vm924_vm3, %v6735_v61 }
0x146a   : > { %13025 = vmatpush3.bf16.msra.mxu1 %v13854_v12  ;;  %13047 = vmatpush3.bf16.msra.mxu0 %v13855_v60 }
0x146b   : > { %13026 = vmatprep.subr.bf16.mxu1 %v13856_v62  ;;  %13048 = vmatprep.subr.bf16.mxu0 %v13857_v14 }
0x146c   : > { %7205 = vmatprep.mubr.bf16.mxu1 %v6974_v56  ;;  %7245 = vmatprep.mubr.bf16.mxu0 %v6976_v15 }
0x146e   : > { %13027 = vmatpush3.bf16.msra.mxu1 %v13858_v63  ;;  %13049 = vmatpush3.bf16.msra.mxu0 %v13859_v0 }
0x146f   : > { %13028 = vmatprep.subr.bf16.mxu1 %v13860_v1  ;;  %13050 = vmatprep.subr.bf16.mxu0 %v13861_v2 }
0x1472   : > { %13029 = vmatpush3.bf16.msra.mxu1 %v13862_v3  ;;  %13051 = vmatpush3.bf16.msra.mxu0 %v13863_v6  ;;  %v6945_v3 = vld [vmem:[%s14293_s17 + $0xb8] sm:$0xff] }
0x1473   : > { %13030 = vmatprep.subr.bf16.mxu1 %v13864_v7  ;;  %13052 = vmatprep.subr.bf16.mxu0 %v13865_v8  ;;  %v11946_v6 = vcombine.high %v6945_v3, %v6945_v3  ;;  %v11945_v7 = vcombine.low %v6945_v3, %v6945_v3 }
0x1475   : > { %v7338_v8 = vsel %vm928_vm1, %v11945_v7, 0 }
0x1476   : > { %13031 = vmatpush3.bf16.msra.mxu1 %v13866_v29  ;;  %13053 = vmatpush3.bf16.msra.mxu0 %v13867_v10  ;;  %v13890_v29 = vld [vmem:[%s14273_s23 + $0xc40] sm:$0xff]  }
0x1477   : > { %13032 = vmatprep.subr.bf16.mxu1 %v13868_v11  ;;  %13054 = vmatprep.subr.bf16.mxu0 %v13869_v13  ;;  %v13891_v10 = vld [vmem:[%s14273_s23 + $0xcc0] sm:$0xff]   ;;  %v15067_v11 = vld.sshfl [vmem:[%s14268_s20 + $0x30] sm:$0x33 pattern:$0x75316420] }
0x1478   : > { %v11939_v13 = vld [vmem:[%s14288_s16 + $0xb] ss:$0 sm:$0xff] }
0x147a   : > { %13033 = vmatpush3.bf16.msra.mxu1 %v13870_v17  ;;  %13055 = vmatpush3.bf16.msra.mxu0 %v13871_v18  ;;  %v7542_v17 = vcombine.high %v15067_v11, %v15067_v11 }
0x147b   : > { %13034 = vmatprep.subr.bf16.mxu1 %v13872_v36  ;;  %13056 = vmatprep.subr.bf16.mxu0 %v13873_v19 }
0x147e   : > { %13035 = vmatpush3.bf16.msra.mxu1 %v13874_v20  ;;  %13057 = vmatpush3.bf16.msra.mxu0 %v13875_v21  ;;  %v7556_v21 = vrot.slane %v7542_v17, %v14332_v40 }
0x147f   : > { %13036 = vmatprep.subr.bf16.mxu1 %v13876_v22  ;;  %13058 = vmatprep.subr.bf16.mxu0 %v13877_v23 }
0x1482   : > { %13037 = vmatpush3.bf16.msra.mxu1 %v13878_v43  ;;  %13059 = vmatpush3.bf16.msra.mxu0 %v13879_v25  ;;  %v13892_v43 = vld [vmem:[%s14273_s23 + $0xc00] sm:$0xff]  }
0x1483   : > { %13038 = vmatprep.subr.bf16.mxu1 %v13880_v26  ;;  %13060 = vmatprep.subr.bf16.mxu0 %v13881_v27  ;;  %v13893_v25 = vld [vmem:[%s14273_s23 + $0xc80] sm:$0xff]   ;;  %v13894_v27 = vld [vmem:[%s14273_s23 + $0xc48] sm:$0xff]  }
0x1486   : > { %13039 = vmatpush3.bf16.msra.mxu1 %v13882_v50  ;;  %13061 = vmatpush3.bf16.msra.mxu0 %v13883_v30  ;;  %v7558_v50 = vcombine.high %v7556_v21, %v7556_v21  ;;  %v13896_v30 = vld [vmem:[%s14273_s23 + $0xc08] sm:$0xff]  }
0x1487   : > { %13369 = vmatprep.subr.bf16.mxu1 %v14194_v46  ;;  %11947 = vmatprep.subr.msk.bf16.mxu0 %vm928_vm1, %v11944_v37  ;;  %v13901_v37 = vld [vmem:[%s14273_s23 + $0xc90] sm:$0xff]  }
0x1489   : > { %7206 = vmatmul.mubr.bf16.vlgmr.msra.gmra.mrb[108].mxu1 %v6967_v28  ;;  %7246 = vmatmul.mubr.bf16.vlgmr.msra.gmra.mrb[112].mxu0 %v6975_v31  ;;  %v13895_v28 = vld [vmem:[%s14273_s23 + $0xcc8] sm:$0xff]  }
0x148a   : > { %13373 = vmatprep.mubr.msk.bf16.mxu1 %vm14195_vm0, %v14194_v46  ;;  %7375 = vmatprep.mubr.bf16.mxu0 %v14196_v9  ;;  %v13897_v31 = vld [vmem:[%s14273_s23 + $0xc88] sm:$0xff]  }
0x148b   : > { %13370 = vmatpush3.bf16.msra.mxu1 %v13884_v32  ;;  %7344 = vmatpush1.bf16.msra.mxu0 %v7332_v39  ;;  %v13898_v32 = vld [vmem:[%s14273_s23 + $0xc50] sm:$0xff]   ;;  %v13903_v39 = vld [vmem:[%s14273_s23 + $0xcd8] sm:$0xff]  }
0x148c   : > { %13371 = vmatprep.subr.bf16.mxu1 %v14194_v46  ;;  %13071 = vmatprep.subr.bf16.mxu0 %v13890_v29 }
0x148f   : > { %13372 = vmatpush3.bf16.msra.mxu1 %v13885_v33  ;;  %v13899_v33 = vld [vmem:[%s14273_s23 + $0xcd0] sm:$0xff]  }
0x1490   : > { %11949 = vmatprep.subr.msk.bf16.mxu1 %vm928_vm1, %v11946_v6 }
0x153c   : > { %v6795_v59 = vpop.f32.mrb[104].mxu1  ;;  %v6836_v41 = vpop.f32.mrb[108].mxu0 }
0x153d   : > { %v6797_v42 = vpop.f32.mrb[105].mxu1  ;;  %v6838_v44 = vpop.f32.mrb[109].mxu0 }
0x153e   : > { %v6847_v45 = vcombine.low %v6795_v59, %v6797_v42  ;;  %v6848_v47 = vcombine.low %v6836_v41, %v6838_v44  ;;  %v6799_v16 = vpop.f32.mrb[106].mxu1  ;;  %v6840_v48 = vpop.f32.mrb[110].mxu0  ;;  %v13904_v59 = vld [vmem:[%s14273_s23 + $0xc18] sm:$0xff]   ;;  %v13906_v42 = vld [vmem:[%s14273_s23 + $0xc60] sm:$0xff]  }
0x153f   : > { %v6800_v49 = vpop.f32.mrb[107].mxu1  ;;  %v6841_v51 = vpop.f32.mrb[111].mxu0  ;;  %v13905_v41 = vld [vmem:[%s14273_s23 + $0xc98] sm:$0xff]   ;;  %v13907_v44 = vld [vmem:[%s14273_s23 + $0xce0] sm:$0xff]   ;;  %v13910_v16 = vld [vmem:[%s14273_s23 + $0xc68] sm:$0xff]  }
0x1540   : > { %v6855_v52 = vrot.slane %v6847_v45, %v14406_v4  ;;  %v6862_v53 = vrot.slane %v6848_v47, %v14406_v4  ;;  %v13908_v45 = vld [vmem:[%s14273_s23 + $0xc20] sm:$0xff]   ;;  %v13911_v48 = vld [vmem:[%s14273_s23 + $0xce8] sm:$0xff]  }
0x1541   : > { %v13909_v47 = vld [vmem:[%s14273_s23 + $0xca0] sm:$0xff]   ;;  %v13912_v49 = vld [vmem:[%s14273_s23 + $0xc28] sm:$0xff]  }
0x1542   : > { %v6863_v5 = vcombine.low %v6855_v52, %v6862_v53  ;;  %v13913_v51 = vld [vmem:[%s14273_s23 + $0xca8] sm:$0xff]   ;;  %v13914_v52 = vld [vmem:[%s14273_s23 + $0xc70] sm:$0xff]  }
0x1543   : > { %v13915_v53 = vld [vmem:[%s14273_s23 + $0xcf0] sm:$0xff]  }
0x1544   : > { %v15056_v54 = vadd.f32 %v6863_v5, %v14992_v24  ;;  %v13916_v5 = vld [vmem:[%s14273_s23 + $0xc30] sm:$0xff]  }
0x155c   : > { %v13040_v55 = vpop.f32.mrb[108].mxu1  ;;  %v13062_v56 = vpop.f32.mrb[112].mxu0 }
0x155d   : > { %v13041_v58 = vpop.f32.mrb[109].mxu1  ;;  %v13063_v12 = vpop.f32.mrb[113].mxu0 }
0x155e   : > { %v13042_v60 = vadd.f32 %v13041_v58, %v13040_v55  ;;  %v13064_v61 = vadd.f32 %v13063_v12, %v13062_v56  ;;  %v13043_v62 = vpop.f32.mrb[110].mxu1  ;;  %v13065_v14 = vpop.f32.mrb[114].mxu0  ;;  %v13917_v55 = vld [vmem:[%s14273_s23 + $0xcb0] sm:$0xff]   ;;  %v13918_v56 = vld [vmem:[%s14273_s23 + $0xc78] sm:$0xff]   ;;  %v7549_v58 = vrot.slane %v15067_v11, %v14332_v40 }
0x155f   : > { %v13044_v15 = vpop.f32.mrb[111].mxu1  ;;  %v13066_v63 = vpop.f32.mrb[115].mxu0  ;;  %v13920_v12 = vld [vmem:[%s14273_s23 + $0xc38] sm:$0xff]   ;;  %v13922_v62 = vld [vmem:[%s14283_s30 + $0xc0] sm:$0xff]   ;;  %v13923_v14 = vld [vmem:[%s14283_s30 + $0xc8] sm:$0xff]  }
0x1560   : > { %v7208_v0 = vadd.f32 %v13042_v60, %v11905_v57  ;;  %v13919_v57 = vld [vmem:[%s14273_s23 + $0xcf8] sm:$0xff]   ;;  %v7526_v15 = vld [vmem:[%s14293_s17 + $0xc0] sm:$0xff] }
0x1561   : > { %v13921_v60 = vld [vmem:[%s14273_s23 + $0xcb8] sm:$0xff]   ;;  %v12061_v63 = vcombine.high %v7526_v15, %v7526_v15 }
0x1562   : > { %v7248_v1 = vadd.f32 %v13064_v61, %v7208_v0  ;;  %v7557_v61 = vcombine.high %v7549_v58, %v7549_v58  ;;  %v12060_v0 = vcombine.low %v7526_v15, %v7526_v15  ;;  %v13938_v15 = vld [vmem:[%s14273_s23 + $0xd10] sm:$0xff]  }
0x1564   : > { %v7253_v24 = vmax.f32 %v7248_v1, 0.0  ;;  %v7914_v1 = vsel %vm928_vm1, %v12060_v0, 0  ;;  %v13940_v0 = vld [vmem:[%s14273_s23 + $0xd58] sm:$0xff]  }
0x1566   : > { %v7254_v2 = vpack.c.bf16 %v7253_v24, %v7253_v24 }
0x1568   : > { %13374 = vmatmul.mubr.msk.bf16.vlgmr.msra.gmra.mrb[112].mxu1 %vm868_vm2, %v7254_v2 }
0x1569   : > { %7416 = vmatprep.mubr.bf16.mxu1 %v14196_v9  ;;  %7385 = vmatpush1.bf16.msra.mxu1 %v7338_v8 }
0x156a   : > { %13093 = vmatprep.subr.bf16.mxu1 %v13891_v10 }
0x163b   : > { %v7310_v18 = vpop.f32.mrb[112].mxu1 }
0x163c   : > { %v7311_v36 = vadd.f32 %v11939_v13, %v7310_v18  ;;  %v13375_v19 = vpop.f32.mrb[113].mxu1 }
0x163d   : > { %v7313_v20 = vpop.f32.mrb[114].mxu1 }
0x163e   : > { %v7316_v22 = vmax.f32 %v7311_v36, 0.0  ;;  %v13376_v23 = vpop.f32.mrb[115].mxu1 }
0x1640   : > { %v7317_v26 = vpack.c.bf16 %v7316_v22, %v7316_v22  ;;  %v12022_v22 = vld [vmem:[%s14278_s26 + $0xc] ss:$0 sm:$0xff] }
0x1642   : > { %11948 = vmatmul.mubr.msk.bf16.vlgmr.msra.gmra.mrb[116].mxu0 %vm924_vm3, %v7317_v26  ;;  %11950 = vmatmul.mubr.msk.bf16.vlgmr.msra.gmra.mrb[116].mxu1 %vm924_vm3, %v7317_v26 }
0x1643   : > { %13072 = vmatpush3.bf16.msra.mxu0 %v13892_v43  ;;  %13094 = vmatpush3.bf16.msra.mxu1 %v13893_v25 }
0x1644   : > { %13073 = vmatprep.subr.bf16.mxu0 %v13894_v27  ;;  %13095 = vmatprep.subr.bf16.mxu1 %v13895_v28 }
0x1645   : > { %7787 = vmatprep.mubr.bf16.mxu0 %v7556_v21  ;;  %7827 = vmatprep.mubr.bf16.mxu1 %v7558_v50 }
0x1647   : > { %13074 = vmatpush3.bf16.msra.mxu0 %v13896_v30  ;;  %13096 = vmatpush3.bf16.msra.mxu1 %v13897_v31 }
0x1648   : > { %13075 = vmatprep.subr.bf16.mxu0 %v13898_v32  ;;  %13097 = vmatprep.subr.bf16.mxu1 %v13899_v33 }
0x164b   : > { %13076 = vmatpush3.bf16.msra.mxu0 %v13900_v35  ;;  %13098 = vmatpush3.bf16.msra.mxu1 %v13901_v37  ;;  %v7527_v35 = vld [vmem:[%s14293_s17 + $0xc8] sm:$0xff] }
0x164c   : > { %13077 = vmatprep.subr.bf16.mxu0 %v13902_v38  ;;  %13099 = vmatprep.subr.bf16.mxu1 %v13903_v39  ;;  %v12063_v37 = vcombine.high %v7527_v35, %v7527_v35  ;;  %v12062_v38 = vcombine.low %v7527_v35, %v7527_v35 }
0x164e   : > { %v7920_v39 = vsel %vm928_vm1, %v12062_v38, 0 }
0x164f   : > { %13078 = vmatpush3.bf16.msra.mxu0 %v13904_v59  ;;  %13100 = vmatpush3.bf16.msra.mxu1 %v13905_v41  ;;  %v13928_v59 = vld [vmem:[%s14273_s23 + $0xd40] sm:$0xff]  }
0x1650   : > { %13079 = vmatprep.subr.bf16.mxu0 %v13906_v42  ;;  %13101 = vmatprep.subr.bf16.mxu1 %v13907_v44  ;;  %v13929_v41 = vld [vmem:[%s14273_s23 + $0xdc0] sm:$0xff]   ;;  %v15131_v42 = vld.sshfl [vmem:[%s14268_s20 + $0x34] sm:$0x33 pattern:$0x75316420] }
0x1651   : > { %v12056_v44 = vld [vmem:[%s14288_s16 + $0xc] ss:$0 sm:$0xff] }
0x1653   : > { %13080 = vmatpush3.bf16.msra.mxu0 %v13908_v45  ;;  %13102 = vmatpush3.bf16.msra.mxu1 %v13909_v47  ;;  %v8124_v45 = vcombine.high %v15131_v42, %v15131_v42 }
0x1654   : > { %13081 = vmatprep.subr.bf16.mxu0 %v13910_v16  ;;  %13103 = vmatprep.subr.bf16.mxu1 %v13911_v48 }
0x1657   : > { %13082 = vmatpush3.bf16.msra.mxu0 %v13912_v49  ;;  %13104 = vmatpush3.bf16.msra.mxu1 %v13913_v51  ;;  %v8138_v51 = vrot.slane %v8124_v45, %v14332_v40 }
0x1658   : > { %13083 = vmatprep.subr.bf16.mxu0 %v13914_v52  ;;  %13105 = vmatprep.subr.bf16.mxu1 %v13915_v53 }
0x165b   : > { %13084 = vmatpush3.bf16.msra.mxu0 %v13916_v5  ;;  %13106 = vmatpush3.bf16.msra.mxu1 %v13917_v55  ;;  %v13930_v5 = vld [vmem:[%s14273_s23 + $0xd00] sm:$0xff]  }
0x165c   : > { %13085 = vmatprep.subr.bf16.mxu0 %v13918_v56  ;;  %13107 = vmatprep.subr.bf16.mxu1 %v13919_v57  ;;  %v13931_v55 = vld [vmem:[%s14273_s23 + $0xd80] sm:$0xff]   ;;  %v13932_v57 = vld [vmem:[%s14273_s23 + $0xd48] sm:$0xff]  }
0x165f   : > { %13086 = vmatpush3.bf16.msra.mxu0 %v13920_v12  ;;  %13108 = vmatpush3.bf16.msra.mxu1 %v13921_v60  ;;  %v8140_v12 = vcombine.high %v8138_v51, %v8138_v51  ;;  %v13934_v60 = vld [vmem:[%s14273_s23 + $0xd08] sm:$0xff]  }
0x1660   : > { %13377 = vmatprep.subr.bf16.mxu0 %v14194_v46  ;;  %12064 = vmatprep.subr.msk.bf16.mxu1 %vm928_vm1, %v12061_v63  ;;  %v13939_v63 = vld [vmem:[%s14273_s23 + $0xd90] sm:$0xff]  }
0x1662   : > { %7788 = vmatmul.mubr.bf16.vlgmr.msra.gmra.mrb[120].mxu0 %v7549_v58  ;;  %7828 = vmatmul.mubr.bf16.vlgmr.msra.gmra.mrb[120].mxu1 %v7557_v61  ;;  %v13933_v58 = vld [vmem:[%s14273_s23 + $0xdc8] sm:$0xff]  }
0x1663   : > { %13381 = vmatprep.mubr.msk.bf16.mxu0 %vm14195_vm0, %v14194_v46  ;;  %7957 = vmatprep.mubr.bf16.mxu1 %v14196_v9  ;;  %v13935_v61 = vld [vmem:[%s14273_s23 + $0xd88] sm:$0xff]  }
0x1664   : > { %13378 = vmatpush3.bf16.msra.mxu0 %v13922_v62  ;;  %7926 = vmatpush1.bf16.msra.mxu1 %v7914_v1  ;;  %v13936_v62 = vld [vmem:[%s14273_s23 + $0xd50] sm:$0xff]   ;;  %v13941_v1 = vld [vmem:[%s14273_s23 + $0xdd8] sm:$0xff]  }
0x1665   : > { %13379 = vmatprep.subr.bf16.mxu0 %v14194_v46  ;;  %13118 = vmatprep.subr.bf16.mxu1 %v13928_v59 }
0x1668   : > { %13380 = vmatpush3.bf16.msra.mxu0 %v13923_v14  ;;  %v13937_v14 = vld [vmem:[%s14273_s23 + $0xdd0] sm:$0xff]  }
0x1669   : > { %12066 = vmatprep.subr.msk.bf16.mxu0 %vm928_vm1, %v12063_v37 }
0x1715   : > { %v7377_v24 = vpop.f32.mrb[116].mxu0  ;;  %v7418_v2 = vpop.f32.mrb[116].mxu1 }
0x1716   : > { %v7379_v3 = vpop.f32.mrb[117].mxu0  ;;  %v7420_v6 = vpop.f32.mrb[117].mxu1 }
0x1717   : > { %v7429_v7 = vcombine.low %v7377_v24, %v7379_v3  ;;  %v7430_v8 = vcombine.low %v7418_v2, %v7420_v6  ;;  %v7381_v29 = vpop.f32.mrb[118].mxu0  ;;  %v7422_v10 = vpop.f32.mrb[118].mxu1  ;;  %v13942_v24 = vld [vmem:[%s14273_s23 + $0xd18] sm:$0xff]   ;;  %v13944_v3 = vld [vmem:[%s14273_s23 + $0xd60] sm:$0xff]  }
0x1718   : > { %v7382_v11 = vpop.f32.mrb[119].mxu0  ;;  %v7423_v13 = vpop.f32.mrb[119].mxu1  ;;  %v13943_v2 = vld [vmem:[%s14273_s23 + $0xd98] sm:$0xff]   ;;  %v13945_v6 = vld [vmem:[%s14273_s23 + $0xde0] sm:$0xff]   ;;  %v13948_v29 = vld [vmem:[%s14273_s23 + $0xd68] sm:$0xff]  }
0x1719   : > { %v7437_v17 = vrot.slane %v7429_v7, %v14406_v4  ;;  %v7444_v18 = vrot.slane %v7430_v8, %v14406_v4  ;;  %v13946_v7 = vld [vmem:[%s14273_s23 + $0xd20] sm:$0xff]   ;;  %v13949_v10 = vld [vmem:[%s14273_s23 + $0xde8] sm:$0xff]  }
0x171a   : > { %v13947_v8 = vld [vmem:[%s14273_s23 + $0xda0] sm:$0xff]   ;;  %v13950_v11 = vld [vmem:[%s14273_s23 + $0xd28] sm:$0xff]  }
0x171b   : > { %v7445_v36 = vcombine.low %v7437_v17, %v7444_v18  ;;  %v13951_v13 = vld [vmem:[%s14273_s23 + $0xda8] sm:$0xff]   ;;  %v13952_v17 = vld [vmem:[%s14273_s23 + $0xd70] sm:$0xff]  }
0x171c   : > { %v13953_v18 = vld [vmem:[%s14273_s23 + $0xdf0] sm:$0xff]  }
0x171d   : > { %v15120_v19 = vadd.f32 %v7445_v36, %v15056_v54  ;;  %v13954_v36 = vld [vmem:[%s14273_s23 + $0xd30] sm:$0xff]  }
0x1735   : > { %v13087_v20 = vpop.f32.mrb[120].mxu0  ;;  %v13109_v21 = vpop.f32.mrb[120].mxu1 }
0x1736   : > { %v13088_v23 = vpop.f32.mrb[121].mxu0  ;;  %v13110_v43 = vpop.f32.mrb[121].mxu1 }
0x1737   : > { %v13089_v25 = vadd.f32 %v13088_v23, %v13087_v20  ;;  %v13111_v26 = vadd.f32 %v13110_v43, %v13109_v21  ;;  %v13090_v27 = vpop.f32.mrb[122].mxu0  ;;  %v13112_v28 = vpop.f32.mrb[122].mxu1  ;;  %v13955_v20 = vld [vmem:[%s14273_s23 + $0xdb0] sm:$0xff]   ;;  %v13956_v21 = vld [vmem:[%s14273_s23 + $0xd78] sm:$0xff]   ;;  %v8131_v23 = vrot.slane %v15131_v42, %v14332_v40 }
0x1738   : > { %v13091_v50 = vpop.f32.mrb[123].mxu0  ;;  %v13113_v30 = vpop.f32.mrb[123].mxu1  ;;  %v13958_v43 = vld [vmem:[%s14273_s23 + $0xd38] sm:$0xff]   ;;  %v13960_v27 = vld [vmem:[%s14283_s30 + $0xd0] sm:$0xff]  }
0x1739   : > { %v7790_v31 = vadd.f32 %v13089_v25, %v12022_v22  ;;  %v13957_v22 = vld [vmem:[%s14273_s23 + $0xdf8] sm:$0xff]   ;;  %v8108_v50 = vld [vmem:[%s14293_s17 + $0xd0] sm:$0xff] }
0x173a   : > { %v13959_v25 = vld [vmem:[%s14273_s23 + $0xdb8] sm:$0xff]   ;;  %v12178_v30 = vcombine.high %v8108_v50, %v8108_v50 }
0x173b   : > { %v7830_v32 = vadd.f32 %v13111_v26, %v7790_v31  ;;  %v8139_v26 = vcombine.high %v8131_v23, %v8131_v23  ;;  %v13961_v28 = vld [vmem:[%s14283_s30 + $0xd8] sm:$0xff]   ;;  %v12177_v31 = vcombine.low %v8108_v50, %v8108_v50  ;;  %v13976_v50 = vld [vmem:[%s14273_s23 + $0xe10] sm:$0xff]  }
0x173d   : > { %v7835_v54 = vmax.f32 %v7830_v32, 0.0  ;;  %v8496_v32 = vsel %vm928_vm1, %v12177_v31, 0  ;;  %v13978_v31 = vld [vmem:[%s14273_s23 + $0xe58] sm:$0xff]  }
0x173f   : > { %v7836_v33 = vpack.c.bf16 %v7835_v54, %v7835_v54 }
0x1741   : > { %13382 = vmatmul.mubr.msk.bf16.vlgmr.msra.gmra.mrb[124].mxu0 %vm868_vm2, %v7836_v33 }
0x1742   : > { %7998 = vmatprep.mubr.bf16.mxu0 %v14196_v9  ;;  %7967 = vmatpush1.bf16.msra.mxu0 %v7920_v39 }
0x1743   : > { %13140 = vmatprep.subr.bf16.mxu0 %v13929_v41 }
0x1814   : > { %v7892_v47 = vpop.f32.mrb[124].mxu0 }
0x1815   : > { %v7893_v16 = vadd.f32 %v12056_v44, %v7892_v47  ;;  %v13383_v48 = vpop.f32.mrb[125].mxu0 }
0x1816   : > { %v7895_v49 = vpop.f32.mrb[126].mxu0 }
0x1817   : > { %v7898_v52 = vmax.f32 %v7893_v16, 0.0  ;;  %v13384_v53 = vpop.f32.mrb[127].mxu0 }
0x1819   : > { %v7899_v56 = vpack.c.bf16 %v7898_v52, %v7898_v52  ;;  %v12139_v52 = vld [vmem:[%s14278_s26 + $0xd] ss:$0 sm:$0xff] }
0x181b   : > { %12065 = vmatmul.mubr.msk.bf16.vlgmr.msra.gmra.mrb[124].mxu1 %vm924_vm3, %v7899_v56  ;;  %12067 = vmatmul.mubr.msk.bf16.vlgmr.msra.gmra.mrb[128].mxu0 %vm924_vm3, %v7899_v56 }
0x181c   : > { %13119 = vmatpush3.bf16.msra.mxu1 %v13930_v5  ;;  %13141 = vmatpush3.bf16.msra.mxu0 %v13931_v55 }
0x181d   : > { %13120 = vmatprep.subr.bf16.mxu1 %v13932_v57  ;;  %13142 = vmatprep.subr.bf16.mxu0 %v13933_v58 }
0x181e   : > { %8369 = vmatprep.mubr.bf16.mxu1 %v8138_v51  ;;  %8409 = vmatprep.mubr.bf16.mxu0 %v8140_v12 }
0x1820   : > { %13121 = vmatpush3.bf16.msra.mxu1 %v13934_v60  ;;  %13143 = vmatpush3.bf16.msra.mxu0 %v13935_v61 }
0x1821   : > { %13122 = vmatprep.subr.bf16.mxu1 %v13936_v62  ;;  %13144 = vmatprep.subr.bf16.mxu0 %v13937_v14 }
0x1824   : > { %13123 = vmatpush3.bf16.msra.mxu1 %v13938_v15  ;;  %13145 = vmatpush3.bf16.msra.mxu0 %v13939_v63  ;;  %v8109_v15 = vld [vmem:[%s14293_s17 + $0xd8] sm:$0xff] }
0x1825   : > { %13124 = vmatprep.subr.bf16.mxu1 %v13940_v0  ;;  %13146 = vmatprep.subr.bf16.mxu0 %v13941_v1  ;;  %v12180_v63 = vcombine.high %v8109_v15, %v8109_v15  ;;  %v12179_v0 = vcombine.low %v8109_v15, %v8109_v15 }
0x1827   : > { %v8502_v1 = vsel %vm928_vm1, %v12179_v0, 0 }
0x1828   : > { %13125 = vmatpush3.bf16.msra.mxu1 %v13942_v24  ;;  %13147 = vmatpush3.bf16.msra.mxu0 %v13943_v2  ;;  %v13966_v24 = vld [vmem:[%s14273_s23 + $0xe40] sm:$0xff]  }
0x1829   : > { %13126 = vmatprep.subr.bf16.mxu1 %v13944_v3  ;;  %13148 = vmatprep.subr.bf16.mxu0 %v13945_v6  ;;  %v13967_v2 = vld [vmem:[%s14273_s23 + $0xec0] sm:$0xff]   ;;  %v15195_v3 = vld.sshfl [vmem:[%s14268_s20 + $0x38] sm:$0x33 pattern:$0x75316420] }
0x182a   : > { %v12173_v6 = vld [vmem:[%s14288_s16 + $0xd] ss:$0 sm:$0xff] }
0x182c   : > { %13127 = vmatpush3.bf16.msra.mxu1 %v13946_v7  ;;  %13149 = vmatpush3.bf16.msra.mxu0 %v13947_v8  ;;  %v8706_v7 = vcombine.high %v15195_v3, %v15195_v3 }
0x182d   : > { %13128 = vmatprep.subr.bf16.mxu1 %v13948_v29  ;;  %13150 = vmatprep.subr.bf16.mxu0 %v13949_v10 }
0x1830   : > { %13129 = vmatpush3.bf16.msra.mxu1 %v13950_v11  ;;  %13151 = vmatpush3.bf16.msra.mxu0 %v13951_v13  ;;  %v8720_v13 = vrot.slane %v8706_v7, %v14332_v40 }
0x1831   : > { %13130 = vmatprep.subr.bf16.mxu1 %v13952_v17  ;;  %13152 = vmatprep.subr.bf16.mxu0 %v13953_v18 }
0x1834   : > { %13131 = vmatpush3.bf16.msra.mxu1 %v13954_v36  ;;  %13153 = vmatpush3.bf16.msra.mxu0 %v13955_v20  ;;  %v13968_v36 = vld [vmem:[%s14273_s23 + $0xe00] sm:$0xff]  }
0x1835   : > { %13132 = vmatprep.subr.bf16.mxu1 %v13956_v21  ;;  %13154 = vmatprep.subr.bf16.mxu0 %v13957_v22  ;;  %v13969_v20 = vld [vmem:[%s14273_s23 + $0xe80] sm:$0xff]   ;;  %v13970_v22 = vld [vmem:[%s14273_s23 + $0xe48] sm:$0xff]  }
0x1838   : > { %13133 = vmatpush3.bf16.msra.mxu1 %v13958_v43  ;;  %13155 = vmatpush3.bf16.msra.mxu0 %v13959_v25  ;;  %v8722_v43 = vcombine.high %v8720_v13, %v8720_v13  ;;  %v13972_v25 = vld [vmem:[%s14273_s23 + $0xe08] sm:$0xff]  }
0x1839   : > { %13385 = vmatprep.subr.bf16.mxu1 %v14194_v46  ;;  %12181 = vmatprep.subr.msk.bf16.mxu0 %vm928_vm1, %v12178_v30  ;;  %v13977_v30 = vld [vmem:[%s14273_s23 + $0xe90] sm:$0xff]  }
0x183b   : > { %8370 = vmatmul.mubr.bf16.vlgmr.msra.gmra.mrb[128].mxu1 %v8131_v23  ;;  %8410 = vmatmul.mubr.bf16.vlgmr.msra.gmra.mrb[132].mxu0 %v8139_v26  ;;  %v13971_v23 = vld [vmem:[%s14273_s23 + $0xec8] sm:$0xff]  }
0x183c   : > { %13389 = vmatprep.mubr.msk.bf16.mxu1 %vm14195_vm0, %v14194_v46  ;;  %8539 = vmatprep.mubr.bf16.mxu0 %v14196_v9  ;;  %v13973_v26 = vld [vmem:[%s14273_s23 + $0xe88] sm:$0xff]  }
0x183d   : > { %13386 = vmatpush3.bf16.msra.mxu1 %v13960_v27  ;;  %8508 = vmatpush1.bf16.msra.mxu0 %v8496_v32  ;;  %v13974_v27 = vld [vmem:[%s14273_s23 + $0xe50] sm:$0xff]   ;;  %v13979_v32 = vld [vmem:[%s14273_s23 + $0xed8] sm:$0xff]  }
0x183e   : > { %13387 = vmatprep.subr.bf16.mxu1 %v14194_v46  ;;  %13165 = vmatprep.subr.bf16.mxu0 %v13966_v24 }
0x1841   : > { %13388 = vmatpush3.bf16.msra.mxu1 %v13961_v28  ;;  %v13975_v28 = vld [vmem:[%s14273_s23 + $0xed0] sm:$0xff]  }
0x1842   : > { %12183 = vmatprep.subr.msk.bf16.mxu1 %vm928_vm1, %v12180_v63 }
0x18ee   : > { %v7959_v54 = vpop.f32.mrb[124].mxu1  ;;  %v8000_v33 = vpop.f32.mrb[128].mxu0 }
0x18ef   : > { %v7961_v35 = vpop.f32.mrb[125].mxu1  ;;  %v8002_v37 = vpop.f32.mrb[129].mxu0 }
0x18f0   : > { %v8011_v38 = vcombine.low %v7959_v54, %v7961_v35  ;;  %v8012_v39 = vcombine.low %v8000_v33, %v8002_v37  ;;  %v7963_v59 = vpop.f32.mrb[126].mxu1  ;;  %v8004_v41 = vpop.f32.mrb[130].mxu0  ;;  %v13980_v54 = vld [vmem:[%s14273_s23 + $0xe18] sm:$0xff]   ;;  %v13982_v35 = vld [vmem:[%s14273_s23 + $0xe60] sm:$0xff]  }
0x18f1   : > { %v7964_v42 = vpop.f32.mrb[127].mxu1  ;;  %v8005_v44 = vpop.f32.mrb[131].mxu0  ;;  %v13981_v33 = vld [vmem:[%s14273_s23 + $0xe98] sm:$0xff]   ;;  %v13983_v37 = vld [vmem:[%s14273_s23 + $0xee0] sm:$0xff]   ;;  %v13986_v59 = vld [vmem:[%s14273_s23 + $0xe68] sm:$0xff]  }
0x18f2   : > { %v8019_v45 = vrot.slane %v8011_v38, %v14406_v4  ;;  %v8026_v47 = vrot.slane %v8012_v39, %v14406_v4  ;;  %v13984_v38 = vld [vmem:[%s14273_s23 + $0xe20] sm:$0xff]   ;;  %v13987_v41 = vld [vmem:[%s14273_s23 + $0xee8] sm:$0xff]  }
0x18f3   : > { %v13985_v39 = vld [vmem:[%s14273_s23 + $0xea0] sm:$0xff]   ;;  %v13988_v42 = vld [vmem:[%s14273_s23 + $0xe28] sm:$0xff]  }
0x18f4   : > { %v8027_v16 = vcombine.low %v8019_v45, %v8026_v47  ;;  %v13989_v44 = vld [vmem:[%s14273_s23 + $0xea8] sm:$0xff]   ;;  %v13990_v45 = vld [vmem:[%s14273_s23 + $0xe70] sm:$0xff]  }
0x18f5   : > { %v13991_v47 = vld [vmem:[%s14273_s23 + $0xef0] sm:$0xff]  }
0x18f6   : > { %v15184_v48 = vadd.f32 %v8027_v16, %v15120_v19  ;;  %v13992_v16 = vld [vmem:[%s14273_s23 + $0xe30] sm:$0xff]  }
0x190e   : > { %v13134_v49 = vpop.f32.mrb[128].mxu1  ;;  %v13156_v51 = vpop.f32.mrb[132].mxu0 }
0x190f   : > { %v13135_v53 = vpop.f32.mrb[129].mxu1  ;;  %v13157_v5 = vpop.f32.mrb[133].mxu0 }
0x1910   : > { %v13136_v55 = vadd.f32 %v13135_v53, %v13134_v49  ;;  %v13158_v56 = vadd.f32 %v13157_v5, %v13156_v51  ;;  %v13137_v57 = vpop.f32.mrb[130].mxu1  ;;  %v13159_v58 = vpop.f32.mrb[134].mxu0  ;;  %v13993_v49 = vld [vmem:[%s14273_s23 + $0xeb0] sm:$0xff]   ;;  %v13994_v51 = vld [vmem:[%s14273_s23 + $0xe78] sm:$0xff]   ;;  %v8713_v53 = vrot.slane %v15195_v3, %v14332_v40 }
0x1911   : > { %v13138_v12 = vpop.f32.mrb[131].mxu1  ;;  %v13160_v60 = vpop.f32.mrb[135].mxu0  ;;  %v13996_v5 = vld [vmem:[%s14273_s23 + $0xe38] sm:$0xff]   ;;  %v13998_v57 = vld [vmem:[%s14283_s30 + $0xe0] sm:$0xff]   ;;  %v13999_v58 = vld [vmem:[%s14283_s30 + $0xe8] sm:$0xff]  }
0x1912   : > { %v8372_v61 = vadd.f32 %v13136_v55, %v12139_v52  ;;  %v13995_v52 = vld [vmem:[%s14273_s23 + $0xef8] sm:$0xff]   ;;  %v8690_v12 = vld [vmem:[%s14293_s17 + $0xe0] sm:$0xff] }
0x1913   : > { %v13997_v55 = vld [vmem:[%s14273_s23 + $0xeb8] sm:$0xff]   ;;  %v12295_v60 = vcombine.high %v8690_v12, %v8690_v12 }
0x1914   : > { %v8412_v62 = vadd.f32 %v13158_v56, %v8372_v61  ;;  %v8721_v56 = vcombine.high %v8713_v53, %v8713_v53  ;;  %v12294_v61 = vcombine.low %v8690_v12, %v8690_v12  ;;  %v14014_v12 = vld [vmem:[%s14273_s23 + $0xf10] sm:$0xff]  }
0x1916   : > { %v8417_v19 = vmax.f32 %v8412_v62, 0.0  ;;  %v9078_v62 = vsel %vm928_vm1, %v12294_v61, 0  ;;  %v14016_v61 = vld [vmem:[%s14273_s23 + $0xf58] sm:$0xff]  }
0x1918   : > { %v8418_v14 = vpack.c.bf16 %v8417_v19, %v8417_v19 }
0x191a   : > { %13390 = vmatmul.mubr.msk.bf16.vlgmr.msra.gmra.mrb[132].mxu1 %vm868_vm2, %v8418_v14 }
0x191b   : > { %8580 = vmatprep.mubr.bf16.mxu1 %v14196_v9  ;;  %8549 = vmatpush1.bf16.msra.mxu1 %v8502_v1 }
0x191c   : > { %13187 = vmatprep.subr.bf16.mxu1 %v13967_v2 }
0x19ed   : > { %v8474_v8 = vpop.f32.mrb[132].mxu1 }
0x19ee   : > { %v8475_v29 = vadd.f32 %v12173_v6, %v8474_v8  ;;  %v13391_v10 = vpop.f32.mrb[133].mxu1 }
0x19ef   : > { %v8477_v11 = vpop.f32.mrb[134].mxu1 }
0x19f0   : > { %v8480_v17 = vmax.f32 %v8475_v29, 0.0  ;;  %v13392_v18 = vpop.f32.mrb[135].mxu1 }
0x19f2   : > { %v8481_v21 = vpack.c.bf16 %v8480_v17, %v8480_v17  ;;  %v12256_v17 = vld [vmem:[%s14278_s26 + $0xe] ss:$0 sm:$0xff] }
0x19f4   : > { %12182 = vmatmul.mubr.msk.bf16.vlgmr.msra.gmra.mrb[136].mxu0 %vm924_vm3, %v8481_v21  ;;  %12184 = vmatmul.mubr.msk.bf16.vlgmr.msra.gmra.mrb[136].mxu1 %vm924_vm3, %v8481_v21 }
0x19f5   : > { %13166 = vmatpush3.bf16.msra.mxu0 %v13968_v36  ;;  %13188 = vmatpush3.bf16.msra.mxu1 %v13969_v20 }
0x19f6   : > { %13167 = vmatprep.subr.bf16.mxu0 %v13970_v22  ;;  %13189 = vmatprep.subr.bf16.mxu1 %v13971_v23 }
0x19f7   : > { %8951 = vmatprep.mubr.bf16.mxu0 %v8720_v13  ;;  %8991 = vmatprep.mubr.bf16.mxu1 %v8722_v43 }
0x19f9   : > { %13168 = vmatpush3.bf16.msra.mxu0 %v13972_v25  ;;  %13190 = vmatpush3.bf16.msra.mxu1 %v13973_v26 }
0x19fa   : > { %13169 = vmatprep.subr.bf16.mxu0 %v13974_v27  ;;  %13191 = vmatprep.subr.bf16.mxu1 %v13975_v28 }
0x19fd   : > { %13170 = vmatpush3.bf16.msra.mxu0 %v13976_v50  ;;  %13192 = vmatpush3.bf16.msra.mxu1 %v13977_v30  ;;  %v8691_v50 = vld [vmem:[%s14293_s17 + $0xe8] sm:$0xff] }
0x19fe   : > { %13171 = vmatprep.subr.bf16.mxu0 %v13978_v31  ;;  %13193 = vmatprep.subr.bf16.mxu1 %v13979_v32  ;;  %v12297_v30 = vcombine.high %v8691_v50, %v8691_v50  ;;  %v12296_v31 = vcombine.low %v8691_v50, %v8691_v50 }
0x1a00   : > { %v9084_v32 = vsel %vm928_vm1, %v12296_v31, 0 }
0x1a01   : > { %13172 = vmatpush3.bf16.msra.mxu0 %v13980_v54  ;;  %13194 = vmatpush3.bf16.msra.mxu1 %v13981_v33  ;;  %v14004_v54 = vld [vmem:[%s14273_s23 + $0xf40] sm:$0xff]  }
0x1a02   : > { %13173 = vmatprep.subr.bf16.mxu0 %v13982_v35  ;;  %13195 = vmatprep.subr.bf16.mxu1 %v13983_v37  ;;  %v14005_v33 = vld [vmem:[%s14273_s23 + $0xfc0] sm:$0xff]   ;;  %v15259_v35 = vld.sshfl [vmem:[%s14268_s20 + $0x3c] sm:$0x33 pattern:$0x75316420] }
0x1a03   : > { %v12290_v37 = vld [vmem:[%s14288_s16 + $0xe] ss:$0 sm:$0xff] }
0x1a05   : > { %13174 = vmatpush3.bf16.msra.mxu0 %v13984_v38  ;;  %13196 = vmatpush3.bf16.msra.mxu1 %v13985_v39  ;;  %v9288_v38 = vcombine.high %v15259_v35, %v15259_v35 }
0x1a06   : > { %13175 = vmatprep.subr.bf16.mxu0 %v13986_v59  ;;  %13197 = vmatprep.subr.bf16.mxu1 %v13987_v41 }
0x1a09   : > { %13176 = vmatpush3.bf16.msra.mxu0 %v13988_v42  ;;  %13198 = vmatpush3.bf16.msra.mxu1 %v13989_v44  ;;  %v9302_v44 = vrot.slane %v9288_v38, %v14332_v40 }
0x1a0a   : > { %13177 = vmatprep.subr.bf16.mxu0 %v13990_v45  ;;  %13199 = vmatprep.subr.bf16.mxu1 %v13991_v47 }
0x1a0d   : > { %13178 = vmatpush3.bf16.msra.mxu0 %v13992_v16  ;;  %13200 = vmatpush3.bf16.msra.mxu1 %v13993_v49  ;;  %v14006_v16 = vld [vmem:[%s14273_s23 + $0xf00] sm:$0xff]  }
0x1a0e   : > { %13179 = vmatprep.subr.bf16.mxu0 %v13994_v51  ;;  %13201 = vmatprep.subr.bf16.mxu1 %v13995_v52  ;;  %v14007_v49 = vld [vmem:[%s14273_s23 + $0xf80] sm:$0xff]   ;;  %v14008_v52 = vld [vmem:[%s14273_s23 + $0xf48] sm:$0xff]  }
0x1a11   : > { %13180 = vmatpush3.bf16.msra.mxu0 %v13996_v5  ;;  %13202 = vmatpush3.bf16.msra.mxu1 %v13997_v55  ;;  %v9304_v5 = vcombine.high %v9302_v44, %v9302_v44  ;;  %v14010_v55 = vld [vmem:[%s14273_s23 + $0xf08] sm:$0xff]  }
0x1a12   : > { %13393 = vmatprep.subr.bf16.mxu0 %v14194_v46  ;;  %12298 = vmatprep.subr.msk.bf16.mxu1 %vm928_vm1, %v12295_v60  ;;  %v14015_v60 = vld [vmem:[%s14273_s23 + $0xf90] sm:$0xff]  }
0x1a14   : > { %8952 = vmatmul.mubr.bf16.vlgmr.msra.gmra.mrb[140].mxu0 %v8713_v53  ;;  %8992 = vmatmul.mubr.bf16.vlgmr.msra.gmra.mrb[140].mxu1 %v8721_v56  ;;  %v14009_v53 = vld [vmem:[%s14273_s23 + $0xfc8] sm:$0xff]  }
0x1a15   : > { %13397 = vmatprep.mubr.msk.bf16.mxu0 %vm14195_vm0, %v14194_v46  ;;  %9121 = vmatprep.mubr.bf16.mxu1 %v14196_v9  ;;  %v14011_v56 = vld [vmem:[%s14273_s23 + $0xf88] sm:$0xff]  }
0x1a16   : > { %13394 = vmatpush3.bf16.msra.mxu0 %v13998_v57  ;;  %9090 = vmatpush1.bf16.msra.mxu1 %v9078_v62  ;;  %v14012_v57 = vld [vmem:[%s14273_s23 + $0xf50] sm:$0xff]   ;;  %v14017_v62 = vld [vmem:[%s14273_s23 + $0xfd8] sm:$0xff]  }
0x1a17   : > { %13395 = vmatprep.subr.bf16.mxu0 %v14194_v46  ;;  %13212 = vmatprep.subr.bf16.mxu1 %v14004_v54 }
0x1a1a   : > { %13396 = vmatpush3.bf16.msra.mxu0 %v13999_v58  ;;  %v14013_v58 = vld [vmem:[%s14273_s23 + $0xfd0] sm:$0xff]  }
0x1a1b   : > { %12300 = vmatprep.subr.msk.bf16.mxu0 %vm928_vm1, %v12297_v30 }
0x1ac7   : > { %v8541_v19 = vpop.f32.mrb[136].mxu0  ;;  %v8582_v14 = vpop.f32.mrb[136].mxu1 }
0x1ac8   : > { %v8543_v15 = vpop.f32.mrb[137].mxu0  ;;  %v8584_v63 = vpop.f32.mrb[137].mxu1 }
0x1ac9   : > { %v8593_v0 = vcombine.low %v8541_v19, %v8543_v15  ;;  %v8594_v1 = vcombine.low %v8582_v14, %v8584_v63  ;;  %v8545_v24 = vpop.f32.mrb[138].mxu0  ;;  %v8586_v2 = vpop.f32.mrb[138].mxu1  ;;  %v14018_v19 = vld [vmem:[%s14273_s23 + $0xf18] sm:$0xff]   ;;  %v14020_v15 = vld [vmem:[%s14273_s23 + $0xf60] sm:$0xff]  }
0x1aca   : > { %v8546_v3 = vpop.f32.mrb[139].mxu0  ;;  %v8587_v6 = vpop.f32.mrb[139].mxu1  ;;  %v14019_v14 = vld [vmem:[%s14273_s23 + $0xf98] sm:$0xff]   ;;  %v14021_v63 = vld [vmem:[%s14273_s23 + $0xfe0] sm:$0xff]   ;;  %v14024_v24 = vld [vmem:[%s14273_s23 + $0xf68] sm:$0xff]  }
0x1acb   : > { %v8601_v7 = vrot.slane %v8593_v0, %v14406_v4  ;;  %v8608_v8 = vrot.slane %v8594_v1, %v14406_v4  ;;  %v14022_v0 = vld [vmem:[%s14273_s23 + $0xf20] sm:$0xff]   ;;  %v14025_v2 = vld [vmem:[%s14273_s23 + $0xfe8] sm:$0xff]  }
0x1acc   : > { %v14023_v1 = vld [vmem:[%s14273_s23 + $0xfa0] sm:$0xff]   ;;  %v14026_v3 = vld [vmem:[%s14273_s23 + $0xf28] sm:$0xff]  }
0x1acd   : > { %v8609_v29 = vcombine.low %v8601_v7, %v8608_v8  ;;  %v14027_v6 = vld [vmem:[%s14273_s23 + $0xfa8] sm:$0xff]   ;;  %v14028_v7 = vld [vmem:[%s14273_s23 + $0xf70] sm:$0xff]  }
0x1ace   : > { %v14029_v8 = vld [vmem:[%s14273_s23 + $0xff0] sm:$0xff]  }
0x1acf   : > { %v15248_v10 = vadd.f32 %v8609_v29, %v15184_v48  ;;  %v14030_v29 = vld [vmem:[%s14273_s23 + $0xf30] sm:$0xff]  }
0x1ae7   : > { %v13181_v11 = vpop.f32.mrb[140].mxu0  ;;  %v13203_v13 = vpop.f32.mrb[140].mxu1 }
0x1ae8   : > { %v13182_v18 = vpop.f32.mrb[141].mxu0  ;;  %v13204_v36 = vpop.f32.mrb[141].mxu1 }
0x1ae9   : > { %v13183_v20 = vadd.f32 %v13182_v18, %v13181_v11  ;;  %v13205_v21 = vadd.f32 %v13204_v36, %v13203_v13  ;;  %v13184_v22 = vpop.f32.mrb[142].mxu0  ;;  %v13206_v23 = vpop.f32.mrb[142].mxu1  ;;  %v14031_v11 = vld [vmem:[%s14273_s23 + $0xfb0] sm:$0xff]   ;;  %v14032_v13 = vld [vmem:[%s14273_s23 + $0xf78] sm:$0xff]   ;;  %v9295_v18 = vrot.slane %v15259_v35, %v14332_v40 }
0x1aea   : > { %v13185_v43 = vpop.f32.mrb[143].mxu0  ;;  %v13207_v25 = vpop.f32.mrb[143].mxu1  ;;  %v14034_v36 = vld [vmem:[%s14273_s23 + $0xf38] sm:$0xff]   ;;  %v14036_v40 = vld [vmem:[%s14283_s30 + $0xf0] sm:$0xff]  }
0x1aeb   : > { %v8954_v26 = vadd.f32 %v13183_v20, %v12256_v17  ;;  %v14033_v17 = vld [vmem:[%s14273_s23 + $0xff8] sm:$0xff]   ;;  %v9272_v23 = vld [vmem:[%s14293_s17 + $0xf0] sm:$0xff] }
0x1aec   : > { %v14035_v20 = vld [vmem:[%s14273_s23 + $0xfb8] sm:$0xff]   ;;  %v12412_v25 = vcombine.high %v9272_v23, %v9272_v23 }
0x1aed   : > { %v8994_v27 = vadd.f32 %v13205_v21, %v8954_v26  ;;  %v9303_v21 = vcombine.high %v9295_v18, %v9295_v18  ;;  %v14037_v22 = vld [vmem:[%s14283_s30 + $0xf8] sm:$0xff]  }
0x1aee   : > { %v9273_v43 = vld [vmem:[%s14293_s17 + $0xf8] sm:$0xff] }
0x1aef   : > { %v8999_v48 = vmax.f32 %v8994_v27, 0.0  ;;  %v12414_v26 = vcombine.high %v9273_v43, %v9273_v43  ;;  %v12411_v27 = vcombine.low %v9272_v23, %v9272_v23  ;;  %v14047_v23 = vld [vmem:[%s15619_s7 + $0x100] ss:$8 sps:$4 sm:$0xff] (!%p12419_p5)  }
0x1af1   : > { %v9000_v28 = vpack.c.bf16 %v8999_v48, %v8999_v48  ;;  %v9660_v48 = vsel %vm928_vm1, %v12411_v27, 0  ;;  %v14053_v27 = vld [vmem:[%s15619_s7 + $0x110] ss:$8 sps:$4 sm:$0xff] (!%p12419_p5)  }
0x1af3   : > { %13398 = vmatmul.mubr.msk.bf16.vlgmr.msra.gmra.mrb[144].mxu0 %vm868_vm2, %v9000_v28 }
0x1af4   : > { %9162 = vmatprep.mubr.bf16.mxu0 %v14196_v9  ;;  %9131 = vmatpush1.bf16.msra.mxu0 %v9084_v32 }
0x1af5   : > { %13234 = vmatprep.subr.bf16.mxu0 %v14005_v33 }
0x1bc6   : > { %v9056_v39 = vpop.f32.mrb[144].mxu0 }
0x1bc7   : > { %v9057_v59 = vadd.f32 %v12290_v37, %v9056_v39  ;;  %v13399_v41 = vpop.f32.mrb[145].mxu0 }
0x1bc8   : > { %v9059_v42 = vpop.f32.mrb[146].mxu0 }
0x1bc9   : > { %v9062_v45 = vmax.f32 %v9057_v59, 0.0  ;;  %v13400_v47 = vpop.f32.mrb[147].mxu0 }
0x1bcb   : > { %v9063_v51 = vpack.c.bf16 %v9062_v45, %v9062_v45  ;;  %v12373_v45 = vld [vmem:[%s14278_s26 + $0xf] ss:$0 sm:$0xff] }
0x1bcd   : > { %12299 = vmatmul.mubr.msk.bf16.vlgmr.msra.gmra.mrb[144].mxu1 %vm924_vm3, %v9063_v51  ;;  %12301 = vmatmul.mubr.msk.bf16.vlgmr.msra.gmra.mrb[148].mxu0 %vm924_vm3, %v9063_v51 }
0x1bce   : > { %13213 = vmatpush3.bf16.msra.mxu1 %v14006_v16  ;;  %13235 = vmatpush3.bf16.msra.mxu0 %v14007_v49 }
0x1bcf   : > { %13214 = vmatprep.subr.bf16.mxu1 %v14008_v52  ;;  %13236 = vmatprep.subr.bf16.mxu0 %v14009_v53 }
0x1bd0   : > { %9533 = vmatprep.mubr.bf16.mxu1 %v9302_v44  ;;  %9573 = vmatprep.mubr.bf16.mxu0 %v9304_v5 }
0x1bd2   : > { %13215 = vmatpush3.bf16.msra.mxu1 %v14010_v55  ;;  %13237 = vmatpush3.bf16.msra.mxu0 %v14011_v56 }
0x1bd3   : > { %13216 = vmatprep.subr.bf16.mxu1 %v14012_v57  ;;  %13238 = vmatprep.subr.bf16.mxu0 %v14013_v58  ;;  %v12413_v58 = vcombine.low %v9273_v43, %v9273_v43  ;;  %v14048_v43 = vld [vmem:[%s15619_s7 + $0x14] ss:$8 sps:$4 sm:$0xff] (!%p12419_p5)  }
0x1bd6   : > { %13217 = vmatpush3.bf16.msra.mxu1 %v14014_v12  ;;  %13239 = vmatpush3.bf16.msra.mxu0 %v14015_v60 }
0x1bd7   : > { %13218 = vmatprep.subr.bf16.mxu1 %v14016_v61  ;;  %13240 = vmatprep.subr.bf16.mxu0 %v14017_v62  ;;  %v9666_v61 = vsel %vm928_vm1, %v12413_v58, 0  ;;  %v14096_v58 = vld [vmem:[%s15619_s7 + $0x94] ss:$8 sps:$4 sm:$0xff] (!%p12419_p5)  }
0x1bda   : > { %13219 = vmatpush3.bf16.msra.mxu1 %v14018_v19  ;;  %13241 = vmatpush3.bf16.msra.mxu0 %v14019_v14 }
0x1bdb   : > { %13220 = vmatprep.subr.bf16.mxu1 %v14020_v15  ;;  %13242 = vmatprep.subr.bf16.mxu0 %v14021_v63 }
0x1bde   : > { %13221 = vmatpush3.bf16.msra.mxu1 %v14022_v0  ;;  %13243 = vmatpush3.bf16.msra.mxu0 %v14023_v1 }
0x1bdf   : > { %13222 = vmatprep.subr.bf16.mxu1 %v14024_v24  ;;  %13244 = vmatprep.subr.bf16.mxu0 %v14025_v2 }
0x1be2   : > { %13223 = vmatpush3.bf16.msra.mxu1 %v14026_v3  ;;  %13245 = vmatpush3.bf16.msra.mxu0 %v14027_v6 }
0x1be3   : > { %13224 = vmatprep.subr.bf16.mxu1 %v14028_v7  ;;  %13246 = vmatprep.subr.bf16.mxu0 %v14029_v8 }
0x1be6   : > { %13225 = vmatpush3.bf16.msra.mxu1 %v14030_v29  ;;  %13247 = vmatpush3.bf16.msra.mxu0 %v14031_v11 }
0x1be7   : > { %13226 = vmatprep.subr.bf16.mxu1 %v14032_v13  ;;  %13248 = vmatprep.subr.bf16.mxu0 %v14033_v17 }
0x1bea   : > { %13227 = vmatpush3.bf16.msra.mxu1 %v14034_v36  ;;  %13249 = vmatpush3.bf16.msra.mxu0 %v14035_v20 }
0x1beb   : > { %13401 = vmatprep.subr.bf16.mxu1 %v14194_v46  ;;  %12415 = vmatprep.subr.msk.bf16.mxu0 %vm928_vm1, %v12412_v25  ;;  %v14050_v25 = vld [vmem:[%s15619_s7 + $0x114] ss:$8 sps:$4 sm:$0xff] (!%p12419_p5)  }
0x1bed   : > { %9534 = vmatmul.mubr.bf16.vlgmr.msra.gmra.mrb[148].mxu1 %v9295_v18  ;;  %9574 = vmatmul.mubr.bf16.vlgmr.msra.gmra.mrb[152].mxu0 %v9303_v21  ;;  %v14042_v21 = vld [vmem:[%s15619_s7 + $0x4] ss:$8 sps:$4 sm:$0xff] (!%p12419_p5)  }
0x1bee   : > { %13405 = vmatprep.mubr.msk.bf16.mxu1 %vm14195_vm0, %v14194_v46  ;;  %9703 = vmatprep.mubr.bf16.mxu0 %v14196_v9 }
0x1bef   : > { %13402 = vmatpush3.bf16.msra.mxu1 %v14036_v40  ;;  %9672 = vmatpush1.bf16.msra.mxu0 %v9660_v48  ;;  %v14044_v40 = vld [vmem:[%s15619_s7 + $0x104] ss:$8 sps:$4 sm:$0xff] (!%p12419_p5)  }
0x1bf0   : > { %13403 = vmatprep.subr.bf16.mxu1 %v14194_v46  ;;  %10283 = vmatprep.subr.bf16.mxu0 (!%p12419_p5), %v14044_v40  ;;  %v14054_v48 = vld [vmem:[%s15619_s7 + $0x24] ss:$8 sps:$4 sm:$0xff] (!%p12419_p5)   ;;  %v14120_v40 = vld [vmem:[%s15619_s7 + $0xd4] ss:$8 sps:$4 sm:$0xff] (!%p12419_p5)  }
0x1bf3   : > { %13404 = vmatpush3.bf16.msra.mxu1 %v14037_v22  ;;  %v14046_v22 = vld [vmem:[%s15619_s7] ss:$8 sps:$4 sm:$0xff] (!%p12419_p5)  }
0x1bf4   : > { %12417 = vmatprep.subr.msk.bf16.mxu1 %vm928_vm1, %v12414_v26  ;;  %v14052_v26 = vld [vmem:[%s15619_s7 + $0x10] ss:$8 sps:$4 sm:$0xff] (!%p12419_p5)  }
0x1ca0   : > { %v9123_v28 = vpop.f32.mrb[144].mxu1  ;;  %v9164_v50 = vpop.f32.mrb[148].mxu0 }
0x1ca1   : > { %v9125_v30 = vpop.f32.mrb[145].mxu1  ;;  %v9166_v31 = vpop.f32.mrb[149].mxu0 }
0x1ca2   : > { %v9175_v46 = vcombine.low %v9123_v28, %v9125_v30  ;;  %v9176_v32 = vcombine.low %v9164_v50, %v9166_v31  ;;  %v9127_v54 = vpop.f32.mrb[146].mxu1  ;;  %v9168_v33 = vpop.f32.mrb[150].mxu0  ;;  %v14056_v28 = vld [vmem:[%s15619_s7 + $0x124] ss:$8 sps:$4 sm:$0xff] (!%p12419_p5)   ;;  %v14058_v50 = vld [vmem:[%s15619_s7 + $0x20] ss:$8 sps:$4 sm:$0xff] (!%p12419_p5)  }
0x1ca3   : > { %v9128_v35 = vpop.f32.mrb[147].mxu1  ;;  %v9169_v37 = vpop.f32.mrb[151].mxu0  ;;  %v14059_v30 = vld [vmem:[%s15619_s7 + $0x120] ss:$8 sps:$4 sm:$0xff] (!%p12419_p5)   ;;  %v14060_v31 = vld [vmem:[%s15619_s7 + $0x34] ss:$8 sps:$4 sm:$0xff] (!%p12419_p5)  }
0x1ca4   : > { %v9183_v38 = vrot.slane %v9175_v46, %v14406_v4  ;;  %v9190_v39 = vrot.slane %v9176_v32, %v14406_v4  ;;  %v14062_v46 = vld [vmem:[%s15619_s7 + $0x134] ss:$8 sps:$4 sm:$0xff] (!%p12419_p5)   ;;  %v14064_v32 = vld [vmem:[%s15619_s7 + $0x30] ss:$8 sps:$4 sm:$0xff] (!%p12419_p5)   ;;  %v14066_v33 = vld [vmem:[%s15619_s7 + $0x44] ss:$8 sps:$4 sm:$0xff] (!%p12419_p5)  }
0x1ca5   : > { %v14065_v54 = vld [vmem:[%s15619_s7 + $0x130] ss:$8 sps:$4 sm:$0xff] (!%p12419_p5)   ;;  %v14068_v35 = vld [vmem:[%s15619_s7 + $0x144] ss:$8 sps:$4 sm:$0xff] (!%p12419_p5)   ;;  %v14070_v37 = vld [vmem:[%s15619_s7 + $0x40] ss:$8 sps:$4 sm:$0xff] (!%p12419_p5)  }
0x1ca6   : > { %v9191_v59 = vcombine.low %v9183_v38, %v9190_v39  ;;  %v14071_v38 = vld [vmem:[%s15619_s7 + $0x140] ss:$8 sps:$4 sm:$0xff] (!%p12419_p5)   ;;  %v14072_v39 = vld [vmem:[%s15619_s7 + $0x54] ss:$8 sps:$4 sm:$0xff] (!%p12419_p5)  }
0x1ca8   : > { %v9193_v41 = vadd.f32 %v9191_v59, %v15248_v10  ;;  %v12407_v10 = vld [vmem:[%s14288_s16 + $0xf] ss:$0 sm:$0xff]  ;;  %v14074_v59 = vld [vmem:[%s15619_s7 + $0x154] ss:$8 sps:$4 sm:$0xff] (!%p12419_p5)  }
0x1cc0   : > { %v13228_v42 = vpop.f32.mrb[148].mxu1  ;;  %v13250_v44 = vpop.f32.mrb[152].mxu0 }
0x1cc1   : > { %v13229_v47 = vpop.f32.mrb[149].mxu1  ;;  %v13251_v16 = vpop.f32.mrb[153].mxu0 }
0x1cc2   : > { %v13230_v49 = vadd.f32 %v13229_v47, %v13228_v42  ;;  %v13252_v51 = vadd.f32 %v13251_v16, %v13250_v44  ;;  %v13231_v52 = vpop.f32.mrb[150].mxu1  ;;  %v13253_v53 = vpop.f32.mrb[154].mxu0  ;;  %v14077_v42 = vld [vmem:[%s15619_s7 + $0x150] ss:$8 sps:$4 sm:$0xff] (!%p12419_p5)   ;;  %v14078_v44 = vld [vmem:[%s15619_s7 + $0x64] ss:$8 sps:$4 sm:$0xff] (!%p12419_p5)  }
0x1cc3   : > { %v13232_v5 = vpop.f32.mrb[151].mxu1  ;;  %v13254_v55 = vpop.f32.mrb[155].mxu0  ;;  %v14082_v47 = vld [vmem:[%s15619_s7 + $0x60] ss:$8 sps:$4 sm:$0xff] (!%p12419_p5)   ;;  %v14088_v52 = vld [vmem:[%s15619_s7 + $0x70] ss:$8 sps:$4 sm:$0xff] (!%p12419_p5)  }
0x1cc4   : > { %v9536_v56 = vadd.f32 %v13230_v49, %v12373_v45  ;;  %v14080_v45 = vld [vmem:[%s15619_s7 + $0x164] ss:$8 sps:$4 sm:$0xff] (!%p12419_p5)   ;;  %v14083_v16 = vld [vmem:[%s15619_s7 + $0x160] ss:$8 sps:$4 sm:$0xff] (!%p12419_p5)   ;;  %v14084_v49 = vld [vmem:[%s15619_s7 + $0x74] ss:$8 sps:$4 sm:$0xff] (!%p12419_p5)  }
0x1cc5   : > { %v14089_v53 = vld [vmem:[%s15619_s7 + $0x170] ss:$8 sps:$4 sm:$0xff] (!%p12419_p5)   ;;  %v14090_v5 = vld [vmem:[%s15619_s7 + $0x84] ss:$8 sps:$4 sm:$0xff] (!%p12419_p5)  }
0x1cc6   : > { %v9576_v57 = vadd.f32 %v13252_v51, %v9536_v56  ;;  %v14086_v51 = vld [vmem:[%s15619_s7 + $0x174] ss:$8 sps:$4 sm:$0xff] (!%p12419_p5)   ;;  %v14092_v55 = vld [vmem:[%s15619_s7 + $0x184] ss:$8 sps:$4 sm:$0xff] (!%p12419_p5)   ;;  %v14094_v56 = vld [vmem:[%s15619_s7 + $0x80] ss:$8 sps:$4 sm:$0xff] (!%p12419_p5)  }
0x1cc8   : > { %v9581_v12 = vmax.f32 %v9576_v57, 0.0  ;;  %v14095_v57 = vld [vmem:[%s15619_s7 + $0x180] ss:$8 sps:$4 sm:$0xff] (!%p12419_p5)  }
0x1cca   : > { %v9582_v60 = vpack.c.bf16 %v9581_v12, %v9581_v12  ;;  %v14098_v12 = vld [vmem:[%s15619_s7 + $0x194] ss:$8 sps:$4 sm:$0xff] (!%p12419_p5)  }
0x1ccc   : > { %13406 = vmatmul.mubr.msk.bf16.vlgmr.msra.gmra.mrb[152].mxu1 %vm868_vm2, %v9582_v60  ;;  %v14100_v60 = vld [vmem:[%s15619_s7 + $0x90] ss:$8 sps:$4 sm:$0xff] (!%p12419_p5)  }
0x1ccd   : > { %9713 = vmatpush1.bf16.msra.mxu1 %v9666_v61  ;;  %9744 = vmatprep.mubr.bf16.mxu1 %v14196_v9  ;;  %v14101_v61 = vld [vmem:[%s15619_s7 + $0x190] ss:$8 sps:$4 sm:$0xff] (!%p12419_p5)  }
0x1cce   : > { %10242 = vmatprep.subr.bf16.mxu1 (!%p12419_p5), %v14042_v21 }
0x1d9f   : > { %v9638_v62 = vpop.f32.mrb[152].mxu1 }
0x1da0   : > { %v9639_v19 = vadd.f32 %v12407_v10, %v9638_v62  ;;  %v13407_v14 = vpop.f32.mrb[153].mxu1  ;;  %v14102_v10 = vld [vmem:[%s15619_s7 + $0xa4] ss:$8 sps:$4 sm:$0xff] (!%p12419_p5)  }
0x1da1   : > { %v9641_v15 = vpop.f32.mrb[154].mxu1  ;;  %v14104_v62 = vld [vmem:[%s15619_s7 + $0x1a4] ss:$8 sps:$4 sm:$0xff] (!%p12419_p5)   ;;  %v14107_v14 = vld [vmem:[%s15619_s7 + $0x1a0] ss:$8 sps:$4 sm:$0xff] (!%p12419_p5)  }
0x1da2   : > { %v9644_v63 = vmax.f32 %v9639_v19, 0.0  ;;  %v13408_v0 = vpop.f32.mrb[155].mxu1  ;;  %v14106_v19 = vld [vmem:[%s15619_s7 + $0xa0] ss:$8 sps:$4 sm:$0xff] (!%p12419_p5)   ;;  %v9786_v15 = vsub.s32 (!%p12419_p5), 0, %v14328_v34 }
0x1da3   : > { %v9790_v0 = vsub.s32 (!%p12419_p5), 1, %v14328_v34 }
0x1da4   : > { %v9645_v1 = vpack.c.bf16 %v9644_v63, %v9644_v63  ;;  %v14108_v63 = vld [vmem:[%s15619_s7 + $0xb4] ss:$8 sps:$4 sm:$0xff] (!%p12419_p5)  }
0x1da6   : > { %12416 = vmatmul.mubr.msk.bf16.vlgmr.msra.gmra.mrb[156].mxu0 %vm924_vm3, %v9645_v1  ;;  %12418 = vmatmul.mubr.msk.bf16.vlgmr.msra.gmra.mrb[156].mxu1 %vm924_vm3, %v9645_v1  ;;  %v9794_v1 = vsub.s32 (!%p12419_p5), 2, %v14328_v34 }
0x1da7   : > { %10243 = vmatpush1.bf16.msra.mxu1 (!%p12419_p5), %v14046_v22  ;;  %10284 = vmatpush1.bf16.msra.mxu0 (!%p12419_p5), %v14047_v23  ;;  %v14122_v23 = vld [vmem:[%s15619_s7 + $0x1d4] ss:$8 sps:$4 sm:$0xff] (!%p12419_p5)  }
0x1da8   : > { %10244 = vmatprep.subr.bf16.mxu1 (!%p12419_p5), %v14048_v43  ;;  %10285 = vmatprep.subr.bf16.mxu0 (!%p12419_p5), %v14050_v25  ;;  %v14124_v25 = vld [vmem:[%s15619_s7 + $0xd0] ss:$8 sps:$4 sm:$0xff] (!%p12419_p5)  }
0x1dab   : > { %10245 = vmatpush1.bf16.msra.mxu1 (!%p12419_p5), %v14052_v26  ;;  %10286 = vmatpush1.bf16.msra.mxu0 (!%p12419_p5), %v14053_v27  ;;  %v14125_v27 = vld [vmem:[%s15619_s7 + $0x1d0] ss:$8 sps:$4 sm:$0xff] (!%p12419_p5)  }
0x1dac   : > { %10246 = vmatprep.subr.bf16.mxu1 (!%p12419_p5), %v14054_v48  ;;  %10287 = vmatprep.subr.bf16.mxu0 (!%p12419_p5), %v14056_v28  ;;  %v14126_v28 = vld [vmem:[%s15619_s7 + $0xe4] ss:$8 sps:$4 sm:$0xff] (!%p12419_p5)  }
0x1daf   : > { %10247 = vmatpush1.bf16.msra.mxu1 (!%p12419_p5), %v14058_v50  ;;  %10288 = vmatpush1.bf16.msra.mxu0 (!%p12419_p5), %v14059_v30  ;;  %v14128_v50 = vld [vmem:[%s15619_s7 + $0x1e4] ss:$8 sps:$4 sm:$0xff] (!%p12419_p5)  }
0x1db0   : > { %10248 = vmatprep.subr.bf16.mxu1 (!%p12419_p5), %v14060_v31  ;;  %10289 = vmatprep.subr.bf16.mxu0 (!%p12419_p5), %v14062_v46  ;;  %v14130_v31 = vld [vmem:[%s15619_s7 + $0xe0] ss:$8 sps:$4 sm:$0xff] (!%p12419_p5)  }
0x1db1   : > { %v14131_v46 = vld [vmem:[%s15619_s7 + $0x1e0] ss:$8 sps:$4 sm:$0xff] (!%p12419_p5)  }
0x1db3   : > { %10249 = vmatpush1.bf16.msra.mxu1 (!%p12419_p5), %v14064_v32  ;;  %10290 = vmatpush1.bf16.msra.mxu0 (!%p12419_p5), %v14065_v54  ;;  %v14132_v32 = vld [vmem:[%s15619_s7 + $0xf4] ss:$8 sps:$4 sm:$0xff] (!%p12419_p5)  }
0x1db4   : > { %10250 = vmatprep.subr.bf16.mxu1 (!%p12419_p5), %v14066_v33  ;;  %10291 = vmatprep.subr.bf16.mxu0 (!%p12419_p5), %v14068_v35  ;;  %v14134_v54 = vld [vmem:[%s15619_s7 + $0x1f4] ss:$8 sps:$4 sm:$0xff] (!%p12419_p5)  }
0x1db7   : > { %10251 = vmatpush1.bf16.msra.mxu1 (!%p12419_p5), %v14070_v37  ;;  %10292 = vmatpush1.bf16.msra.mxu0 (!%p12419_p5), %v14071_v38 }
0x1db8   : > { %10252 = vmatprep.subr.bf16.mxu1 (!%p12419_p5), %v14072_v39  ;;  %10293 = vmatprep.subr.bf16.mxu0 (!%p12419_p5), %v14074_v59  ;;  %v14136_v59 = vld [vmem:[%s15619_s7 + $0xf0] ss:$8 sps:$4 sm:$0xff] (!%p12419_p5)  }
0x1dbb   : > { %10294 = vmatpush1.bf16.msra.mxu0 (!%p12419_p5), %v14077_v42 }
0x1dbc   : > { %10295 = vmatprep.subr.bf16.mxu0 (!%p12419_p5), %v14080_v45  ;;  %v14138_v45 = vld [vmem:[%s15621_s9 + $0x40] sm:$0xff] (!%p12419_p5)  }
0x1dbf   : > { %10296 = vmatpush1.bf16.msra.mxu0 (!%p12419_p5), %v14083_v16 }
0x1dc0   : > { %10297 = vmatprep.subr.bf16.mxu0 (!%p12419_p5), %v14086_v51  ;;  %v14140_v51 = vld [vmem:[%s15621_s9 + $0x48] sm:$0xff] (!%p12419_p5)  }
0x1dc3   : > { %10298 = vmatpush1.bf16.msra.mxu0 (!%p12419_p5), %v14089_v53  ;;  %v14142_v53 = vld [vmem:[%s15621_s9 + $0x50] sm:$0xff] (!%p12419_p5)  }
0x1dc4   : > { %10299 = vmatprep.subr.bf16.mxu0 (!%p12419_p5), %v14092_v55  ;;  %v14144_v55 = vld [vmem:[%s15621_s9 + $0x58] sm:$0xff] (!%p12419_p5)  }
0x1dc7   : > { %10300 = vmatpush1.bf16.msra.mxu0 (!%p12419_p5), %v14095_v57  ;;  %v14146_v57 = vld [vmem:[%s15621_s9 + $0x60] sm:$0xff] (!%p12419_p5)  }
0x1dc8   : > { %10301 = vmatprep.subr.bf16.mxu0 (!%p12419_p5), %v14098_v12  ;;  %v14148_v12 = vld [vmem:[%s15621_s9 + $0x68] sm:$0xff] (!%p12419_p5)  }
0x1dcb   : > { %10302 = vmatpush1.bf16.msra.mxu0 (!%p12419_p5), %v14101_v61  ;;  %v14150_v61 = vld [vmem:[%s15621_s9 + $0x70] sm:$0xff] (!%p12419_p5)  }
0x1dcc   : > { %10303 = vmatprep.subr.bf16.mxu0 (!%p12419_p5), %v14104_v62  ;;  %v14152_v62 = vld [vmem:[%s15621_s9 + $0x78] sm:$0xff] (!%p12419_p5)  }
0x1dcf   : > { %10304 = vmatpush1.bf16.msra.mxu0 (!%p12419_p5), %v14107_v14  ;;  %v9910_v14 = vld [vmem:[%s15620_s8] sm:$0x3] (!%p12419_p5) }
0x1e79   : > { %v9705_v24 = vpop.f32.mrb[156].mxu0  ;;  %v9746_v2 = vpop.f32.mrb[156].mxu1 }
0x1e7a   : > { %v9707_v3 = vpop.f32.mrb[157].mxu0  ;;  %v9748_v6 = vpop.f32.mrb[157].mxu1 }
0x1e7b   : > { %v9757_v7 = vcombine.low %v9705_v24, %v9707_v3  ;;  %v9758_v8 = vcombine.low %v9746_v2, %v9748_v6  ;;  %v9709_v29 = vpop.f32.mrb[158].mxu0  ;;  %v9750_v9 = vpop.f32.mrb[158].mxu1  ;;  %v14110_v24 = vld [vmem:[%s15619_s7 + $0x1b4] ss:$8 sps:$4 sm:$0xff] (!%p12419_p5)   ;;  %v9798_v2 = vsub.s32 (!%p12419_p5), 3, %v14328_v34 }
0x1e7c   : > { %v9710_v11 = vpop.f32.mrb[159].mxu0  ;;  %v9751_v13 = vpop.f32.mrb[159].mxu1  ;;  %v14112_v3 = vld [vmem:[%s15619_s7 + $0xb0] ss:$8 sps:$4 sm:$0xff] (!%p12419_p5)   ;;  %10305 = vmatprep.subr.bf16.mxu0 (!%p12419_p5), %v14110_v24 }
0x1e7d   : > { %v9765_v17 = vrot.slane %v9757_v7, %v14406_v4  ;;  %v9772_v18 = vrot.slane %v9758_v8, %v14406_v4  ;;  %9780 = sbr.rel (%p12419_p5) target bundleno = 8295 (0x2067), region = 68  ;;  %v14113_v6 = vld [vmem:[%s15619_s7 + $0x1b0] ss:$8 sps:$4 sm:$0xff] (!%p12419_p5)   ;;  %v9782_v7 = vld [vmem:[%s15618_s6] sm:$0xf] (!%p12419_p5) }
0x1e7e   : > { %v14114_v8 = vld [vmem:[%s15619_s7 + $0xc4] ss:$8 sps:$4 sm:$0xff] (!%p12419_p5)   ;;  %v9787_v29 = vrot.slane (!%p12419_p5), %v9782_v7, %v9786_v15  ;;  %v9791_v9 = vrot.slane (!%p12419_p5), %v9782_v7, %v9790_v0  ;;  %v9795_v11 = vrot.slane (!%p12419_p5), %v9782_v7, %v9794_v1  ;;  %10306 = vmatpush1.bf16.msra.mxu0 (!%p12419_p5), %v14113_v6  ;;  %v9919_v1 = vrot.slane (!%p12419_p5), %v9910_v14, %v9790_v0 }
0x1e7f   : > { %v9773_v36 = vcombine.low %v9765_v17, %v9772_v18  ;;  %v14116_v13 = vld [vmem:[%s15619_s7 + $0x1c4] ss:$8 sps:$4 sm:$0xff] (!%p12419_p5)   ;;  %v9799_v17 = vrot.slane (!%p12419_p5), %v9782_v7, %v9798_v2  ;;  %v14118_v18 = vld [vmem:[%s15619_s7 + $0xc0] ss:$8 sps:$4 sm:$0xff] (!%p12419_p5)  }
0x1e80   : > { %10307 = vmatprep.subr.bf16.mxu0 (!%p12419_p5), %v14116_v13 }
0x1e81   : > { %v9775_v20 = vadd.f32 %v9773_v36, %v9193_v41  ;;  %v14076_v41 = vld [vmem:[%s15619_s7 + $0x50] ss:$8 sps:$4 sm:$0xff] (!%p12419_p5)   ;;  %v9800_v36 = vcombine.low (!%p12419_p5), %v9787_v29, %v9791_v9  ;;  %v9801_v21 = vcombine.low (!%p12419_p5), %v9795_v11, %v9799_v17 }
0x1e82   : > { %10253 = vmatpush1.bf16.msra.mxu1 (!%p12419_p5), %v14076_v41  ;;  %v14137_v41 = vld [vmem:[%s15619_s7 + $0x1f0] ss:$8 sps:$4 sm:$0xff] (!%p12419_p5)  }
0x1e83   : > { %9776 = vst [vmem:[#allocation2] sm:$0xff] %v9775_v20  ;;  %10254 = vmatprep.subr.bf16.mxu1 (!%p12419_p5), %v14078_v44  ;;  %v14119_v20 = vld [vmem:[%s15619_s7 + $0x1c0] ss:$8 sps:$4 sm:$0xff] (!%p12419_p5)   ;;  %v9808_v22 = vrot.slane (!%p12419_p5), %v9800_v36, %v14406_v4  ;;  %v9815_v43 = vrot.slane (!%p12419_p5), %v9801_v21, %v14406_v4 }
0x1e84   : > { %10308 = vmatpush1.bf16.msra.mxu0 %v14119_v20 }
0x1e85   : > { %v9816_v48 = vcombine.low %v9808_v22, %v9815_v43  ;;  %10309 = vmatprep.subr.bf16.mxu0 %v14122_v23 }
0x1e86   : > { %10255 = vmatpush1.bf16.msra.mxu1 %v14082_v47 }
0x1e87   : > { %10256 = vmatprep.subr.bf16.mxu1 %v14084_v49  ;;  %v14139_v49 = vld [vmem:[%s15621_s9] sm:$0xff]  }
0x1e88   : > { %10310 = vmatpush1.bf16.msra.mxu0 %v14125_v27 }
0x1e89   : > { %10311 = vmatprep.subr.bf16.mxu0 %v14128_v50 }
0x1e8a   : > { %10257 = vmatpush1.bf16.msra.mxu1 %v14088_v52  ;;  %v9781_v26 = vld [vmem:[#allocation2] sm:$0xff]  ;;  %v14141_v52 = vld [vmem:[%s15621_s9 + $0x8] sm:$0xff]  }
0x1e8b   : > { %10258 = vmatprep.subr.bf16.mxu1 %v14090_v5  ;;  %v9818_v30 = vadd.f32 %v9816_v48, %v9781_v26  ;;  %v14143_v5 = vld [vmem:[%s15621_s9 + $0x10] sm:$0xff]  }
0x1e8c   : > { %10312 = vmatpush1.bf16.msra.mxu0 %v14131_v46 }
0x1e8d   : > { %v9819_v33 = vmax.f32 %v9818_v30, 0.0  ;;  %10313 = vmatprep.subr.bf16.mxu0 %v14134_v54 }
0x1e8e   : > { %10259 = vmatpush1.bf16.msra.mxu1 %v14094_v56  ;;  %v14145_v56 = vld [vmem:[%s15621_s9 + $0x18] sm:$0xff]  }
0x1e8f   : > { %10260 = vmatprep.subr.bf16.mxu1 %v14096_v58  ;;  %v9828_v35 = vrot.slane %v9819_v33, %v14406_v4  ;;  %v9821_v37 = vcombine.high %v9819_v33, %v9819_v33  ;;  %v14147_v58 = vld [vmem:[%s15621_s9 + $0x20] sm:$0xff]  }
0x1e90   : > { %10314 = vmatpush1.bf16.msra.mxu0 %v14137_v41 }
0x1e91   : > { %v9836_v38 = vcombine.high %v9828_v35, %v9828_v35  ;;  %v9835_v39 = vrot.slane %v9821_v37, %v14406_v4  ;;  %v9842_v47 = vpack.c.bf16 %v9828_v35, %v9828_v35 }
0x1e92   : > { %10261 = vmatpush1.bf16.msra.mxu1 %v14100_v60  ;;  %v14149_v60 = vld [vmem:[%s15621_s9 + $0x28] sm:$0xff]  }
0x1e93   : > { %10262 = vmatprep.subr.bf16.mxu1 %v14102_v10  ;;  %v9843_v42 = vpack.c.bf16 %v9836_v38, %v9836_v38  ;;  %v9837_v44 = vcombine.high %v9835_v39, %v9835_v39  ;;  %v9844_v16 = vpack.c.bf16 %v9835_v39, %v9835_v39  ;;  %v14151_v10 = vld [vmem:[%s15621_s9 + $0x30] sm:$0xff]  }
0x1e95   : > { %10274 = vmatprep.mubr.bf16.mxu1 %v9843_v42  ;;  %v9845_v4 = vpack.c.bf16 %v9837_v44, %v9837_v44 }
0x1e96   : > { %10263 = vmatpush1.bf16.msra.mxu1 %v14106_v19  ;;  %v14153_v19 = vld [vmem:[%s15621_s9 + $0x38] sm:$0xff]  }
0x1e97   : > { %10264 = vmatprep.subr.bf16.mxu1 %v14108_v63  ;;  %10315 = vmatprep.mubr.bf16.mxu0 %v9845_v4  ;;  %v9915_v63 = vrot.slane %v9910_v14, %v9786_v15 }
0x1e98   : > { %10316 = vmatmul.mubr.bf16.vlgmr.msra.gmra.mrb[0].mxu0 %v9844_v16 }
0x1e9a   : > { %10265 = vmatpush1.bf16.msra.mxu1 %v14112_v3 }
0x1e9b   : > { %10266 = vmatprep.subr.bf16.mxu1 %v14114_v8 }
0x1e9e   : > { %10267 = vmatpush1.bf16.msra.mxu1 %v14118_v18 }
0x1e9f   : > { %10268 = vmatprep.subr.bf16.mxu1 %v14120_v40 }
0x1ea2   : > { %10269 = vmatpush1.bf16.msra.mxu1 %v14124_v25 }
0x1ea3   : > { %10270 = vmatprep.subr.bf16.mxu1 %v14126_v28 }
0x1ea6   : > { %10271 = vmatpush1.bf16.msra.mxu1 %v14130_v31 }
0x1ea7   : > { %10272 = vmatprep.subr.bf16.mxu1 %v14132_v32 }
0x1eaa   : > { %10273 = vmatpush1.bf16.msra.mxu1 %v14136_v59 }
0x1eab   : > { %13259 = vmatprep.subr.bf16.mxu1 %v14138_v45 }
0x1ead   : > { %10275 = vmatmul.mubr.bf16.vlgmr.msra.gmra.mrb[0].mxu1 %v9842_v47 }
0x1eae   : > { %13260 = vmatpush3.bf16.msra.mxu1 %v14139_v49 }
0x1eaf   : > { %13261 = vmatprep.subr.bf16.mxu1 %v14140_v51 }
0x1eb2   : > { %13262 = vmatpush3.bf16.msra.mxu1 %v14141_v52 }
0x1eb3   : > { %13263 = vmatprep.subr.bf16.mxu1 %v14142_v53 }
0x1eb6   : > { %13264 = vmatpush3.bf16.msra.mxu1 %v14143_v5 }
0x1eb7   : > { %13265 = vmatprep.subr.bf16.mxu1 %v14144_v55 }
0x1eba   : > { %13266 = vmatpush3.bf16.msra.mxu1 %v14145_v56 }
0x1ebb   : > { %13267 = vmatprep.subr.bf16.mxu1 %v14146_v57 }
0x1ebe   : > { %13268 = vmatpush3.bf16.msra.mxu1 %v14147_v58 }
0x1ebf   : > { %13269 = vmatprep.subr.bf16.mxu1 %v14148_v12 }
0x1ec2   : > { %13270 = vmatpush3.bf16.msra.mxu1 %v14149_v60 }
0x1ec3   : > { %13271 = vmatprep.subr.bf16.mxu1 %v14150_v61 }
0x1ec6   : > { %13272 = vmatpush3.bf16.msra.mxu1 %v14151_v10 }
0x1ec7   : > { %13273 = vmatprep.subr.bf16.mxu1 %v14152_v62 }
0x1eca   : > { %13274 = vmatpush3.bf16.msra.mxu1 %v14153_v19 }
0x1f6b   : > { %v10317_v2 = vpop.f32.mrb[0].mxu0 }
0x1f6c   : > { %v10319_v7 = vpop.f32.mrb[1].mxu0 }
0x1f6d   : > { %v10321_v9 = vpop.f32.mrb[2].mxu0 }
0x1f6e   : > { %v10322_v17 = vpop.f32.mrb[3].mxu0 }
0x1f80   : > { %v10276_v24 = vpop.f32.mrb[0].mxu1 }
0x1f81   : > { %v10277_v3 = vadd.f32 %v10276_v24, %v9915_v63  ;;  %v10278_v6 = vpop.f32.mrb[1].mxu1 }
0x1f82   : > { %v10279_v8 = vadd.f32 %v10278_v6, %v9919_v1  ;;  %v10280_v29 = vpop.f32.mrb[2].mxu1 }
0x1f83   : > { %v10318_v11 = vadd.f32 %v10317_v2, %v10277_v3  ;;  %v10281_v13 = vpop.f32.mrb[3].mxu1 }
0x1f84   : > { %v10320_v18 = vadd.f32 %v10319_v7, %v10279_v8 }
0x1f85   : > { %v10324_v36 = vmax.f32 %v10318_v11, 0.0 }
0x1f86   : > { %v10325_v20 = vmax.f32 %v10320_v18, 0.0 }
0x1f87   : > { %v10326_v40 = vpack.c.bf16 %v10324_v36, %v10324_v36 }
0x1f88   : > { %v10327_v21 = vpack.c.bf16 %v10325_v20, %v10325_v20 }
0x1f8a   : > { %10488 = vmatprep.mubr.bf16.mxu1 %v10327_v21 }
0x1f8b   : > { %10489 = vmatmul.mubr.bf16.vlgmr.msra.gmra.mrb[4].mxu1 %v10326_v40 }
0x205e   : > { %v13275_v34 = vpop.f32.mrb[4].mxu1 }
0x205f   : > { %v13276_v15 = vpop.f32.mrb[5].mxu1 }
0x2060   : > { %v13277_v0 = vadd.f32 %v13276_v15, %v13275_v34  ;;  %v13278_v22 = vpop.f32.mrb[6].mxu1 }
0x2061   : > { %v13279_v23 = vpop.f32.mrb[7].mxu1 }
0x2062   : > { %v10496_v43 = vmax.f32 %v13277_v0, 0.0 }
0x2064   : > { %v10497_v25 = vmin.f32 %v10496_v43, 6.0 }
0x2066   : > { %10499 = vst.msk [vmem:[#allocation3] sm:$0x3] %vm10498_vm4, %v10497_v25 }
0x2067 PF: > { %p13417_p6 = scmp.eq.s32.totalorder %s14260_s14, 1  ;;  %s14198_s21 = smov [#allocation3]  }
0x2068   : > { %s10507_s22 = sshll.u32 %s14198_s21, 4  ;;  %s10508_s22 = int_to_ptr.vmem [resolvable:$true] %s10507_s22 }
0x2069   : > { %s14154_s23 = scalar_lea.vmem %s10508_s22, 32  ;;  %p14161_p10 = scmp.lt.s32.totalorder %s10508_s22, %s10508_s22 }
0x206a   : > { %p14155_p7 = scmp.ne.s32.totalorder %s10508_s22, %s14154_s23  ;;  %p14162_p11 = scmp.lt.s32.totalorder %s14154_s23, %s14154_s23 }
0x206c   : > { %p14156_p8 = pnand %p14155_p7, %p13417_p6  ;;  %p14163_p12 = por %p14162_p11, %p14161_p10 }
0x206e   : > { %p14157_p9 = pneg %p14156_p8 }
0x2070   : > { %p14164_p13 = pnand %p14163_p12, %p14157_p9 }
0x2072   : > { %14167 = shalt.err (!%p14164_p13)
}
0x2073   : > { %s14168_s26 = scalar_lea.hbm %s15622_s10, 32 }
0x2074   : > { %p14169_p0 = scmp.ne.s32.totalorder %s15622_s10, %s14168_s26  ;;  %p14174_p3 = scmp.lt.u32.totalorder %s14168_s26, %s15622_s10 }
0x2076   : > { %p14170_p1 = pnand %p14169_p0, %p13417_p6 }
0x2078   : > { %p14171_p2 = pneg %p14170_p1 }
0x207a   : > { %p14176_p4 = pnand %p14174_p3, %p14171_p2 }
0x207c   : > { %14179 = shalt.err (!%p14176_p4)
}
0x207d   : > { %13414 = dma.vmem_to_hbm [thread:$0]  (%p13417_p6), %s10508_s22, 32, %s15622_s10, [#allocation4]  }
0x207e   : > { %14185 = dma.done.wait (%p13417_p6), [#allocation4], 32  }
0x207f   : > { %14187 = vsyncadd (%p13417_p6), [#allocation4], 4294967264 }
0x2080 PF: > { %s21_s13 = sadd.s32 1, %s14190_s13  }
0x2081   : > { %p18_p5 = scmp.ge.s32.totalorder %s21_s13, 4  }
0x2083   :  { %20 = sbr.rel (!%p18_p5) target bundleno = 1 (0x1), region = 185 }
0x208a   :  { %10520 = vsyncpa [#allocation4], 1 }
0x208b   :  { %10522 = vsyncpa [#allocation4 + $0x1], 1 }

</bundles_post_ra>
